<compile_context>
chip_gen: v5e
topology: v5e:2x2
jax: 0.10.0
libtpu: 0.0.40
codegen_flags: <defaults>
</compile_context>

<pallas_src>
import functools

import jax
import jax.numpy as jnp
from jax import lax
from jax.experimental import pallas as pl
from jax.experimental.pallas import tpu as pltpu


# dot_general dimension numbers.
_NT = (((1,), (1,)), ((), ()))    # (1,X)·(Y,X) -> (1,Y)   contract last dims
_NN = (((1,), (0,)), ((), ()))    # (1,X)·(X,Y) -> (1,Y)   standard matmul
_COLS = (((0,), (0,)), ((), ()))  # (3,N)·(3,M) -> (N,M)   contract leading (coord) dim

# Annealing temperature schedule of the CUDA approxmatch kernel:
#   level = -4^j for j = 7..-1, then level = 0 for the final pass (10 levels total).
_LEVELS = tuple(-(4.0 ** j) for j in range(7, -2, -1)) + (0.0,)


def _emd_kernel(xyz1t_ref, xyz2t_ref, cost_ref, *, bt, n, m, multiL, multiR):
    """One batch tile (bt elements) per grid step.

    xyz1t_ref : (bt, 3, N)  VMEM, lane-dense along N
    xyz2t_ref : (bt, 3, M)  VMEM, lane-dense along M
    cost_ref  : (1, bt, 1)  VMEM, per-step output block (batch axis is parallel)
    """
    ones3 = jnp.ones((3, 1), jnp.float32)

    @pl.loop(0, bt)
    def _(bi):
        p1t = xyz1t_ref[bi]   # (3, N)
        p2t = xyz2t_ref[bi]   # (3, M)

        # Pairwise squared distances on the MXU: d2 = |p1|^2 + |p2|^2 - 2 p1·p2.
        cross = lax.dot_general(p1t, p2t, _COLS,
                                preferred_element_type=jnp.float32)          # (N, M)
        n1 = lax.dot_general(p1t * p1t, ones3, _COLS,
                             preferred_element_type=jnp.float32)              # (N, 1)
        n2 = jnp.sum(p2t * p2t, axis=0, keepdims=True)                        # (1, M)
        d2 = jnp.maximum(n1 + n2 - 2.0 * cross, 0.0)   # clamp cancellation
        sqrt_d2 = jnp.sqrt(d2)   # the only (N, M) f32 array kept live across levels

        remainL = jnp.full((1, n), multiL, jnp.float32)
        remainR = jnp.full((1, m), multiR, jnp.float32)
        cost = jnp.zeros((1, 1), jnp.float32)

        # 10-level annealing loop, fully unrolled with static level constants.
        for level in _LEVELS:
            if level == 0.0:
                k32 = jnp.ones_like(sqrt_d2)
            else:
                # d2 recomputed from sqrt_d2 (one extra VALU mul) so d2 itself is dead.
                k32 = jnp.exp(level * (sqrt_d2 * sqrt_d2))                    # (N, M) f32
            kb = k32.astype(jnp.bfloat16)                                     # MXU operands
            dkb = (sqrt_d2 * k32).astype(jnp.bfloat16)

            # suml[k] = 1e-9 + sum_l K[k,l] * remainR[l]      (MXU matvec, f32 acc)
            suml = lax.dot_general(remainR.astype(jnp.bfloat16), kb, _NT,
                                   preferred_element_type=jnp.float32) + 1e-9  # (1, N)
            ratioL = remainL / suml

            # sumr[l] = (sum_k K[k,l] * ratioL[k]) * remainR[l]
            sumr = lax.dot_general(ratioL.astype(jnp.bfloat16), kb, _NN,
                                   preferred_element_type=jnp.float32) * remainR  # (1, M)
            consumption = jnp.minimum(remainR / (sumr + 1e-9), 1.0)
            ratioR = consumption * remainR
            remainR = jnp.maximum(0.0, remainR - sumr)

            # w[k,l] = K * ratioL[k] * ratioR[l] is never materialized:
            #   sum_l w[k,l]             = ratioL[k] * (K @ ratioR)[k]
            #   sum_{k,l} sqrt_d2 * w    = sum_k ratioL[k] * ((sqrt_d2*K) @ ratioR)[k]
            ratioR_b = ratioR.astype(jnp.bfloat16)
            rowk = lax.dot_general(ratioR_b, kb, _NT,
                                   preferred_element_type=jnp.float32)        # (1, N)
            rowc = lax.dot_general(ratioR_b, dkb, _NT,
                                   preferred_element_type=jnp.float32)        # (1, N)
            remainL = jnp.maximum(0.0, remainL - ratioL * rowk)
            cost = cost + jnp.sum(ratioL * rowc, axis=1, keepdims=True)

        cost_ref[0, pl.ds(bi, 1), :] = cost


def _pick_bt(b):
    for bt in (8, 4, 2):
        if b % bt == 0:
            return bt
    return 1


def emd_pallas(xyz1, xyz2):
    """Forward EMD cost. xyz1: (B, N, 3), xyz2: (B, M, 3) -> cost: (B,) float32."""
    xyz1 = xyz1.astype(jnp.float32)
    xyz2 = xyz2.astype(jnp.float32)
    b, n, d = xyz1.shape
    _, m, _ = xyz2.shape
    assert d == 3

    # Matches CUDA integer-division semantics: multiR = n/m (int), etc.
    if n >= m:
        multiL, multiR = 1.0, float(n // m)
    else:
        multiL, multiR = float(m // n), 1.0

    bt = _pick_bt(b)
    nt = b // bt

    # Lane-dense layouts: coordinate axis (3) on sublanes, points on lanes.
    xyz1_t = jnp.transpose(xyz1, (0, 2, 1))   # (B, 3, N)
    xyz2_t = jnp.transpose(xyz2, (0, 2, 1))   # (B, 3, M)

    kernel = functools.partial(_emd_kernel, bt=bt, n=n, m=m,
                               multiL=multiL, multiR=multiR)

    # VMEM budget: ~16 B/element of (N,M) working set (sqrt_d2 + transient exp in f32,
    # K/dK in bf16) + double-buffered lane-dense input blocks + margin; clamped to the
    # actual chip's VMEM capacity (v7x: 64 MiB per TensorCore, v5e/v6e: 128 MiB).
    def rup(x, k):
        return (x + k - 1) // k * k

    work_bytes = 16 * n * m
    in_bytes = 2 * bt * 8 * rup(n, 128) * 4 + 2 * bt * 8 * rup(m, 128) * 4
    need = work_bytes + in_bytes + (4 << 20)
    try:
        phys = int(pltpu.get_tpu_info().vmem_capacity_bytes)
    except Exception:
        phys = 64 << 20
    cap = max(32 << 20, phys - (16 << 20))
    vmem_limit = int(min(max(need, 32 << 20), cap))

    cost = pl.pallas_call(
        kernel,
        out_shape=jax.ShapeDtypeStruct((nt, bt, 1), jnp.float32),
        grid_spec=pltpu.PrefetchScalarGridSpec(
            num_scalar_prefetch=0,
            grid=(nt,),
            in_specs=[
                pl.BlockSpec((bt, 3, n), lambda i: (i, 0, 0)),
                pl.BlockSpec((bt, 3, m), lambda i: (i, 0, 0)),
            ],
            out_specs=pl.BlockSpec((1, bt, 1), lambda i: (i, 0, 0)),
        ),
        compiler_params=pltpu.CompilerParams(
            dimension_semantics=("parallel",),
            vmem_limit_bytes=vmem_limit,
        ),
    )(xyz1_t, xyz2_t)
    return cost.reshape(b)


def emd_reference(xyz1, xyz2):
    """Pure-JAX f32 reference of the same approxmatch + matchcost algorithm."""
    xyz1 = xyz1.astype(jnp.float32)
    xyz2 = xyz2.astype(jnp.float32)
    b, n, _ = xyz1.shape
    m = xyz2.shape[1]
    if n >= m:
        multiL, multiR = 1.0, float(n // m)
    else:
        multiL, multiR = float(m // n), 1.0

    def one(p1, p2):
        diff = p1[:, None, :] - p2[None, :, :]
        d2 = jnp.sum(diff * diff, axis=-1)                  # (N, M)
        remainL = jnp.full((n, 1), multiL, jnp.float32)
        remainR = jnp.full((1, m), multiR, jnp.float32)
        match = jnp.zeros((n, m), jnp.float32)
        for j in range(7, -3, -1):
            level = 0.0 if j == -2 else -float(4.0 ** j)
            K = jnp.exp(level * d2)
            suml = 1e-9 + jnp.sum(K * remainR, axis=1, keepdims=True)
            ratioL = remainL / suml
            sumr = jnp.sum(K * ratioL, axis=0, keepdims=True) * remainR
            consumption = jnp.minimum(remainR / (sumr + 1e-9), 1.0)
            ratioR = consumption * remainR
            remainR = jnp.maximum(0.0, remainR - sumr)
            w = K * ratioL * ratioR
            match = match + w
            remainL = jnp.maximum(0.0, remainL - jnp.sum(w, axis=1, keepdims=True))
        return jnp.sum(jnp.sqrt(d2) * match)

    return jax.vmap(one)(xyz1, xyz2)


if __name__ == "__main__":
    key = jax.random.PRNGKey(0)
    k1, k2 = jax.random.split(key)
    B, N, M = 2, 64, 32
    xyz1 = jax.random.normal(k1, (B, N, 3), dtype=jnp.float32)
    xyz2 = jax.random.normal(k2, (B, M, 3), dtype=jnp.float32)

    cost = emd_pallas(xyz1, xyz2)
    jax.block_until_ready(cost)

    cost_ref = emd_reference(xyz1, xyz2)
    jax.block_until_ready(cost_ref)

    assert cost.shape == (B,)
    assert bool(jnp.all(jnp.isfinite(cost)))
    # bf16 MXU operands (K / dK / ratio vectors) relax agreement vs. the exact f32
    # reference slightly; all accumulators stay f32, so 1% relative is ample margin.
    assert bool(jnp.allclose(cost, cost_ref, rtol=1e-2, atol=1e-2)), (cost, cost_ref)

    print("KERNEL_OK")
</pallas_src>

<mosaic_0001>
module attributes {stable_mosaic.version = 11 : i64} {
  func.func @_emd_kernel(%arg0: i32, %arg1: memref<2x3x64xf32, #tpu.memory_space<vmem>>, %arg2: memref<2x3x32xf32, #tpu.memory_space<vmem>>, %arg3: memref<1x2x1xf32, #tpu.memory_space<vmem>>) attributes {dimension_semantics = [#tpu.dimension_semantics<parallel>], iteration_bounds = array<i64: 1>, scalar_prefetch = 0 : i64, scratch_operands = 0 : i64, tpu.core_type = #tpu.core_type<tc>, window_params = [{transform_indices = @transform_0, window_bounds = array<i64: 2, 3, 64>}, {transform_indices = @transform_1, window_bounds = array<i64: 2, 3, 32>}, {transform_indices = @transform_2, window_bounds = array<i64: 1, 2, 1>}]} {
    %cst = arith.constant 1.000000e+00 : f32
    %0 = vector.broadcast %cst : f32 to vector<3x1xf32>
    %c0_i32 = arith.constant 0 : i32
    %c2_i32 = arith.constant 2 : i32
    %1 = arith.addi %c0_i32, %c2_i32 : i32
    %c1_i32 = arith.constant 1 : i32
    scf.for %arg4 = %c0_i32 to %1 step %c1_i32  : i32 {
      %c1_i32_1 = arith.constant 1 : i32
      %2 = arith.muli %arg4, %c1_i32_1 : i32
      %c0_i32_2 = arith.constant 0 : i32
      %3 = arith.addi %c0_i32_2, %2 : i32
      %4 = arith.index_cast %3 : i32 to index
      %c0 = arith.constant 0 : index
      %c0_3 = arith.constant 0 : index
      %5 = vector.load %arg1[%4, %c0, %c0_3] : memref<2x3x64xf32, #tpu.memory_space<vmem>>, vector<1x3x64xf32>
      %6 = vector.shape_cast %5 : vector<1x3x64xf32> to vector<3x64xf32>
      %7 = arith.index_cast %3 : i32 to index
      %c0_4 = arith.constant 0 : index
      %c0_5 = arith.constant 0 : index
      %8 = vector.load %arg2[%7, %c0_4, %c0_5] : memref<2x3x32xf32, #tpu.memory_space<vmem>>, vector<1x3x32xf32>
      %9 = vector.shape_cast %8 : vector<1x3x32xf32> to vector<3x32xf32>
      %cst_6 = arith.constant dense<0.000000e+00> : vector<64x32xf32>
      %10 = tpu.matmul %6, %9, %cst_6 {dimension_numbers = #tpu.dot_dimension_numbers<[0], [0], [1], [1], [0, 1, 1, 1], [], []>} : vector<3x64xf32>, vector<3x32xf32>, vector<64x32xf32> -> vector<64x32xf32>
      %11 = arith.mulf %6, %6 : vector<3x64xf32>
      %cst_7 = arith.constant dense<0.000000e+00> : vector<64x1xf32>
      %12 = tpu.matmul %11, %0, %cst_7 {dimension_numbers = #tpu.dot_dimension_numbers<[0], [0], [1], [1], [0, 1, 1, 1], [], []>} : vector<3x64xf32>, vector<3x1xf32>, vector<64x1xf32> -> vector<64x1xf32>
      %13 = arith.mulf %9, %9 : vector<3x32xf32>
      %cst_8 = arith.constant dense<0.000000e+00> : vector<32xf32>
      %14 = vector.multi_reduction <add>, %13, %cst_8 [0] : vector<3x32xf32> to vector<32xf32>
      %15 = vector.shape_cast %14 : vector<32xf32> to vector<1x32xf32>
      %16 = vector.broadcast %12 : vector<64x1xf32> to vector<64x32xf32>
      %17 = vector.broadcast %15 : vector<1x32xf32> to vector<64x32xf32>
      %18 = arith.addf %16, %17 : vector<64x32xf32>
      %cst_9 = arith.constant 2.000000e+00 : f32
      %19 = vector.broadcast %cst_9 : f32 to vector<64x32xf32>
      %20 = arith.mulf %19, %10 : vector<64x32xf32>
      %21 = arith.subf %18, %20 : vector<64x32xf32>
      %cst_10 = arith.constant 0.000000e+00 : f32
      %22 = vector.broadcast %cst_10 : f32 to vector<64x32xf32>
      %23 = arith.maximumf %21, %22 : vector<64x32xf32>
      %24 = math.sqrt %23 : vector<64x32xf32>
      %cst_11 = arith.constant 1.000000e+00 : f32
      %25 = vector.broadcast %cst_11 : f32 to vector<1x64xf32>
      %cst_12 = arith.constant 2.000000e+00 : f32
      %26 = vector.broadcast %cst_12 : f32 to vector<1x32xf32>
      %cst_13 = arith.constant 0.000000e+00 : f32
      %27 = vector.broadcast %cst_13 : f32 to vector<1x1xf32>
      %28 = arith.mulf %24, %24 : vector<64x32xf32>
      %cst_14 = arith.constant -1.638400e+04 : f32
      %29 = vector.broadcast %cst_14 : f32 to vector<64x32xf32>
      %30 = arith.mulf %29, %28 : vector<64x32xf32>
      %31 = math.exp %30 : vector<64x32xf32>
      %32 = arith.truncf %31 : vector<64x32xf32> to vector<64x32xbf16>
      %33 = arith.mulf %24, %31 : vector<64x32xf32>
      %34 = arith.truncf %33 : vector<64x32xf32> to vector<64x32xbf16>
      %35 = arith.truncf %26 : vector<1x32xf32> to vector<1x32xbf16>
      %cst_15 = arith.constant dense<0.000000e+00> : vector<1x64xf32>
      %36 = tpu.matmul %35, %32, %cst_15 {dimension_numbers = #tpu.dot_dimension_numbers<[1], [1], [0], [0], [0, 0, 1, 0], [], []>} : vector<1x32xbf16>, vector<64x32xbf16>, vector<1x64xf32> -> vector<1x64xf32>
      %cst_16 = arith.constant 9.99999971E-10 : f32
      %37 = vector.broadcast %cst_16 : f32 to vector<1x64xf32>
      %38 = arith.addf %36, %37 : vector<1x64xf32>
      %39 = arith.divf %25, %38 : vector<1x64xf32>
      %40 = arith.truncf %39 : vector<1x64xf32> to vector<1x64xbf16>
      %cst_17 = arith.constant dense<0.000000e+00> : vector<1x32xf32>
      %41 = tpu.matmul %40, %32, %cst_17 {dimension_numbers = #tpu.dot_dimension_numbers<[1], [0], [0], [1], [0, 0, 1, 1], [], []>} : vector<1x64xbf16>, vector<64x32xbf16>, vector<1x32xf32> -> vector<1x32xf32>
      %42 = arith.mulf %41, %26 : vector<1x32xf32>
      %cst_18 = arith.constant 9.99999971E-10 : f32
      %43 = vector.broadcast %cst_18 : f32 to vector<1x32xf32>
      %44 = arith.addf %42, %43 : vector<1x32xf32>
      %45 = arith.divf %26, %44 : vector<1x32xf32>
      %cst_19 = arith.constant 1.000000e+00 : f32
      %46 = vector.broadcast %cst_19 : f32 to vector<1x32xf32>
      %47 = arith.minimumf %45, %46 : vector<1x32xf32>
      %48 = arith.mulf %47, %26 : vector<1x32xf32>
      %49 = arith.subf %26, %42 : vector<1x32xf32>
      %cst_20 = arith.constant 0.000000e+00 : f32
      %50 = vector.broadcast %cst_20 : f32 to vector<1x32xf32>
      %51 = arith.maximumf %50, %49 : vector<1x32xf32>
      %52 = arith.truncf %48 : vector<1x32xf32> to vector<1x32xbf16>
      %cst_21 = arith.constant dense<0.000000e+00> : vector<1x64xf32>
      %53 = tpu.matmul %52, %32, %cst_21 {dimension_numbers = #tpu.dot_dimension_numbers<[1], [1], [0], [0], [0, 0, 1, 0], [], []>} : vector<1x32xbf16>, vector<64x32xbf16>, vector<1x64xf32> -> vector<1x64xf32>
      %cst_22 = arith.constant dense<0.000000e+00> : vector<1x64xf32>
      %54 = tpu.matmul %52, %34, %cst_22 {dimension_numbers = #tpu.dot_dimension_numbers<[1], [1], [0], [0], [0, 0, 1, 0], [], []>} : vector<1x32xbf16>, vector<64x32xbf16>, vector<1x64xf32> -> vector<1x64xf32>
      %55 = arith.mulf %39, %53 : vector<1x64xf32>
      %56 = arith.subf %25, %55 : vector<1x64xf32>
      %cst_23 = arith.constant 0.000000e+00 : f32
      %57 = vector.broadcast %cst_23 : f32 to vector<1x64xf32>
      %58 = arith.maximumf %57, %56 : vector<1x64xf32>
      %59 = arith.mulf %39, %54 : vector<1x64xf32>
      %cst_24 = arith.constant dense<0.000000e+00> : vector<1xf32>
      %60 = vector.multi_reduction <add>, %59, %cst_24 [1] : vector<1x64xf32> to vector<1xf32>
      %61 = vector.shape_cast %60 : vector<1xf32> to vector<1x1xf32>
      %62 = arith.addf %27, %61 : vector<1x1xf32>
      %63 = arith.mulf %24, %24 : vector<64x32xf32>
      %cst_25 = arith.constant -4.096000e+03 : f32
      %64 = vector.broadcast %cst_25 : f32 to vector<64x32xf32>
      %65 = arith.mulf %64, %63 : vector<64x32xf32>
      %66 = math.exp %65 : vector<64x32xf32>
      %67 = arith.truncf %66 : vector<64x32xf32> to vector<64x32xbf16>
      %68 = arith.mulf %24, %66 : vector<64x32xf32>
      %69 = arith.truncf %68 : vector<64x32xf32> to vector<64x32xbf16>
      %70 = arith.truncf %51 : vector<1x32xf32> to vector<1x32xbf16>
      %cst_26 = arith.constant dense<0.000000e+00> : vector<1x64xf32>
      %71 = tpu.matmul %70, %67, %cst_26 {dimension_numbers = #tpu.dot_dimension_numbers<[1], [1], [0], [0], [0, 0, 1, 0], [], []>} : vector<1x32xbf16>, vector<64x32xbf16>, vector<1x64xf32> -> vector<1x64xf32>
      %cst_27 = arith.constant 9.99999971E-10 : f32
      %72 = vector.broadcast %cst_27 : f32 to vector<1x64xf32>
      %73 = arith.addf %71, %72 : vector<1x64xf32>
      %74 = arith.divf %58, %73 : vector<1x64xf32>
      %75 = arith.truncf %74 : vector<1x64xf32> to vector<1x64xbf16>
      %cst_28 = arith.constant dense<0.000000e+00> : vector<1x32xf32>
      %76 = tpu.matmul %75, %67, %cst_28 {dimension_numbers = #tpu.dot_dimension_numbers<[1], [0], [0], [1], [0, 0, 1, 1], [], []>} : vector<1x64xbf16>, vector<64x32xbf16>, vector<1x32xf32> -> vector<1x32xf32>
      %77 = arith.mulf %76, %51 : vector<1x32xf32>
      %cst_29 = arith.constant 9.99999971E-10 : f32
      %78 = vector.broadcast %cst_29 : f32 to vector<1x32xf32>
      %79 = arith.addf %77, %78 : vector<1x32xf32>
      %80 = arith.divf %51, %79 : vector<1x32xf32>
      %cst_30 = arith.constant 1.000000e+00 : f32
      %81 = vector.broadcast %cst_30 : f32 to vector<1x32xf32>
      %82 = arith.minimumf %80, %81 : vector<1x32xf32>
      %83 = arith.mulf %82, %51 : vector<1x32xf32>
      %84 = arith.subf %51, %77 : vector<1x32xf32>
      %cst_31 = arith.constant 0.000000e+00 : f32
      %85 = vector.broadcast %cst_31 : f32 to vector<1x32xf32>
      %86 = arith.maximumf %85, %84 : vector<1x32xf32>
      %87 = arith.truncf %83 : vector<1x32xf32> to vector<1x32xbf16>
      %cst_32 = arith.constant dense<0.000000e+00> : vector<1x64xf32>
      %88 = tpu.matmul %87, %67, %cst_32 {dimension_numbers = #tpu.dot_dimension_numbers<[1], [1], [0], [0], [0, 0, 1, 0], [], []>} : vector<1x32xbf16>, vector<64x32xbf16>, vector<1x64xf32> -> vector<1x64xf32>
      %cst_33 = arith.constant dense<0.000000e+00> : vector<1x64xf32>
      %89 = tpu.matmul %87, %69, %cst_33 {dimension_numbers = #tpu.dot_dimension_numbers<[1], [1], [0], [0], [0, 0, 1, 0], [], []>} : vector<1x32xbf16>, vector<64x32xbf16>, vector<1x64xf32> -> vector<1x64xf32>
      %90 = arith.mulf %74, %88 : vector<1x64xf32>
      %91 = arith.subf %58, %90 : vector<1x64xf32>
      %cst_34 = arith.constant 0.000000e+00 : f32
      %92 = vector.broadcast %cst_34 : f32 to vector<1x64xf32>
      %93 = arith.maximumf %92, %91 : vector<1x64xf32>
      %94 = arith.mulf %74, %89 : vector<1x64xf32>
      %cst_35 = arith.constant dense<0.000000e+00> : vector<1xf32>
      %95 = vector.multi_reduction <add>, %94, %cst_35 [1] : vector<1x64xf32> to vector<1xf32>
      %96 = vector.shape_cast %95 : vector<1xf32> to vector<1x1xf32>
      %97 = arith.addf %62, %96 : vector<1x1xf32>
      %98 = arith.mulf %24, %24 : vector<64x32xf32>
      %cst_36 = arith.constant -1.024000e+03 : f32
      %99 = vector.broadcast %cst_36 : f32 to vector<64x32xf32>
      %100 = arith.mulf %99, %98 : vector<64x32xf32>
      %101 = math.exp %100 : vector<64x32xf32>
      %102 = arith.truncf %101 : vector<64x32xf32> to vector<64x32xbf16>
      %103 = arith.mulf %24, %101 : vector<64x32xf32>
      %104 = arith.truncf %103 : vector<64x32xf32> to vector<64x32xbf16>
      %105 = arith.truncf %86 : vector<1x32xf32> to vector<1x32xbf16>
      %cst_37 = arith.constant dense<0.000000e+00> : vector<1x64xf32>
      %106 = tpu.matmul %105, %102, %cst_37 {dimension_numbers = #tpu.dot_dimension_numbers<[1], [1], [0], [0], [0, 0, 1, 0], [], []>} : vector<1x32xbf16>, vector<64x32xbf16>, vector<1x64xf32> -> vector<1x64xf32>
      %cst_38 = arith.constant 9.99999971E-10 : f32
      %107 = vector.broadcast %cst_38 : f32 to vector<1x64xf32>
      %108 = arith.addf %106, %107 : vector<1x64xf32>
      %109 = arith.divf %93, %108 : vector<1x64xf32>
      %110 = arith.truncf %109 : vector<1x64xf32> to vector<1x64xbf16>
      %cst_39 = arith.constant dense<0.000000e+00> : vector<1x32xf32>
      %111 = tpu.matmul %110, %102, %cst_39 {dimension_numbers = #tpu.dot_dimension_numbers<[1], [0], [0], [1], [0, 0, 1, 1], [], []>} : vector<1x64xbf16>, vector<64x32xbf16>, vector<1x32xf32> -> vector<1x32xf32>
      %112 = arith.mulf %111, %86 : vector<1x32xf32>
      %cst_40 = arith.constant 9.99999971E-10 : f32
      %113 = vector.broadcast %cst_40 : f32 to vector<1x32xf32>
      %114 = arith.addf %112, %113 : vector<1x32xf32>
      %115 = arith.divf %86, %114 : vector<1x32xf32>
      %cst_41 = arith.constant 1.000000e+00 : f32
      %116 = vector.broadcast %cst_41 : f32 to vector<1x32xf32>
      %117 = arith.minimumf %115, %116 : vector<1x32xf32>
      %118 = arith.mulf %117, %86 : vector<1x32xf32>
      %119 = arith.subf %86, %112 : vector<1x32xf32>
      %cst_42 = arith.constant 0.000000e+00 : f32
      %120 = vector.broadcast %cst_42 : f32 to vector<1x32xf32>
      %121 = arith.maximumf %120, %119 : vector<1x32xf32>
      %122 = arith.truncf %118 : vector<1x32xf32> to vector<1x32xbf16>
      %cst_43 = arith.constant dense<0.000000e+00> : vector<1x64xf32>
      %123 = tpu.matmul %122, %102, %cst_43 {dimension_numbers = #tpu.dot_dimension_numbers<[1], [1], [0], [0], [0, 0, 1, 0], [], []>} : vector<1x32xbf16>, vector<64x32xbf16>, vector<1x64xf32> -> vector<1x64xf32>
      %cst_44 = arith.constant dense<0.000000e+00> : vector<1x64xf32>
      %124 = tpu.matmul %122, %104, %cst_44 {dimension_numbers = #tpu.dot_dimension_numbers<[1], [1], [0], [0], [0, 0, 1, 0], [], []>} : vector<1x32xbf16>, vector<64x32xbf16>, vector<1x64xf32> -> vector<1x64xf32>
      %125 = arith.mulf %109, %123 : vector<1x64xf32>
      %126 = arith.subf %93, %125 : vector<1x64xf32>
      %cst_45 = arith.constant 0.000000e+00 : f32
      %127 = vector.broadcast %cst_45 : f32 to vector<1x64xf32>
      %128 = arith.maximumf %127, %126 : vector<1x64xf32>
      %129 = arith.mulf %109, %124 : vector<1x64xf32>
      %cst_46 = arith.constant dense<0.000000e+00> : vector<1xf32>
      %130 = vector.multi_reduction <add>, %129, %cst_46 [1] : vector<1x64xf32> to vector<1xf32>
      %131 = vector.shape_cast %130 : vector<1xf32> to vector<1x1xf32>
      %132 = arith.addf %97, %131 : vector<1x1xf32>
      %133 = arith.mulf %24, %24 : vector<64x32xf32>
      %cst_47 = arith.constant -2.560000e+02 : f32
      %134 = vector.broadcast %cst_47 : f32 to vector<64x32xf32>
      %135 = arith.mulf %134, %133 : vector<64x32xf32>
      %136 = math.exp %135 : vector<64x32xf32>
      %137 = arith.truncf %136 : vector<64x32xf32> to vector<64x32xbf16>
      %138 = arith.mulf %24, %136 : vector<64x32xf32>
      %139 = arith.truncf %138 : vector<64x32xf32> to vector<64x32xbf16>
      %140 = arith.truncf %121 : vector<1x32xf32> to vector<1x32xbf16>
      %cst_48 = arith.constant dense<0.000000e+00> : vector<1x64xf32>
      %141 = tpu.matmul %140, %137, %cst_48 {dimension_numbers = #tpu.dot_dimension_numbers<[1], [1], [0], [0], [0, 0, 1, 0], [], []>} : vector<1x32xbf16>, vector<64x32xbf16>, vector<1x64xf32> -> vector<1x64xf32>
      %cst_49 = arith.constant 9.99999971E-10 : f32
      %142 = vector.broadcast %cst_49 : f32 to vector<1x64xf32>
      %143 = arith.addf %141, %142 : vector<1x64xf32>
      %144 = arith.divf %128, %143 : vector<1x64xf32>
      %145 = arith.truncf %144 : vector<1x64xf32> to vector<1x64xbf16>
      %cst_50 = arith.constant dense<0.000000e+00> : vector<1x32xf32>
      %146 = tpu.matmul %145, %137, %cst_50 {dimension_numbers = #tpu.dot_dimension_numbers<[1], [0], [0], [1], [0, 0, 1, 1], [], []>} : vector<1x64xbf16>, vector<64x32xbf16>, vector<1x32xf32> -> vector<1x32xf32>
      %147 = arith.mulf %146, %121 : vector<1x32xf32>
      %cst_51 = arith.constant 9.99999971E-10 : f32
      %148 = vector.broadcast %cst_51 : f32 to vector<1x32xf32>
      %149 = arith.addf %147, %148 : vector<1x32xf32>
      %150 = arith.divf %121, %149 : vector<1x32xf32>
      %cst_52 = arith.constant 1.000000e+00 : f32
      %151 = vector.broadcast %cst_52 : f32 to vector<1x32xf32>
      %152 = arith.minimumf %150, %151 : vector<1x32xf32>
      %153 = arith.mulf %152, %121 : vector<1x32xf32>
      %154 = arith.subf %121, %147 : vector<1x32xf32>
      %cst_53 = arith.constant 0.000000e+00 : f32
      %155 = vector.broadcast %cst_53 : f32 to vector<1x32xf32>
      %156 = arith.maximumf %155, %154 : vector<1x32xf32>
      %157 = arith.truncf %153 : vector<1x32xf32> to vector<1x32xbf16>
      %cst_54 = arith.constant dense<0.000000e+00> : vector<1x64xf32>
      %158 = tpu.matmul %157, %137, %cst_54 {dimension_numbers = #tpu.dot_dimension_numbers<[1], [1], [0], [0], [0, 0, 1, 0], [], []>} : vector<1x32xbf16>, vector<64x32xbf16>, vector<1x64xf32> -> vector<1x64xf32>
      %cst_55 = arith.constant dense<0.000000e+00> : vector<1x64xf32>
      %159 = tpu.matmul %157, %139, %cst_55 {dimension_numbers = #tpu.dot_dimension_numbers<[1], [1], [0], [0], [0, 0, 1, 0], [], []>} : vector<1x32xbf16>, vector<64x32xbf16>, vector<1x64xf32> -> vector<1x64xf32>
      %160 = arith.mulf %144, %158 : vector<1x64xf32>
      %161 = arith.subf %128, %160 : vector<1x64xf32>
      %cst_56 = arith.constant 0.000000e+00 : f32
      %162 = vector.broadcast %cst_56 : f32 to vector<1x64xf32>
      %163 = arith.maximumf %162, %161 : vector<1x64xf32>
      %164 = arith.mulf %144, %159 : vector<1x64xf32>
      %cst_57 = arith.constant dense<0.000000e+00> : vector<1xf32>
      %165 = vector.multi_reduction <add>, %164, %cst_57 [1] : vector<1x64xf32> to vector<1xf32>
      %166 = vector.shape_cast %165 : vector<1xf32> to vector<1x1xf32>
      %167 = arith.addf %132, %166 : vector<1x1xf32>
      %168 = arith.mulf %24, %24 : vector<64x32xf32>
      %cst_58 = arith.constant -6.400000e+01 : f32
      %169 = vector.broadcast %cst_58 : f32 to vector<64x32xf32>
      %170 = arith.mulf %169, %168 : vector<64x32xf32>
      %171 = math.exp %170 : vector<64x32xf32>
      %172 = arith.truncf %171 : vector<64x32xf32> to vector<64x32xbf16>
      %173 = arith.mulf %24, %171 : vector<64x32xf32>
      %174 = arith.truncf %173 : vector<64x32xf32> to vector<64x32xbf16>
      %175 = arith.truncf %156 : vector<1x32xf32> to vector<1x32xbf16>
      %cst_59 = arith.constant dense<0.000000e+00> : vector<1x64xf32>
      %176 = tpu.matmul %175, %172, %cst_59 {dimension_numbers = #tpu.dot_dimension_numbers<[1], [1], [0], [0], [0, 0, 1, 0], [], []>} : vector<1x32xbf16>, vector<64x32xbf16>, vector<1x64xf32> -> vector<1x64xf32>
      %cst_60 = arith.constant 9.99999971E-10 : f32
      %177 = vector.broadcast %cst_60 : f32 to vector<1x64xf32>
      %178 = arith.addf %176, %177 : vector<1x64xf32>
      %179 = arith.divf %163, %178 : vector<1x64xf32>
      %180 = arith.truncf %179 : vector<1x64xf32> to vector<1x64xbf16>
      %cst_61 = arith.constant dense<0.000000e+00> : vector<1x32xf32>
      %181 = tpu.matmul %180, %172, %cst_61 {dimension_numbers = #tpu.dot_dimension_numbers<[1], [0], [0], [1], [0, 0, 1, 1], [], []>} : vector<1x64xbf16>, vector<64x32xbf16>, vector<1x32xf32> -> vector<1x32xf32>
      %182 = arith.mulf %181, %156 : vector<1x32xf32>
      %cst_62 = arith.constant 9.99999971E-10 : f32
      %183 = vector.broadcast %cst_62 : f32 to vector<1x32xf32>
      %184 = arith.addf %182, %183 : vector<1x32xf32>
      %185 = arith.divf %156, %184 : vector<1x32xf32>
      %cst_63 = arith.constant 1.000000e+00 : f32
      %186 = vector.broadcast %cst_63 : f32 to vector<1x32xf32>
      %187 = arith.minimumf %185, %186 : vector<1x32xf32>
      %188 = arith.mulf %187, %156 : vector<1x32xf32>
      %189 = arith.subf %156, %182 : vector<1x32xf32>
      %cst_64 = arith.constant 0.000000e+00 : f32
      %190 = vector.broadcast %cst_64 : f32 to vector<1x32xf32>
      %191 = arith.maximumf %190, %189 : vector<1x32xf32>
      %192 = arith.truncf %188 : vector<1x32xf32> to vector<1x32xbf16>
      %cst_65 = arith.constant dense<0.000000e+00> : vector<1x64xf32>
      %193 = tpu.matmul %192, %172, %cst_65 {dimension_numbers = #tpu.dot_dimension_numbers<[1], [1], [0], [0], [0, 0, 1, 0], [], []>} : vector<1x32xbf16>, vector<64x32xbf16>, vector<1x64xf32> -> vector<1x64xf32>
      %cst_66 = arith.constant dense<0.000000e+00> : vector<1x64xf32>
      %194 = tpu.matmul %192, %174, %cst_66 {dimension_numbers = #tpu.dot_dimension_numbers<[1], [1], [0], [0], [0, 0, 1, 0], [], []>} : vector<1x32xbf16>, vector<64x32xbf16>, vector<1x64xf32> -> vector<1x64xf32>
      %195 = arith.mulf %179, %193 : vector<1x64xf32>
      %196 = arith.subf %163, %195 : vector<1x64xf32>
      %cst_67 = arith.constant 0.000000e+00 : f32
      %197 = vector.broadcast %cst_67 : f32 to vector<1x64xf32>
      %198 = arith.maximumf %197, %196 : vector<1x64xf32>
      %199 = arith.mulf %179, %194 : vector<1x64xf32>
      %cst_68 = arith.constant dense<0.000000e+00> : vector<1xf32>
      %200 = vector.multi_reduction <add>, %199, %cst_68 [1] : vector<1x64xf32> to vector<1xf32>
      %201 = vector.shape_cast %200 : vector<1xf32> to vector<1x1xf32>
      %202 = arith.addf %167, %201 : vector<1x1xf32>
      %203 = arith.mulf %24, %24 : vector<64x32xf32>
      %cst_69 = arith.constant -1.600000e+01 : f32
      %204 = vector.broadcast %cst_69 : f32 to vector<64x32xf32>
      %205 = arith.mulf %204, %203 : vector<64x32xf32>
      %206 = math.exp %205 : vector<64x32xf32>
      %207 = arith.truncf %206 : vector<64x32xf32> to vector<64x32xbf16>
      %208 = arith.mulf %24, %206 : vector<64x32xf32>
      %209 = arith.truncf %208 : vector<64x32xf32> to vector<64x32xbf16>
      %210 = arith.truncf %191 : vector<1x32xf32> to vector<1x32xbf16>
      %cst_70 = arith.constant dense<0.000000e+00> : vector<1x64xf32>
      %211 = tpu.matmul %210, %207, %cst_70 {dimension_numbers = #tpu.dot_dimension_numbers<[1], [1], [0], [0], [0, 0, 1, 0], [], []>} : vector<1x32xbf16>, vector<64x32xbf16>, vector<1x64xf32> -> vector<1x64xf32>
      %cst_71 = arith.constant 9.99999971E-10 : f32
      %212 = vector.broadcast %cst_71 : f32 to vector<1x64xf32>
      %213 = arith.addf %211, %212 : vector<1x64xf32>
      %214 = arith.divf %198, %213 : vector<1x64xf32>
      %215 = arith.truncf %214 : vector<1x64xf32> to vector<1x64xbf16>
      %cst_72 = arith.constant dense<0.000000e+00> : vector<1x32xf32>
      %216 = tpu.matmul %215, %207, %cst_72 {dimension_numbers = #tpu.dot_dimension_numbers<[1], [0], [0], [1], [0, 0, 1, 1], [], []>} : vector<1x64xbf16>, vector<64x32xbf16>, vector<1x32xf32> -> vector<1x32xf32>
      %217 = arith.mulf %216, %191 : vector<1x32xf32>
      %cst_73 = arith.constant 9.99999971E-10 : f32
      %218 = vector.broadcast %cst_73 : f32 to vector<1x32xf32>
      %219 = arith.addf %217, %218 : vector<1x32xf32>
      %220 = arith.divf %191, %219 : vector<1x32xf32>
      %cst_74 = arith.constant 1.000000e+00 : f32
      %221 = vector.broadcast %cst_74 : f32 to vector<1x32xf32>
      %222 = arith.minimumf %220, %221 : vector<1x32xf32>
      %223 = arith.mulf %222, %191 : vector<1x32xf32>
      %224 = arith.subf %191, %217 : vector<1x32xf32>
      %cst_75 = arith.constant 0.000000e+00 : f32
      %225 = vector.broadcast %cst_75 : f32 to vector<1x32xf32>
      %226 = arith.maximumf %225, %224 : vector<1x32xf32>
      %227 = arith.truncf %223 : vector<1x32xf32> to vector<1x32xbf16>
      %cst_76 = arith.constant dense<0.000000e+00> : vector<1x64xf32>
      %228 = tpu.matmul %227, %207, %cst_76 {dimension_numbers = #tpu.dot_dimension_numbers<[1], [1], [0], [0], [0, 0, 1, 0], [], []>} : vector<1x32xbf16>, vector<64x32xbf16>, vector<1x64xf32> -> vector<1x64xf32>
      %cst_77 = arith.constant dense<0.000000e+00> : vector<1x64xf32>
      %229 = tpu.matmul %227, %209, %cst_77 {dimension_numbers = #tpu.dot_dimension_numbers<[1], [1], [0], [0], [0, 0, 1, 0], [], []>} : vector<1x32xbf16>, vector<64x32xbf16>, vector<1x64xf32> -> vector<1x64xf32>
      %230 = arith.mulf %214, %228 : vector<1x64xf32>
      %231 = arith.subf %198, %230 : vector<1x64xf32>
      %cst_78 = arith.constant 0.000000e+00 : f32
      %232 = vector.broadcast %cst_78 : f32 to vector<1x64xf32>
      %233 = arith.maximumf %232, %231 : vector<1x64xf32>
      %234 = arith.mulf %214, %229 : vector<1x64xf32>
      %cst_79 = arith.constant dense<0.000000e+00> : vector<1xf32>
      %235 = vector.multi_reduction <add>, %234, %cst_79 [1] : vector<1x64xf32> to vector<1xf32>
      %236 = vector.shape_cast %235 : vector<1xf32> to vector<1x1xf32>
      %237 = arith.addf %202, %236 : vector<1x1xf32>
      %238 = arith.mulf %24, %24 : vector<64x32xf32>
      %cst_80 = arith.constant -4.000000e+00 : f32
      %239 = vector.broadcast %cst_80 : f32 to vector<64x32xf32>
      %240 = arith.mulf %239, %238 : vector<64x32xf32>
      %241 = math.exp %240 : vector<64x32xf32>
      %242 = arith.truncf %241 : vector<64x32xf32> to vector<64x32xbf16>
      %243 = arith.mulf %24, %241 : vector<64x32xf32>
      %244 = arith.truncf %243 : vector<64x32xf32> to vector<64x32xbf16>
      %245 = arith.truncf %226 : vector<1x32xf32> to vector<1x32xbf16>
      %cst_81 = arith.constant dense<0.000000e+00> : vector<1x64xf32>
      %246 = tpu.matmul %245, %242, %cst_81 {dimension_numbers = #tpu.dot_dimension_numbers<[1], [1], [0], [0], [0, 0, 1, 0], [], []>} : vector<1x32xbf16>, vector<64x32xbf16>, vector<1x64xf32> -> vector<1x64xf32>
      %cst_82 = arith.constant 9.99999971E-10 : f32
      %247 = vector.broadcast %cst_82 : f32 to vector<1x64xf32>
      %248 = arith.addf %246, %247 : vector<1x64xf32>
      %249 = arith.divf %233, %248 : vector<1x64xf32>
      %250 = arith.truncf %249 : vector<1x64xf32> to vector<1x64xbf16>
      %cst_83 = arith.constant dense<0.000000e+00> : vector<1x32xf32>
      %251 = tpu.matmul %250, %242, %cst_83 {dimension_numbers = #tpu.dot_dimension_numbers<[1], [0], [0], [1], [0, 0, 1, 1], [], []>} : vector<1x64xbf16>, vector<64x32xbf16>, vector<1x32xf32> -> vector<1x32xf32>
      %252 = arith.mulf %251, %226 : vector<1x32xf32>
      %cst_84 = arith.constant 9.99999971E-10 : f32
      %253 = vector.broadcast %cst_84 : f32 to vector<1x32xf32>
      %254 = arith.addf %252, %253 : vector<1x32xf32>
      %255 = arith.divf %226, %254 : vector<1x32xf32>
      %cst_85 = arith.constant 1.000000e+00 : f32
      %256 = vector.broadcast %cst_85 : f32 to vector<1x32xf32>
      %257 = arith.minimumf %255, %256 : vector<1x32xf32>
      %258 = arith.mulf %257, %226 : vector<1x32xf32>
      %259 = arith.subf %226, %252 : vector<1x32xf32>
      %cst_86 = arith.constant 0.000000e+00 : f32
      %260 = vector.broadcast %cst_86 : f32 to vector<1x32xf32>
      %261 = arith.maximumf %260, %259 : vector<1x32xf32>
      %262 = arith.truncf %258 : vector<1x32xf32> to vector<1x32xbf16>
      %cst_87 = arith.constant dense<0.000000e+00> : vector<1x64xf32>
      %263 = tpu.matmul %262, %242, %cst_87 {dimension_numbers = #tpu.dot_dimension_numbers<[1], [1], [0], [0], [0, 0, 1, 0], [], []>} : vector<1x32xbf16>, vector<64x32xbf16>, vector<1x64xf32> -> vector<1x64xf32>
      %cst_88 = arith.constant dense<0.000000e+00> : vector<1x64xf32>
      %264 = tpu.matmul %262, %244, %cst_88 {dimension_numbers = #tpu.dot_dimension_numbers<[1], [1], [0], [0], [0, 0, 1, 0], [], []>} : vector<1x32xbf16>, vector<64x32xbf16>, vector<1x64xf32> -> vector<1x64xf32>
      %265 = arith.mulf %249, %263 : vector<1x64xf32>
      %266 = arith.subf %233, %265 : vector<1x64xf32>
      %cst_89 = arith.constant 0.000000e+00 : f32
      %267 = vector.broadcast %cst_89 : f32 to vector<1x64xf32>
      %268 = arith.maximumf %267, %266 : vector<1x64xf32>
      %269 = arith.mulf %249, %264 : vector<1x64xf32>
      %cst_90 = arith.constant dense<0.000000e+00> : vector<1xf32>
      %270 = vector.multi_reduction <add>, %269, %cst_90 [1] : vector<1x64xf32> to vector<1xf32>
      %271 = vector.shape_cast %270 : vector<1xf32> to vector<1x1xf32>
      %272 = arith.addf %237, %271 : vector<1x1xf32>
      %273 = arith.mulf %24, %24 : vector<64x32xf32>
      %cst_91 = arith.constant -1.000000e+00 : f32
      %274 = vector.broadcast %cst_91 : f32 to vector<64x32xf32>
      %275 = arith.mulf %274, %273 : vector<64x32xf32>
      %276 = math.exp %275 : vector<64x32xf32>
      %277 = arith.truncf %276 : vector<64x32xf32> to vector<64x32xbf16>
      %278 = arith.mulf %24, %276 : vector<64x32xf32>
      %279 = arith.truncf %278 : vector<64x32xf32> to vector<64x32xbf16>
      %280 = arith.truncf %261 : vector<1x32xf32> to vector<1x32xbf16>
      %cst_92 = arith.constant dense<0.000000e+00> : vector<1x64xf32>
      %281 = tpu.matmul %280, %277, %cst_92 {dimension_numbers = #tpu.dot_dimension_numbers<[1], [1], [0], [0], [0, 0, 1, 0], [], []>} : vector<1x32xbf16>, vector<64x32xbf16>, vector<1x64xf32> -> vector<1x64xf32>
      %cst_93 = arith.constant 9.99999971E-10 : f32
      %282 = vector.broadcast %cst_93 : f32 to vector<1x64xf32>
      %283 = arith.addf %281, %282 : vector<1x64xf32>
      %284 = arith.divf %268, %283 : vector<1x64xf32>
      %285 = arith.truncf %284 : vector<1x64xf32> to vector<1x64xbf16>
      %cst_94 = arith.constant dense<0.000000e+00> : vector<1x32xf32>
      %286 = tpu.matmul %285, %277, %cst_94 {dimension_numbers = #tpu.dot_dimension_numbers<[1], [0], [0], [1], [0, 0, 1, 1], [], []>} : vector<1x64xbf16>, vector<64x32xbf16>, vector<1x32xf32> -> vector<1x32xf32>
      %287 = arith.mulf %286, %261 : vector<1x32xf32>
      %cst_95 = arith.constant 9.99999971E-10 : f32
      %288 = vector.broadcast %cst_95 : f32 to vector<1x32xf32>
      %289 = arith.addf %287, %288 : vector<1x32xf32>
      %290 = arith.divf %261, %289 : vector<1x32xf32>
      %cst_96 = arith.constant 1.000000e+00 : f32
      %291 = vector.broadcast %cst_96 : f32 to vector<1x32xf32>
      %292 = arith.minimumf %290, %291 : vector<1x32xf32>
      %293 = arith.mulf %292, %261 : vector<1x32xf32>
      %294 = arith.subf %261, %287 : vector<1x32xf32>
      %cst_97 = arith.constant 0.000000e+00 : f32
      %295 = vector.broadcast %cst_97 : f32 to vector<1x32xf32>
      %296 = arith.maximumf %295, %294 : vector<1x32xf32>
      %297 = arith.truncf %293 : vector<1x32xf32> to vector<1x32xbf16>
      %cst_98 = arith.constant dense<0.000000e+00> : vector<1x64xf32>
      %298 = tpu.matmul %297, %277, %cst_98 {dimension_numbers = #tpu.dot_dimension_numbers<[1], [1], [0], [0], [0, 0, 1, 0], [], []>} : vector<1x32xbf16>, vector<64x32xbf16>, vector<1x64xf32> -> vector<1x64xf32>
      %cst_99 = arith.constant dense<0.000000e+00> : vector<1x64xf32>
      %299 = tpu.matmul %297, %279, %cst_99 {dimension_numbers = #tpu.dot_dimension_numbers<[1], [1], [0], [0], [0, 0, 1, 0], [], []>} : vector<1x32xbf16>, vector<64x32xbf16>, vector<1x64xf32> -> vector<1x64xf32>
      %300 = arith.mulf %284, %298 : vector<1x64xf32>
      %301 = arith.subf %268, %300 : vector<1x64xf32>
      %cst_100 = arith.constant 0.000000e+00 : f32
      %302 = vector.broadcast %cst_100 : f32 to vector<1x64xf32>
      %303 = arith.maximumf %302, %301 : vector<1x64xf32>
      %304 = arith.mulf %284, %299 : vector<1x64xf32>
      %cst_101 = arith.constant dense<0.000000e+00> : vector<1xf32>
      %305 = vector.multi_reduction <add>, %304, %cst_101 [1] : vector<1x64xf32> to vector<1xf32>
      %306 = vector.shape_cast %305 : vector<1xf32> to vector<1x1xf32>
      %307 = arith.addf %272, %306 : vector<1x1xf32>
      %308 = arith.mulf %24, %24 : vector<64x32xf32>
      %cst_102 = arith.constant -2.500000e-01 : f32
      %309 = vector.broadcast %cst_102 : f32 to vector<64x32xf32>
      %310 = arith.mulf %309, %308 : vector<64x32xf32>
      %311 = math.exp %310 : vector<64x32xf32>
      %312 = arith.truncf %311 : vector<64x32xf32> to vector<64x32xbf16>
      %313 = arith.mulf %24, %311 : vector<64x32xf32>
      %314 = arith.truncf %313 : vector<64x32xf32> to vector<64x32xbf16>
      %315 = arith.truncf %296 : vector<1x32xf32> to vector<1x32xbf16>
      %cst_103 = arith.constant dense<0.000000e+00> : vector<1x64xf32>
      %316 = tpu.matmul %315, %312, %cst_103 {dimension_numbers = #tpu.dot_dimension_numbers<[1], [1], [0], [0], [0, 0, 1, 0], [], []>} : vector<1x32xbf16>, vector<64x32xbf16>, vector<1x64xf32> -> vector<1x64xf32>
      %cst_104 = arith.constant 9.99999971E-10 : f32
      %317 = vector.broadcast %cst_104 : f32 to vector<1x64xf32>
      %318 = arith.addf %316, %317 : vector<1x64xf32>
      %319 = arith.divf %303, %318 : vector<1x64xf32>
      %320 = arith.truncf %319 : vector<1x64xf32> to vector<1x64xbf16>
      %cst_105 = arith.constant dense<0.000000e+00> : vector<1x32xf32>
      %321 = tpu.matmul %320, %312, %cst_105 {dimension_numbers = #tpu.dot_dimension_numbers<[1], [0], [0], [1], [0, 0, 1, 1], [], []>} : vector<1x64xbf16>, vector<64x32xbf16>, vector<1x32xf32> -> vector<1x32xf32>
      %322 = arith.mulf %321, %296 : vector<1x32xf32>
      %cst_106 = arith.constant 9.99999971E-10 : f32
      %323 = vector.broadcast %cst_106 : f32 to vector<1x32xf32>
      %324 = arith.addf %322, %323 : vector<1x32xf32>
      %325 = arith.divf %296, %324 : vector<1x32xf32>
      %cst_107 = arith.constant 1.000000e+00 : f32
      %326 = vector.broadcast %cst_107 : f32 to vector<1x32xf32>
      %327 = arith.minimumf %325, %326 : vector<1x32xf32>
      %328 = arith.mulf %327, %296 : vector<1x32xf32>
      %329 = arith.subf %296, %322 : vector<1x32xf32>
      %cst_108 = arith.constant 0.000000e+00 : f32
      %330 = vector.broadcast %cst_108 : f32 to vector<1x32xf32>
      %331 = arith.maximumf %330, %329 : vector<1x32xf32>
      %332 = arith.truncf %328 : vector<1x32xf32> to vector<1x32xbf16>
      %cst_109 = arith.constant dense<0.000000e+00> : vector<1x64xf32>
      %333 = tpu.matmul %332, %312, %cst_109 {dimension_numbers = #tpu.dot_dimension_numbers<[1], [1], [0], [0], [0, 0, 1, 0], [], []>} : vector<1x32xbf16>, vector<64x32xbf16>, vector<1x64xf32> -> vector<1x64xf32>
      %cst_110 = arith.constant dense<0.000000e+00> : vector<1x64xf32>
      %334 = tpu.matmul %332, %314, %cst_110 {dimension_numbers = #tpu.dot_dimension_numbers<[1], [1], [0], [0], [0, 0, 1, 0], [], []>} : vector<1x32xbf16>, vector<64x32xbf16>, vector<1x64xf32> -> vector<1x64xf32>
      %335 = arith.mulf %319, %333 : vector<1x64xf32>
      %336 = arith.subf %303, %335 : vector<1x64xf32>
      %cst_111 = arith.constant 0.000000e+00 : f32
      %337 = vector.broadcast %cst_111 : f32 to vector<1x64xf32>
      %338 = arith.maximumf %337, %336 : vector<1x64xf32>
      %339 = arith.mulf %319, %334 : vector<1x64xf32>
      %cst_112 = arith.constant dense<0.000000e+00> : vector<1xf32>
      %340 = vector.multi_reduction <add>, %339, %cst_112 [1] : vector<1x64xf32> to vector<1xf32>
      %341 = vector.shape_cast %340 : vector<1xf32> to vector<1x1xf32>
      %342 = arith.addf %307, %341 : vector<1x1xf32>
      %cst_113 = arith.constant 1.000000e+00 : f32
      %343 = vector.broadcast %cst_113 : f32 to vector<64x32xf32>
      %344 = arith.truncf %343 : vector<64x32xf32> to vector<64x32xbf16>
      %345 = arith.mulf %24, %343 : vector<64x32xf32>
      %346 = arith.truncf %345 : vector<64x32xf32> to vector<64x32xbf16>
      %347 = arith.truncf %331 : vector<1x32xf32> to vector<1x32xbf16>
      %cst_114 = arith.constant dense<0.000000e+00> : vector<1x64xf32>
      %348 = tpu.matmul %347, %344, %cst_114 {dimension_numbers = #tpu.dot_dimension_numbers<[1], [1], [0], [0], [0, 0, 1, 0], [], []>} : vector<1x32xbf16>, vector<64x32xbf16>, vector<1x64xf32> -> vector<1x64xf32>
      %cst_115 = arith.constant 9.99999971E-10 : f32
      %349 = vector.broadcast %cst_115 : f32 to vector<1x64xf32>
      %350 = arith.addf %348, %349 : vector<1x64xf32>
      %351 = arith.divf %338, %350 : vector<1x64xf32>
      %352 = arith.truncf %351 : vector<1x64xf32> to vector<1x64xbf16>
      %cst_116 = arith.constant dense<0.000000e+00> : vector<1x32xf32>
      %353 = tpu.matmul %352, %344, %cst_116 {dimension_numbers = #tpu.dot_dimension_numbers<[1], [0], [0], [1], [0, 0, 1, 1], [], []>} : vector<1x64xbf16>, vector<64x32xbf16>, vector<1x32xf32> -> vector<1x32xf32>
      %354 = arith.mulf %353, %331 : vector<1x32xf32>
      %cst_117 = arith.constant 9.99999971E-10 : f32
      %355 = vector.broadcast %cst_117 : f32 to vector<1x32xf32>
      %356 = arith.addf %354, %355 : vector<1x32xf32>
      %357 = arith.divf %331, %356 : vector<1x32xf32>
      %cst_118 = arith.constant 1.000000e+00 : f32
      %358 = vector.broadcast %cst_118 : f32 to vector<1x32xf32>
      %359 = arith.minimumf %357, %358 : vector<1x32xf32>
      %360 = arith.mulf %359, %331 : vector<1x32xf32>
      %361 = arith.truncf %360 : vector<1x32xf32> to vector<1x32xbf16>
      %cst_119 = arith.constant dense<0.000000e+00> : vector<1x64xf32>
      %362 = tpu.matmul %361, %346, %cst_119 {dimension_numbers = #tpu.dot_dimension_numbers<[1], [1], [0], [0], [0, 0, 1, 0], [], []>} : vector<1x32xbf16>, vector<64x32xbf16>, vector<1x64xf32> -> vector<1x64xf32>
      %363 = arith.mulf %351, %362 : vector<1x64xf32>
      %cst_120 = arith.constant dense<0.000000e+00> : vector<1xf32>
      %364 = vector.multi_reduction <add>, %363, %cst_120 [1] : vector<1x64xf32> to vector<1xf32>
      %365 = vector.shape_cast %364 : vector<1xf32> to vector<1x1xf32>
      %366 = arith.addf %342, %365 : vector<1x1xf32>
      %c0_121 = arith.constant 0 : index
      %367 = arith.index_cast %3 : i32 to index
      %c0_122 = arith.constant 0 : index
      %368 = vector.load %arg3[%c0_121, %367, %c0_122] : memref<1x2x1xf32, #tpu.memory_space<vmem>>, vector<1x1x1xf32>
      %369 = vector.shape_cast %368 : vector<1x1x1xf32> to vector<1x1xf32>
      %370 = vector.shape_cast %366 : vector<1x1xf32> to vector<1x1x1xf32>
      tpu.vector_store %arg3[%c0_121, %367, %c0_122], %370 {strides = array<i32>} : memref<1x2x1xf32, #tpu.memory_space<vmem>>, vector<1x1x1xf32>,
    }
    %c2_i32_0 = arith.constant 2 : i32
    return
  }
  func.func @transform_0(%arg0: i32) -> (i32, i32, i32) {
    %c0_i32 = arith.constant 0 : i32
    %c0_i32_0 = arith.constant 0 : i32
    %c0_i32_1 = arith.constant 0 : i32
    return %arg0, %c0_i32, %c0_i32_0 : i32, i32, i32
  }
  func.func @transform_1(%arg0: i32) -> (i32, i32, i32) {
    %c0_i32 = arith.constant 0 : i32
    %c0_i32_0 = arith.constant 0 : i32
    %c0_i32_1 = arith.constant 0 : i32
    return %arg0, %c0_i32, %c0_i32_0 : i32, i32, i32
  }
  func.func @transform_2(%arg0: i32) -> (i32, i32, i32) {
    %c0_i32 = arith.constant 0 : i32
    %c0_i32_0 = arith.constant 0 : i32
    %c0_i32_1 = arith.constant 0 : i32
    return %arg0, %c0_i32, %c0_i32_0 : i32, i32, i32
  }
}

</mosaic_0001>

<bundles_post_ra>
// kernel: tpu_custom_call.1
= control target key start
LH: loop header
LB: loop body
LE: loop exit
PB: predicated region body
PF: predicated region fallthrough
CT: control target
= control target key end

     0   :  { %s2391_s9 = smov 0   ;;  %s3611_s0 = inlined_call_operand.vmem [shape: f32[2,3,64], index: 0, kind: input, shape index: {}]   ;;  %s3612_s1 = inlined_call_operand.vmem [shape: f32[2,3,32], index: 1, kind: input, shape index: {}]   ;;  %s3613_s2 = inlined_call_operand.vmem [shape: f32[1,2,1], index: 2, kind: output, shape index: {}]  }
   0x1 LB: > { %s2089_s10 = sshll.u32 %s2370_s9, 2  ;;  %vm82_vm0 = vcmask 1042432   ;;  %vm57_vm1 = vcmask 23552   ;;  %v2372_v6 = vmov 1.0   ;;  %v3614_v22 = vmov 0   ;;  %s2072_s19 = scalar_lea.vmem %s3613_s2, %s2370_s9  ;;  %s2370_s9 = sphi %s2391_s9, %s19_s9  }
   0x2   : > { %s21_s13 = scalar_lea.vmem %s3611_s0, %s2089_s10  ;;  %s23_s16 = scalar_lea.vmem %s3612_s1, %s2089_s10  ;;  %2162 = vset.pattern.permute.xlu2 %v3614_v22  ;;  %2161 = vset.pattern.permute.xlu1 %v3614_v22  ;;  %vm229_vm2 = vcmask 256000  }
   0x3   : > { %v22_v0 = vld [vmem:[%s21_s13] sm:$0x7]  ;;  %s19_s9 = sadd.s32 1, %s2370_s9  }
   0x4   : > { %25 = vxpose.xlu0.b32.start.end [1/1] (short) (narrow) %v22_v0, 64  ;;  %v2403_v1 = vld [vmem:[%s23_s16] sm:$0x7]  ;;  %v127_v2 = vmul.f32 %v22_v0, %v22_v0  ;;  %p16_p0 = scmp.ge.s32.totalorder %s19_s9, 2  }
   0x5   : > { %2090 = vmatpush.msk.msra.mxu0 %vm82_vm0, %v2403_v1  ;;  %2147 = vmatpush.msk.msra.mxu1 %vm82_vm0, %v2403_v1  ;;  %v228_v33 = vmul.f32 %v2403_v1, %v2403_v1 }
   0x7   : > { %2099 = vmatpush.msk.msrb.mxu1 %vm82_vm0, %v2372_v6  ;;  %v230_v34 = vsel %vm229_vm2, %v228_v33, 0.0 }
   0x8   : > { %v231_v36 = vrot.slane %v230_v34, 4 }
   0xa   : > { %v232_v37 = vadd.f32 %v231_v36, %v230_v34 }
   0xc   : > { %v233_v38 = vrot.slane %v232_v37, 2 }
   0xe   : > { %v234_v40 = vadd.f32 %v233_v38, %v232_v37 }
  0x10   : > { %v235_v41 = vrot.slane %v234_v40, 1 }
  0x12   : > { %v2436_v43 = vadd.f32 %v235_v41, %v234_v40 }
  0x44   : > { %128 = vxpose.xlu0.b32.start.end [1/1] (short) (narrow) %v127_v2, 64 }
  0xa8   : > { %v41_v3 = vpop.trf.xlu0 }
  0xa9   : > { %2091 = vmatmul.msk.f32.vlgmr.msra.gmra.mxu0 %vm57_vm1, %v41_v3 }
  0xab   : > { %2163 = vset.pattern.permute.xlu0 %v3614_v22 }
  0xb0   : > { %v42_v4 = vpop.trf.xlu0 }
  0xb1   : > { %2092 = vmatmul.msk.f32.gmra.mxu0 %vm57_vm1, %v42_v4 }
  0xb8   : > { %v43_v5 = vpop.trf.xlu0 }
  0xb9   : > { %2093 = vmatmul.msk.f32.gmra.mxu0 %vm57_vm1, %v43_v5 }
  0xc0   : > { %v44_v7 = vpop.trf.xlu0 }
  0xc1   : > { %2094 = vmatmul.msk.f32.gmra.mxu0 %vm57_vm1, %v44_v7 }
  0xc8   : > { %v45_v8 = vpop.trf.xlu0 }
  0xc9   : > { %2095 = vmatmul.msk.f32.gmra.mxu0 %vm57_vm1, %v45_v8 }
  0xd0   : > { %v46_v9 = vpop.trf.xlu0 }
  0xd1   : > { %2096 = vmatmul.msk.f32.gmra.mxu0 %vm57_vm1, %v46_v9 }
  0xd8   : > { %v47_v10 = vpop.trf.xlu0 }
  0xd9   : > { %2097 = vmatmul.msk.f32.vlgmr.msra.gmra.mxu1 %vm57_vm1, %v47_v10 }
  0xe0   : > { %v48_v11 = vpop.trf.xlu0 }
  0xe1   : > { %2098 = vmatmul.msk.f32.gmra.mxu1 %vm57_vm1, %v48_v11 }
  0xe8   : > { %v144_v12 = vpop.trf.xlu0 }
  0xe9   : > { %2100 = vmatmul.msk.f32.vlgmr.msrb.gmra.mxu1 %vm57_vm1, %v144_v12 }
  0xf0   : > { %v145_v13 = vpop.trf.xlu0 }
  0xf1   : > { %2101 = vmatmul.msk.f32.gmra.mxu1 %vm57_vm1, %v145_v13 }
  0xf8   : > { %v146_v14 = vpop.trf.xlu0 }
  0xf9   : > { %2102 = vmatmul.msk.f32.gmra.mxu1 %vm57_vm1, %v146_v14 }
 0x100   : > { %v147_v15 = vpop.trf.xlu0 }
 0x101   : > { %2103 = vmatmul.msk.f32.gmra.mxu1 %vm57_vm1, %v147_v15 }
 0x108   : > { %v148_v16 = vpop.trf.xlu0 }
 0x109   : > { %2104 = vmatmul.msk.f32.gmra.mxu1 %vm57_vm1, %v148_v16 }
 0x110   : > { %v149_v17 = vpop.trf.xlu0 }
 0x111   : > { %2105 = vmatmul.msk.f32.gmra.mxu1 %vm57_vm1, %v149_v17 }
 0x118   : > { %v150_v18 = vpop.trf.xlu0 }
 0x119   : > { %2106 = vmatmul.msk.f32.gmra.mxu1 %vm57_vm1, %v150_v18 }
 0x120   : > { %v151_v19 = vpop.trf.xlu0 }
 0x121   : > { %2107 = vmatmul.msk.f32.gmra.mxu1 %vm57_vm1, %v151_v19  ;;  %vm453_vm1 = vcmask 261120  }
 0x126   : > { %v2430_v31 = vpop.f32.mrf.mxu0 }
 0x12e   : > { %v106_v32 = vpop.f32.mrf.mxu0 }
 0x12f   : > { %v286_v7 = vmul.f32 2.0, %v106_v32 }
 0x136   : > { %v2434_v35 = vpop.f32.mrf.mxu0 }
 0x13e   : > { %v112_v39 = vpop.f32.mrf.mxu0 }
 0x13f   : > { %v288_v59 = vmul.f32 2.0, %v112_v39 }
 0x146   : > { %v115_v42 = vpop.f32.mrf.mxu0 }
 0x147   : > { %v289_v45 = vmul.f32 2.0, %v115_v42 }
 0x14e   : > { %v118_v49 = vpop.f32.mrf.mxu0 }
 0x14f   : > { %v290_v51 = vmul.f32 2.0, %v118_v49 }
 0x156   : > { %v2423_v20 = vpop.f32.mrf.mxu1 }
 0x157   : > { %v291_v40 = vmul.f32 2.0, %v2423_v20 }
 0x15e   : > { %v2425_v21 = vpop.f32.mrf.mxu1 }
 0x166   : > { %v204_v23 = vpop.f32.mrf.mxu1 }
 0x16e   : > { %v207_v24 = vpop.f32.mrf.mxu1 }
 0x176   : > { %v210_v25 = vpop.f32.mrf.mxu1 }
 0x17e   : > { %v213_v26 = vpop.f32.mrf.mxu1 }
 0x186   : > { %v216_v27 = vpop.f32.mrf.mxu1 }
 0x187   : > { %259 = vperm.xlu2 %2162, %v216_v27  }
 0x18e   : > { %v219_v28 = vpop.f32.mrf.mxu1 }
 0x18f   : > { %264 = vperm.xlu2 %2162, %v219_v28  }
 0x196   : > { %v222_v29 = vpop.f32.mrf.mxu1 }
 0x197   : > { %254 = vperm.xlu2 %2162, %v213_v26   ;;  %269 = vperm.xlu1 %2161, %v222_v29  }
 0x19e   : > { %v225_v30 = vpop.f32.mrf.mxu1 }
 0x19f   : > { %244 = vperm.xlu2 %2162, %v207_v24   ;;  %274 = vperm.xlu1 %2161, %v225_v30  }
 0x1a7   : > { %249 = vperm.xlu1 %2161, %v210_v25  }
 0x1af   : > { %239 = vperm.xlu1 %2161, %v204_v23  }
 0x1e1   : > { %v260_v44 = vpop.permute.xlu2 %259 }
 0x1e2   : > { %v281_v46 = vadd.f32 %v260_v44, %v2436_v43 }
 0x1e4   : > { %v297_v47 = vsub.f32 %v281_v46, %v289_v45 }
 0x1e6   : > { %v305_v48 = vmax.f32 %v297_v47, 0.0 }
 0x1e8   : > { %2164 = vrsqrt.f32 %v305_v48  ;;  %vm364_vm3 = vcmp.eq.f32.partialorder %v305_v48, inf  ;;  %v367_v14 = vand.u32 2147483648, %v305_v48  ;;  %vm366_vm4 = vcmp.eq.f32.partialorder %v305_v48, 0.0 }
 0x1e9   : > { %v265_v50 = vpop.permute.xlu2 %264 }
 0x1ea   : > { %v282_v52 = vadd.f32 %v265_v50, %v2436_v43 }
 0x1ec   : > { %v298_v53 = vsub.f32 %v282_v52, %v290_v51 }
 0x1ee   : > { %v2165_v54 = vpop.eup %2164  ;;  %v306_v55 = vmax.f32 %v298_v53, 0.0  ;;  %v292_v53 = vmul.f32 2.0, %v2425_v21 }
 0x1ef   : > { %v358_v56 = vmul.f32 %v2165_v54, %v305_v48 }
 0x1f0   : > { %2166 = vrsqrt.f32 %v306_v55  ;;  %vm376_vm5 = vcmp.eq.f32.partialorder %v306_v55, inf  ;;  %v379_v24 = vand.u32 2147483648, %v306_v55  ;;  %vm378_vm6 = vcmp.eq.f32.partialorder %v306_v55, 0.0 }
 0x1f1   : > { %v359_v57 = vmul.f32 %v2165_v54, %v358_v56  ;;  %v255_v58 = vpop.permute.xlu2 %254 }
 0x1f2   : > { %v280_v60 = vadd.f32 %v255_v58, %v2436_v43 }
 0x1f3   : > { %v360_v61 = vmul.f32 0.5, %v359_v57 }
 0x1f4   : > { %v296_v62 = vsub.f32 %v280_v60, %v288_v59 }
 0x1f5   : > { %v361_v63 = vsub.f32 1.5, %v360_v61 }
 0x1f6   : > { %v2167_v0 = vpop.eup %2166  ;;  %v2441_v1 = vmax.f32 %v296_v62, 0.0 }
 0x1f7   : > { %v362_v2 = vmul.f32 %v2165_v54, %v361_v63  ;;  %v370_v3 = vmul.f32 %v2167_v0, %v306_v55 }
 0x1f8   : > { %2168 = vrsqrt.f32 %v2441_v1  ;;  %vm352_vm7 = vcmp.eq.f32.partialorder %v2441_v1, inf  ;;  %v355_v54 = vand.u32 2147483648, %v2441_v1  ;;  %vm354_vm8 = vcmp.eq.f32.partialorder %v2441_v1, 0.0 }
 0x1f9   : > { %v363_v4 = vmul.f32 %v362_v2, %v305_v48  ;;  %v371_v5 = vmul.f32 %v2167_v0, %v370_v3  ;;  %v245_v6 = vpop.permute.xlu2 %244 }
 0x1fa   : > { %v278_v8 = vadd.f32 %v245_v6, %v2436_v43 }
 0x1fb   : > { %v372_v9 = vmul.f32 0.5, %v371_v5  ;;  %v365_v11 = vsel %vm364_vm3, %v305_v48, %v363_v4 }
 0x1fc   : > { %v294_v10 = vsub.f32 %v278_v8, %v286_v7  ;;  %v2448_v18 = vsel %vm366_vm4, %v367_v14, %v365_v11  ;;  %v287_v8 = vmul.f32 2.0, %v2434_v35 }
 0x1fd   : > { %v373_v12 = vsub.f32 1.5, %v372_v9  ;;  %3683 = vst [vmem:[#allocation2_spill] sm:$0xff] %v2448_v18  ;;  %v2453_v27 = vmul.f32 %v2448_v18, %v2448_v18 }
 0x1fe   : > { %v2169_v13 = vpop.eup %2168  ;;  %v2445_v15 = vmax.f32 %v294_v10, 0.0 }
 0x1ff   : > { %v374_v16 = vmul.f32 %v2167_v0, %v373_v12  ;;  %v346_v17 = vmul.f32 %v2169_v13, %v2441_v1  ;;  %v763_v34 = vmul.f32 -1024.0, %v2453_v27  ;;  %v935_v52 = vmul.f32 -256.0, %v2453_v27 }
 0x200   : > { %2170 = vrsqrt.f32 %v2445_v15  ;;  %v417_v61 = vmul.f32 -16384.0, %v2453_v27  ;;  %v591_v63 = vmul.f32 -4096.0, %v2453_v27  ;;  %vm328_vm9 = vcmp.eq.f32.partialorder %v2445_v15, inf }
 0x201   : > { %v375_v19 = vmul.f32 %v374_v16, %v306_v55  ;;  %v347_v23 = vmul.f32 %v2169_v13, %v346_v17  ;;  %v775_v45 = vmul.f32 1.442695, %v763_v34  ;;  %v947_v21 = vmul.f32 1.442695, %v935_v52 }
 0x202   : > { %v429_v9 = vmul.f32 1.442695, %v417_v61  ;;  %v603_v12 = vmul.f32 1.442695, %v591_v63  ;;  %v331_v16 = vand.u32 2147483648, %v2445_v15  ;;  %vm330_vm10 = vcmp.eq.f32.partialorder %v2445_v15, 0.0 }
 0x203   : > { %v377_v25 = vsel %vm376_vm5, %v306_v55, %v375_v19  ;;  %v348_v26 = vmul.f32 0.5, %v347_v23 }
 0x204   : > { %v2455_v28 = vsel %vm378_vm6, %v379_v24, %v377_v25 }
 0x205   : > { %3684 = vst [vmem:[#allocation3_spill] sm:$0xff] %v2455_v28  ;;  %v349_v29 = vsub.f32 1.5, %v348_v26  ;;  %v2459_v30 = vmul.f32 %v2455_v28, %v2455_v28  ;;  %v285_v26 = vmul.f32 2.0, %v2430_v31  ;;  %v1107_v31 = vmul.f32 -64.0, %v2453_v27 }
 0x206   : > { %v2171_v32 = vpop.eup %2170 }
 0x207   : > { %v322_v33 = vmul.f32 %v2171_v32, %v2445_v15  ;;  %v764_v36 = vmul.f32 -1024.0, %v2459_v30  ;;  %v350_v37 = vmul.f32 %v2169_v13, %v349_v29  ;;  %v936_v50 = vmul.f32 -256.0, %v2459_v30 }
 0x208   : > { %v592_v4 = vmul.f32 -4096.0, %v2459_v30 }
 0x209   : > { %v323_v38 = vmul.f32 %v2171_v32, %v322_v33  ;;  %v270_v39 = vpop.permute.xlu1 %269  ;;  %v777_v42 = vmul.f32 1.442695, %v764_v36  ;;  %v351_v47 = vmul.f32 %v350_v37, %v2441_v1  ;;  %v949_v57 = vmul.f32 1.442695, %v936_v50 }
 0x20a   : > { %v283_v41 = vadd.f32 %v270_v39, %v2436_v43  ;;  %v605_v24 = vmul.f32 1.442695, %v592_v4 }
 0x20b   : > { %v324_v44 = vmul.f32 0.5, %v323_v38  ;;  %2172 = vpow2.f32 %v777_v42  ;;  %v353_v20 = vsel %vm352_vm7, %v2441_v1, %v351_v47  ;;  %v418_v1 = vmul.f32 -16384.0, %v2459_v30 }
 0x20c   : > { %v299_v46 = vsub.f32 %v283_v41, %v291_v40  ;;  %2174 = vpow2.f32 %v775_v45  ;;  %v2480_v59 = vsel %vm354_vm8, %v355_v54, %v353_v20  ;;  %v1108_v45 = vmul.f32 -64.0, %v2459_v30 }
 0x20d   : > { %v325_v48 = vsub.f32 1.5, %v324_v44  ;;  %3685 = vst [vmem:[#allocation4_spill] sm:$0xff] %v2480_v59  ;;  %v2494_v6 = vmul.f32 %v2480_v59, %v2480_v59  ;;  %v431_v35 = vmul.f32 1.442695, %v418_v1  ;;  %vm498_vm8 = vcmask 523264  }
 0x20e   : > { %v2467_v49 = vmax.f32 %v299_v46, 0.0 }
 0x20f   : > { %v326_v55 = vmul.f32 %v2171_v32, %v325_v48  ;;  %v416_v23 = vmul.f32 -16384.0, %v2494_v6  ;;  %v590_v36 = vmul.f32 -4096.0, %v2494_v6  ;;  %v762_v39 = vmul.f32 -1024.0, %v2494_v6 }
 0x210   : > { %2176 = vrsqrt.f32 %v2467_v49  ;;  %vm388_vm11 = vcmp.eq.f32.partialorder %v2467_v49, inf  ;;  %v391_v52 = vand.u32 2147483648, %v2467_v49  ;;  %vm390_vm12 = vcmp.eq.f32.partialorder %v2467_v49, 0.0 }
 0x211   : > { %v275_v51 = vpop.permute.xlu1 %274  ;;  %v2478_v58 = vpop.eup %2172  ;;  %v327_v2 = vmul.f32 %v326_v55, %v2445_v15  ;;  %2178 = vpow2.f32 %v949_v57  ;;  %v427_v42 = vmul.f32 1.442695, %v416_v23  ;;  %v601_v50 = vmul.f32 1.442695, %v590_v36 }
 0x212   : > { %v284_v56 = vadd.f32 %v275_v51, %v2436_v43  ;;  %v2483_v62 = vpop.eup %2174  ;;  %v2498_v7 = vmul.f32 %v2478_v58, %v2455_v28  ;;  %v773_v54 = vmul.f32 1.442695, %v762_v39 }
 0x213   : > { %v2505_v13 = vmul.f32 %v2483_v62, %v2448_v18  ;;  %v329_v14 = vsel %vm328_vm9, %v2445_v15, %v327_v2 }
 0x214   : > { %v300_v60 = vsub.f32 %v284_v56, %v292_v53  ;;  %3686 = vst [vmem:[#allocation5_spill] sm:$0xff] %v2498_v7  ;;  %v2517_v33 = vsel %vm330_vm10, %v331_v16, %v329_v14 }
 0x215   : > { %3687 = vst [vmem:[#allocation6_spill] sm:$0xff] %v2505_v13  ;;  %v2531_v44 = vmul.f32 %v2517_v33, %v2517_v33 }
 0x216   : > { %v2177_v0 = vpop.eup %2176  ;;  %v2487_v3 = vmax.f32 %v300_v60, 0.0  ;;  %3689 = vst [vmem:[#allocation8_spill] sm:$0xff] %v2517_v33 }
 0x217   : > { %v382_v5 = vmul.f32 %v2177_v0, %v2467_v49  ;;  %v2515_v32 = vpop.eup %2178 }
 0x218   : > { %2180 = vrsqrt.f32 %v2487_v3  ;;  %3688 = vst [vmem:[#allocation7_spill] sm:$0xff] %v2515_v32  ;;  %v2537_v20 = vmul.f32 %v2515_v32, %v2455_v28  ;;  %vm400_vm13 = vcmp.eq.f32.partialorder %v2487_v3, inf  ;;  %vm402_vm14 = vcmp.eq.f32.partialorder %v2487_v3, 0.0 }
 0x219   : > { %v383_v10 = vmul.f32 %v2177_v0, %v382_v5  ;;  %v250_v11 = vpop.permute.xlu1 %249  ;;  %2182 = vpow2.f32 %v947_v21 }
 0x21a   : > { %v279_v17 = vadd.f32 %v250_v11, %v2436_v43  ;;  %2184 = vpow2.f32 %v429_v9  ;;  %3691 = vst [vmem:[#allocation10_spill] sm:$0xff] %v2537_v20  ;;  %v1121_v9 = vmul.f32 1.442695, %v1108_v45 }
 0x21b   : > { %v384_v19 = vmul.f32 0.5, %v383_v10  ;;  %2186 = vpow2.f32 %v603_v12 }
 0x21c   : > { %v295_v29 = vsub.f32 %v279_v17, %v287_v8  ;;  %2188 = vpow2.f32 %v431_v35  ;;  %v1119_v8 = vmul.f32 1.442695, %v1107_v31 }
 0x21d   : > { %v385_v34 = vsub.f32 1.5, %v384_v19  ;;  %2190 = vpow2.f32 %v605_v24  ;;  %v403_v19 = vand.u32 2147483648, %v2487_v3 }
 0x21e   : > { %v2181_v37 = vpop.eup %2180  ;;  %v2520_v38 = vmax.f32 %v295_v29, 0.0 }
 0x21f   : > { %v2524_v40 = vpop.eup %2182  ;;  %v386_v15 = vmul.f32 %v2177_v0, %v385_v34  ;;  %v394_v41 = vmul.f32 %v2181_v37, %v2487_v3 }
 0x220   : > { %3690 = vst [vmem:[#allocation9_spill] sm:$0xff] %v2524_v40  ;;  %2192 = vrsqrt.f32 %v2520_v38  ;;  %v2539_v51 = vpop.eup %2184  ;;  %v2545_v55 = vmul.f32 %v2524_v40, %v2448_v18  ;;  %vm340_vm15 = vcmp.eq.f32.partialorder %v2520_v38, inf  ;;  %vm342_vm0 = vcmp.eq.f32.partialorder %v2520_v38, 0.0 }
 0x221   : > { %v387_v46 = vmul.f32 %v386_v15, %v2467_v49  ;;  %v395_v47 = vmul.f32 %v2181_v37, %v394_v41  ;;  %v240_v48 = vpop.permute.xlu1 %239  ;;  %v2547_v56 = vpop.eup %2186  ;;  %2194 = vpow2.f32 %v427_v42 }
 0x222   : > { %v277_v53 = vadd.f32 %v240_v48, %v2436_v43  ;;  %3692 = vst [vmem:[#allocation11_spill] sm:$0xff] %v2545_v55  ;;  %v2551_v61 = vpop.eup %2188  ;;  %v414_v43 = vmul.f32 -16384.0, %v2531_v44  ;;  %2196 = vpow2.f32 %v601_v50 }
 0x223   : > { %v389_v57 = vsel %vm388_vm11, %v2467_v49, %v387_v46  ;;  %v396_v60 = vmul.f32 0.5, %v395_v47  ;;  %v2558_v2 = vpop.eup %2190  ;;  %2198 = vpow2.f32 %v773_v54  ;;  %v760_v47 = vmul.f32 -1024.0, %v2531_v44 }
 0x224   : > { %v2553_v63 = vsel %vm390_vm12, %v391_v52, %v389_v57  ;;  %v293_v21 = vsub.f32 %v277_v53, %v285_v26  ;;  %v423_v16 = vmul.f32 1.442695, %v414_v43 }
 0x225   : > { %3693 = vst [vmem:[#allocation12_spill] sm:$0xff] %v2553_v63  ;;  %v397_v1 = vsub.f32 1.5, %v396_v60  ;;  %v2562_v4 = vmul.f32 %v2553_v63, %v2553_v63 }
 0x226   : > { %v2193_v49 = vpop.eup %2192  ;;  %v2564_v5 = vmax.f32 %v293_v21, 0.0 }
 0x227   : > { %v398_v10 = vmul.f32 %v2181_v37, %v397_v1  ;;  %v334_v11 = vmul.f32 %v2193_v49, %v2520_v38  ;;  %v419_v12 = vmul.f32 -16384.0, %v2562_v4  ;;  %v593_v14 = vmul.f32 -4096.0, %v2562_v4  ;;  %v2571_v17 = vpop.eup %2194 }
 0x228   : > { %2200 = vrsqrt.f32 %v2564_v5  ;;  %v765_v29 = vmul.f32 -1024.0, %v2562_v4  ;;  %v937_v34 = vmul.f32 -256.0, %v2562_v4  ;;  %v2577_v36 = vpop.eup %2196  ;;  %vm316_vm2 = vcmp.eq.f32.partialorder %v2564_v5, inf }
 0x229   : > { %v399_v35 = vmul.f32 %v398_v10, %v2487_v3  ;;  %v335_v23 = vmul.f32 %v2193_v49, %v334_v11  ;;  %v433_v24 = vmul.f32 1.442695, %v419_v12  ;;  %v607_v26 = vmul.f32 1.442695, %v593_v14  ;;  %v2581_v31 = vpop.eup %2198 }
 0x22a   : > { %2202 = vpow2.f32 %v1119_v8  ;;  %v779_v41 = vmul.f32 1.442695, %v765_v29  ;;  %v951_v48 = vmul.f32 1.442695, %v937_v34  ;;  %v343_v11 = vand.u32 2147483648, %v2520_v38 }
 0x22b   : > { %v401_v37 = vsel %vm400_vm13, %v2487_v3, %v399_v35  ;;  %v336_v39 = vmul.f32 0.5, %v335_v23  ;;  %2204 = vpow2.f32 %v1121_v9  ;;  %v934_v3 = vmul.f32 -256.0, %v2494_v6 }
 0x22c   : > { %v2583_v15 = vsel %vm402_vm14, %v403_v19, %v401_v37  ;;  %2206 = vpow2.f32 %v423_v16  ;;  %vm318_vm3 = vcmp.eq.f32.partialorder %v2564_v5, 0.0  ;;  %vm582_vm14 = vcmask 516096  }
 0x22d   : > { %3694 = vst [vmem:[#allocation13_spill] sm:$0xff] %v2583_v15  ;;  %v337_v42 = vsub.f32 1.5, %v336_v39  ;;  %v2587_v45 = vmul.f32 %v2583_v15, %v2583_v15  ;;  %2208 = vpow2.f32 %v433_v24 }
 0x22e   : > { %v2201_v46 = vpop.eup %2200  ;;  %2210 = vpow2.f32 %v607_v26 }
 0x22f   : > { %v338_v50 = vmul.f32 %v2193_v49, %v337_v42  ;;  %v310_v52 = vmul.f32 %v2201_v46, %v2564_v5  ;;  %v420_v53 = vmul.f32 -16384.0, %v2587_v45  ;;  %v594_v54 = vmul.f32 -4096.0, %v2587_v45 }
 0x230   : > { %v2594_v57 = vpop.eup %2202  ;;  %v766_v60 = vmul.f32 -1024.0, %v2587_v45  ;;  %2212 = vpow2.f32 %v779_v41  ;;  %v938_v21 = vmul.f32 -256.0, %v2587_v45  ;;  %v769_v41 = vmul.f32 1.442695, %v760_v47 }
 0x231   : > { %3695 = vst [vmem:[#allocation14_spill] sm:$0xff] %v2594_v57  ;;  %v2599_v43 = vpop.eup %2204  ;;  %v339_v1 = vmul.f32 %v338_v50, %v2520_v38  ;;  %v311_v49 = vmul.f32 %v2201_v46, %v310_v52  ;;  %v435_v8 = vmul.f32 1.442695, %v420_v53  ;;  %v609_v9 = vmul.f32 1.442695, %v594_v54 }
 0x232   : > { %3696 = vst [vmem:[#allocation15_spill] sm:$0xff] %v2599_v43  ;;  %v2602_v10 = vpop.eup %2206  ;;  %v781_v12 = vmul.f32 1.442695, %v766_v60  ;;  %2214 = vpow2.f32 %v951_v48  ;;  %v953_v14 = vmul.f32 1.442695, %v938_v21  ;;  %v2615_v26 = vmul.f32 %v2594_v57, %v2448_v18 }
 0x233   : > { %v2605_v16 = vpop.eup %2208  ;;  %v341_v35 = vsel %vm340_vm15, %v2520_v38, %v339_v1  ;;  %v312_v19 = vmul.f32 0.5, %v311_v49  ;;  %2216 = vpow2.f32 %v435_v8  ;;  %v2619_v29 = vmul.f32 %v2599_v43, %v2455_v28 }
 0x234   : > { %v2609_v23 = vpop.eup %2210  ;;  %v2611_v24 = vsel %vm342_vm0, %v343_v11, %v341_v35  ;;  %2218 = vpow2.f32 %v609_v9  ;;  %3698 = vst [vmem:[#allocation17_spill] sm:$0xff] %v2615_v26  ;;  %v2623_v38 = vpack.c.bf16 %v2551_v61, %v2539_v51  ;;  %v1110_v42 = vmul.f32 -64.0, %v2587_v45 }
 0x235   : > { %3697 = vst [vmem:[#allocation16_spill] sm:$0xff] %v2611_v24  ;;  %v313_v34 = vsub.f32 1.5, %v312_v19  ;;  %v2627_v37 = vmul.f32 %v2611_v24, %v2611_v24  ;;  %2220 = vpow2.f32 %v781_v12  ;;  %v945_v1 = vmul.f32 1.442695, %v934_v3 }
 0x236   : > { %3699 = vst [vmem:[#allocation18_spill] sm:$0xff] %v2619_v29  ;;  %v2629_v39 = vpop.eup %2212  ;;  %2222 = vpow2.f32 %v953_v14  ;;  %v932_v47 = vmul.f32 -256.0, %v2531_v44  ;;  %v1109_v11 = vmul.f32 -64.0, %v2562_v4  ;;  %v319_v14 = vand.u32 2147483648, %v2564_v5 }
 0x237   : > { %v314_v50 = vmul.f32 %v2201_v46, %v313_v34  ;;  %v415_v52 = vmul.f32 -16384.0, %v2627_v37  ;;  %v589_v53 = vmul.f32 -4096.0, %v2627_v37  ;;  %v761_v54 = vmul.f32 -1024.0, %v2627_v37 }
 0x238   : > { %v2215_v60 = vpop.eup %2214  ;;  %v933_v21 = vmul.f32 -256.0, %v2627_v37  ;;  %v1125_v3 = vmul.f32 1.442695, %v1110_v42  ;;  %v941_v29 = vmul.f32 1.442695, %v932_v47 }
 0x239   : > { %v2640_v49 = vpop.eup %2216  ;;  %v315_v8 = vmul.f32 %v314_v50, %v2564_v5  ;;  %v425_v9 = vmul.f32 1.442695, %v415_v52  ;;  %v771_v46 = vmul.f32 1.442695, %v761_v54  ;;  %v599_v52 = vmul.f32 1.442695, %v589_v53 }
 0x23a   : > { %v2644_v12 = vpop.eup %2218  ;;  %v440_v35 = vpack.c.bf16 %v2640_v49, %v2605_v16  ;;  %v943_v0 = vmul.f32 1.442695, %v933_v21  ;;  %v1123_v53 = vmul.f32 1.442695, %v1109_v11  ;;  %v2685_v11 = vpack.c.bf16 %v2558_v2, %v2547_v56 }
 0x23b   : > { %v2650_v19 = vpop.eup %2220  ;;  %v317_v34 = vsel %vm316_vm2, %v2564_v5, %v315_v8  ;;  %v2655_v50 = vpack.c.bf16 %v2644_v12, %v2609_v23  ;;  %2224 = vpow2.f32 %v425_v9  ;;  %v2671_v8 = vmul.f32 %v2629_v39, %v2553_v63 }
 0x23c   : > { %v2223_v54 = vpop.eup %2222  ;;  %v2657_v22 = vsel %vm318_vm3, %v319_v14, %v317_v34  ;;  %506 = vmatpush.bf16.msra.mxu3 %v440_v35  ;;  %v2660_v48 = vsel %vm453_vm1, %v440_v35, 0  ;;  %2226 = vpow2.f32 %v945_v1  ;;  %v2675_v21 = vmul.f32 %v2650_v19, %v2583_v15 }
 0x23d   : > { %3700 = vst [vmem:[#allocation19_spill] sm:$0xff] %v2657_v22  ;;  %473 = vmatpush.bf16.xpose.msra.mxu2 %v2660_v48  ;;  %v641_v5 = vsel %vm453_vm1, %v2655_v50, 0  ;;  %v2667_v42 = vmul.f32 %v2657_v22, %v2657_v22  ;;  %2228 = vpow2.f32 %v771_v46  ;;  %v2677_v1 = vpack.c.bf16 %v2223_v54, %v2215_v60 }
 0x23e   : > { %647 = vmatpush.bf16.xpose.msrb.mxu0 %v641_v5  ;;  %717 = vmatpush.bf16.xpose.msra.mxu1 %v641_v5  ;;  %3701 = vst [vmem:[#allocation20_spill] sm:$0xff] %v2671_v8  ;;  %2230 = vpow2.f32 %v1125_v3  ;;  %v588_v5 = vmul.f32 -4096.0, %v2531_v44  ;;  %v2697_v43 = vmul.f32 %v2223_v54, %v2583_v15  ;;  %v638_v47 = vsel %vm453_vm1, %v2685_v11, 0 }
 0x23f   : > { %3702 = vst [vmem:[#allocation21_spill] sm:$0xff] %v2677_v1  ;;  %v413_v9 = vmul.f32 -16384.0, %v2667_v42  ;;  %2232 = vpow2.f32 %v599_v52  ;;  %v587_v14 = vmul.f32 -4096.0, %v2667_v42  ;;  %v759_v46 = vmul.f32 -1024.0, %v2667_v42 }
 0x240   : > { %507 = vmatpush.bf16.msra.mxu3 %v2623_v38  ;;  %2234 = vpow2.f32 %v943_v0  ;;  %3704 = vst [vmem:[#allocation23_spill] sm:$0xff] %v2697_v43  ;;  %v448_v55 = vmul.f32 %v2640_v49, %v2583_v15  ;;  %v1279_v1 = vmul.f32 -16.0, %v2453_v27 }
 0x241   : > { %v2689_v34 = vpop.eup %2224  ;;  %v421_v3 = vmul.f32 1.442695, %v413_v9  ;;  %v767_v52 = vmul.f32 1.442695, %v759_v46  ;;  %2236 = vpow2.f32 %v1123_v53  ;;  %v595_v0 = vmul.f32 1.442695, %v587_v14 }
 0x242   : > { %v2692_v25 = vpop.eup %2226  ;;  %v438_v26 = vpack.c.bf16 %v2571_v17, %v2689_v34  ;;  %2238 = vpow2.f32 %v769_v41  ;;  %v931_v9 = vmul.f32 -256.0, %v2667_v42  ;;  %v2704_v53 = vsel %vm453_vm1, %v2623_v38, 0 }
 0x243   : > { %3703 = vst [vmem:[#allocation22_spill] sm:$0xff] %v2692_v25  ;;  %v2699_v57 = vpop.eup %2228  ;;  %2240 = vpow2.f32 %v421_v3  ;;  %v2707_v46 = vmul.f32 %v2215_v60, %v2553_v63  ;;  %v2720_v14 = vmul.f32 %v2581_v31, %v2480_v59  ;;  %v597_v60 = vmul.f32 1.442695, %v588_v5 }
 0x244   : > { %v2231_v35 = vpop.eup %2230  ;;  %508 = vmatpush.bf16.msra.mxu3 %v438_v26  ;;  %2242 = vpow2.f32 %v767_v52  ;;  %v2716_v54 = vmul.f32 %v2699_v57, %v2611_v24  ;;  %v939_v3 = vmul.f32 1.442695, %v931_v9  ;;  %v2734_v40 = vmul.f32 %v2692_v25, %v2480_v59 }
 0x245   : > { %3705 = vst [vmem:[#allocation24_spill] sm:$0xff] %v2707_v46  ;;  %v2709_v41 = vpop.eup %2232  ;;  %474 = vmatpush.bf16.xpose.msra.mxu2 %v2704_v53  ;;  %2244 = vpow2.f32 %v941_v29  ;;  %v1106_v5 = vmul.f32 -64.0, %v2494_v6  ;;  %v1105_v46 = vmul.f32 -64.0, %v2627_v37  ;;  %v2761_v25 = vsel %vm453_vm1, %v438_v26, 0 }
 0x246   : > { %3706 = vst [vmem:[#allocation25_spill] sm:$0xff] %v2716_v54  ;;  %v2722_v38 = vpop.eup %2234  ;;  %648 = vmatpush.bf16.xpose.msrb.mxu0 %v638_v47  ;;  %718 = vmatpush.bf16.xpose.msra.mxu1 %v638_v47  ;;  %2246 = vpow2.f32 %v595_v0  ;;  %v2745_v0 = vpack.c.bf16 %v2577_v36, %v2709_v41  ;;  %v447_v26 = vmul.f32 %v2605_v16, %v2553_v63 }
 0x247   : > { %3707 = vst [vmem:[#allocation26_spill] sm:$0xff] %v2720_v14  ;;  %v2237_v20 = vpop.eup %2236  ;;  %v2730_v32 = vmul.f32 %v2722_v38, %v2611_v24  ;;  %2248 = vpow2.f32 %v939_v3  ;;  %v1115_v54 = vmul.f32 1.442695, %v1105_v46 }
 0x248   : > { %3708 = vst [vmem:[#allocation27_spill] sm:$0xff] %v2722_v38  ;;  %v2736_v47 = vpop.eup %2238  ;;  %v2738_v29 = vpack.c.bf16 %v2231_v35, %v2237_v20  ;;  %2250 = vpow2.f32 %v597_v60  ;;  %v635_v38 = vsel %vm453_vm1, %v2745_v0, 0  ;;  %v2783_v14 = vmul.f32 %v2237_v20, %v2553_v63 }
 0x249   : > { %3709 = vst [vmem:[#allocation28_spill] sm:$0xff] %v2730_v32  ;;  %v2741_v9 = vpop.eup %2240  ;;  %v1117_v32 = vmul.f32 1.442695, %v1106_v5  ;;  %v452_v5 = vpack.c.bf16 %v448_v55, %v447_v26  ;;  %v1291_v55 = vmul.f32 1.442695, %v1279_v1  ;;  %v786_v26 = vpack.c.bf16 %v2650_v19, %v2629_v39 }
 0x24a   : > { %3710 = vst [vmem:[#allocation29_spill] sm:$0xff] %v2734_v40  ;;  %v437_v52 = vpack.c.bf16 %v2602_v10, %v2741_v9  ;;  %v2752_v3 = vpop.eup %2242  ;;  %v1452_v39 = vmul.f32 -4.0, %v2459_v30 }
 0x24b   : > { %3711 = vst [vmem:[#allocation30_spill] sm:$0xff] %v2738_v29  ;;  %v2756_v29 = vmul.f32 %v2736_v47, %v2517_v33  ;;  %v2758_v43 = vpop.eup %2244  ;;  %v2767_v60 = vmul.f32 %v2752_v3, %v2657_v22  ;;  %2252 = vpow2.f32 %v1117_v32  ;;  %v1280_v32 = vmul.f32 -16.0, %v2459_v30 }
 0x24c   : > { %3713 = vst [vmem:[#allocation32_spill] sm:$0xff] %v2758_v43  ;;  %509 = vmatpush.bf16.msra.mxu3 %v437_v52  ;;  %v2769_v40 = vpop.eup %2246  ;;  %v2794_v16 = vmul.f32 %v2758_v43, %v2517_v33  ;;  %v1103_v43 = vmul.f32 -64.0, %v2667_v42  ;;  %2254 = vpow2.f32 %v1115_v54 }
 0x24d   : > { %3712 = vst [vmem:[#allocation31_spill] sm:$0xff] %v2756_v29  ;;  %475 = vmatpush.bf16.xpose.msra.mxu2 %v2761_v25  ;;  %v2778_v49 = vpop.eup %2248  ;;  %v1293_v8 = vmul.f32 1.442695, %v1280_v32 }
 0x24e   : > { %3714 = vst [vmem:[#allocation33_spill] sm:$0xff] %v2767_v60  ;;  %649 = vmatpush.bf16.xpose.msrb.mxu0 %v635_v38  ;;  %719 = vmatpush.bf16.xpose.msra.mxu1 %v635_v38  ;;  %v2790_v13 = vmul.f32 %v2778_v49, %v2657_v22  ;;  %v1104_v38 = vmul.f32 -64.0, %v2531_v44  ;;  %v2797_v7 = vpop.eup %2250  ;;  %v1282_v60 = vmul.f32 -16.0, %v2587_v45  ;;  %v1111_v1 = vmul.f32 1.442695, %v1103_v43 }
 0x24f   : > { %3715 = vst [vmem:[#allocation34_spill] sm:$0xff] %v2778_v49  ;;  %v2804_v46 = vpack.c.bf16 %v2797_v7, %v2769_v40  ;;  %v1451_v49 = vmul.f32 -4.0, %v2453_v27  ;;  %v1465_v43 = vmul.f32 1.442695, %v1452_v39  ;;  %v784_v39 = vpack.c.bf16 %v2581_v31, %v2699_v57 }
 0x250   : > { %544 = vmatpush.bf16.xpose.msrb.mxu3 %v2660_v48  ;;  %3716 = vst [vmem:[#allocation35_spill] sm:$0xff] %v2783_v14  ;;  %v2786_v48 = vmul.f32 %v2231_v35, %v2583_v15  ;;  %v1281_v35 = vmul.f32 -16.0, %v2562_v4  ;;  %v1113_v20 = vmul.f32 1.442695, %v1104_v38  ;;  %v1297_v14 = vmul.f32 1.442695, %v1282_v60 }
 0x251   : > { %v632_v54 = vsel %vm453_vm1, %v2804_v46, 0  ;;  %v2822_v19 = vpop.eup %2252  ;;  %v1463_v60 = vmul.f32 1.442695, %v1451_v49  ;;  %v445_v38 = vmul.f32 %v2539_v51, %v2448_v18  ;;  %v1624_v49 = vmul.f32 -1.0, %v2459_v30 }
 0x252   : > { %3717 = vst [vmem:[#allocation36_spill] sm:$0xff] %v2786_v48  ;;  %v1295_v29 = vmul.f32 1.442695, %v1281_v35  ;;  %v2814_v48 = vsel %vm453_vm1, %v437_v52, 0  ;;  %v563_v52 = vsel %vm453_vm1, %v452_v5, 0  ;;  %v1623_v5 = vmul.f32 -1.0, %v2453_v27 }
 0x253   : > { %v2849_v51 = vmul.f32 %v2822_v19, %v2480_v59 }
 0x254   : > { %2256 = vpow2.f32 %v1295_v29  ;;  %v446_v29 = vmul.f32 %v2551_v61, %v2455_v28  ;;  %v785_v61 = vpack.c.bf16 %v2478_v58, %v2483_v62  ;;  %v2374_v62 = vmov 1073758208  }
 0x255   : > { %476 = vmatpush.bf16.xpose.msra.mxu2 %v2814_v48  ;;  %2258 = vpow2.f32 %v1297_v14  ;;  %v2830_v14 = vpop.eup %2254 }
 0x256   : > { %650 = vmatpush.bf16.xpose.msrb.mxu0 %v632_v54  ;;  %720 = vmatpush.bf16.xpose.msra.mxu1 %v632_v54  ;;  %2260 = vpow2.f32 %v1291_v55  ;;  %v2845_v55 = vmul.f32 %v2830_v14, %v2611_v24  ;;  %v1635_v54 = vmul.f32 1.442695, %v1623_v5  ;;  %v2884_v57 = vsel %vm453_vm1, %v785_v61, 0 }
 0x257   : > { %2262 = vpow2.f32 %v1293_v8  ;;  %v451_v8 = vpack.c.bf16 %v446_v29, %v445_v38  ;;  %v1453_v29 = vmul.f32 -4.0, %v2562_v4  ;;  %v444_v38 = vmul.f32 %v2571_v17, %v2480_v59 }
 0x258   : > { %545 = vmatpush.bf16.xpose.msrb.mxu3 %v2704_v53  ;;  %v2828_v53 = vsel %vm453_vm1, %v786_v26, 0  ;;  %2264 = vpow2.f32 %v1113_v20  ;;  %v443_v20 = vmul.f32 %v2689_v34, %v2611_v24 }
 0x259   : > { %2266 = vpow2.f32 %v1111_v1  ;;  %v560_v34 = vsel %vm453_vm1, %v451_v8, 0 }
 0x25a   : > { %v2839_v35 = vpop.eup %2256  ;;  %2268 = vpow2.f32 %v1463_v60  ;;  %v1637_v60 = vmul.f32 1.442695, %v1624_v49  ;;  %v1795_v49 = vmul.f32 -0.25, %v2453_v27  ;;  %v450_v17 = vpack.c.bf16 %v444_v38, %v443_v20 }
 0x25b   : > { %v2841_v32 = vpop.eup %2258  ;;  %2270 = vpow2.f32 %v1465_v43  ;;  %v1625_v27 = vmul.f32 -1.0, %v2562_v4 }
 0x25c   : > { %v2851_v58 = vpop.eup %2260  ;;  %2108 = vmatmul.msk.bf16.vlgmr.msra.gmra.mxu2 %vm453_vm1, %v2374_v62  ;;  %2272 = vpow2.f32 %v1635_v54  ;;  %v1454_v54 = vmul.f32 -4.0, %v2587_v45 }
 0x25d   : > { %569 = vmatpush.bf16.xpose.msrb.mxu2 %v563_v52  ;;  %3718 = vst [vmem:[#allocation37_spill] sm:$0xff] %v2851_v58  ;;  %v2860_v1 = vpop.eup %2262  ;;  %v2875_v5 = vmul.f32 %v2851_v58, %v2448_v18  ;;  %v1796_v52 = vmul.f32 -0.25, %v2459_v30  ;;  %2274 = vpow2.f32 %v1637_v60  ;;  %v622_v58 = vmul.f32 %v2644_v12, %v2583_v15 }
 0x25e   : > { %851 = vmatpush.bf16.msra.mxu0 %v786_v26  ;;  %889 = vmatpush.bf16.xpose.msrb.mxu1 %v2828_v53  ;;  %v2858_v26 = vpack.c.bf16 %v2841_v32, %v2839_v35  ;;  %3720 = vst [vmem:[#allocation39_spill] sm:$0xff] %v2860_v1  ;;  %v2868_v43 = vpop.eup %2264  ;;  %v1807_v12 = vmul.f32 1.442695, %v1795_v49  ;;  %v1278_v60 = vmul.f32 -16.0, %v2494_v6  ;;  %v1469_v38 = vmul.f32 1.442695, %v1454_v54 }
 0x25f   : > { %3721 = vst [vmem:[#allocation40_spill] sm:$0xff] %v2875_v5  ;;  %v2881_v31 = vpop.eup %2266  ;;  %v2904_v20 = vmul.f32 %v2868_v43, %v2517_v33  ;;  %v1809_v62 = vmul.f32 1.442695, %v1796_v52  ;;  %v441_v49 = vmul.f32 %v2741_v9, %v2657_v22  ;;  %v1797_v52 = vmul.f32 -0.25, %v2562_v4 }
 0x260   : > { %3719 = vst [vmem:[#allocation38_spill] sm:$0xff] %v2858_v26  ;;  %546 = vmatpush.bf16.xpose.msrb.mxu3 %v2761_v25  ;;  %v2879_v25 = vmul.f32 %v2860_v1, %v2455_v28  ;;  %v2887_v8 = vpop.eup %2268  ;;  %v2910_v30 = vmul.f32 %v2881_v31, %v2657_v22  ;;  %v442_v9 = vmul.f32 %v2602_v10, %v2517_v33 }
 0x261   : > { %3723 = vst [vmem:[#allocation42_spill] sm:$0xff] %v2887_v8  ;;  %v2893_v1 = vpop.eup %2270  ;;  %v619_v10 = vmul.f32 %v2547_v56, %v2448_v18  ;;  %v2968_v56 = vmul.f32 %v2841_v32, %v2583_v15  ;;  %v1276_v32 = vmul.f32 -16.0, %v2531_v44 }
 0x262   : > { %852 = vmatpush.bf16.msra.mxu0 %v785_v61  ;;  %3722 = vst [vmem:[#allocation41_spill] sm:$0xff] %v2879_v25  ;;  %v1467_v61 = vmul.f32 1.442695, %v1453_v29  ;;  %v557_v29 = vsel %vm453_vm1, %v450_v17, 0  ;;  %v1639_v25 = vmul.f32 1.442695, %v1625_v27  ;;  %v2927_v26 = vpop.eup %2272 }
 0x263   : > { %3726 = vst [vmem:[#allocation45_spill] sm:$0xff] %v2927_v26  ;;  %v1626_v17 = vmul.f32 -1.0, %v2587_v45  ;;  %v2933_v54 = vpop.eup %2274  ;;  %v1289_v27 = vmul.f32 1.442695, %v1278_v60  ;;  %v2945_v4 = vmul.f32 %v2927_v26, %v2448_v18  ;;  %v620_v60 = vmul.f32 %v2558_v2, %v2455_v28 }
 0x264   : > { %2276 = vpow2.f32 %v1467_v61  ;;  %3727 = vst [vmem:[#allocation46_spill] sm:$0xff] %v2933_v54  ;;  %v621_v61 = vmul.f32 %v2609_v23, %v2553_v63  ;;  %v449_v23 = vpack.c.bf16 %v442_v9, %v441_v49  ;;  %v1450_v49 = vmul.f32 -4.0, %v2494_v6 }
 0x265   : > { %570 = vmatpush.bf16.xpose.msrb.mxu2 %v560_v34  ;;  %v2897_v34 = vpack.c.bf16 %v2736_v47, %v2752_v3  ;;  %v2914_v47 = vmul.f32 %v2887_v8, %v2448_v18  ;;  %v2918_v3 = vmul.f32 %v2893_v1, %v2455_v28  ;;  %2278 = vpow2.f32 %v1469_v38  ;;  %3728 = vst [vmem:[#allocation47_spill] sm:$0xff] %v2945_v4 }
 0x266   : > { %853 = vmatpush.bf16.msra.mxu0 %v784_v39  ;;  %890 = vmatpush.bf16.xpose.msrb.mxu1 %v2884_v57  ;;  %2280 = vpow2.f32 %v1807_v12  ;;  %v1641_v38 = vmul.f32 1.442695, %v1626_v17  ;;  %v626_v8 = vpack.c.bf16 %v622_v58, %v621_v61  ;;  %v1277_v12 = vmul.f32 -16.0, %v2627_v37 }
 0x267   : > { %3724 = vst [vmem:[#allocation43_spill] sm:$0xff] %v2914_v47  ;;  %2282 = vpow2.f32 %v1809_v62  ;;  %v1798_v58 = vmul.f32 -0.25, %v2587_v45  ;;  %v554_v2 = vsel %vm453_vm1, %v449_v23, 0 }
 0x268   : > { %3725 = vst [vmem:[#allocation44_spill] sm:$0xff] %v2918_v3  ;;  %547 = vmatpush.bf16.xpose.msrb.mxu3 %v2814_v48  ;;  %v2936_v48 = vsel %vm453_vm1, %v784_v39, 0  ;;  %2284 = vpow2.f32 %v1639_v25  ;;  %v2949_v39 = vmul.f32 %v2933_v54, %v2455_v28  ;;  %v1287_v17 = vmul.f32 1.442695, %v1277_v12 }
 0x269   : > { %2286 = vpow2.f32 %v1641_v38  ;;  %v1813_v9 = vmul.f32 1.442695, %v1798_v58  ;;  %v1449_v12 = vmul.f32 -4.0, %v2627_v37  ;;  %v617_v3 = vmul.f32 %v2709_v41, %v2611_v24 }
 0x26a   : > { %854 = vmatpush.bf16.msra.mxu0 %v2897_v34  ;;  %3729 = vst [vmem:[#allocation48_spill] sm:$0xff] %v2949_v39  ;;  %v2277_v5 = vpop.eup %2276  ;;  %2288 = vpow2.f32 %v1289_v27  ;;  %v736_v27 = vsel %vm453_vm1, %v626_v8, 0  ;;  %v1461_v8 = vmul.f32 1.442695, %v1450_v49  ;;  %v1447_v49 = vmul.f32 -4.0, %v2667_v42 }
 0x26b   : > { %v2279_v62 = vpop.eup %2278  ;;  %v618_v41 = vmul.f32 %v2577_v36, %v2480_v59 }
 0x26c   : > { %v2960_v61 = vpop.eup %2280  ;;  %v2970_v45 = vpack.c.bf16 %v2279_v62, %v2277_v5 }
 0x26d   : > { %571 = vmatpush.bf16.xpose.msrb.mxu2 %v557_v29  ;;  %v1811_v29 = vmul.f32 1.442695, %v1797_v52  ;;  %3730 = vst [vmem:[#allocation49_spill] sm:$0xff] %v2960_v61  ;;  %v2964_v52 = vmul.f32 %v2839_v35, %v2553_v63  ;;  %v2972_v38 = vpop.eup %2282  ;;  %v2981_v35 = vsel %vm453_vm1, %v2897_v34, 0  ;;  %v2989_v23 = vmul.f32 %v2960_v61, %v2448_v18 }
 0x26e   : > { %891 = vmatpush.bf16.xpose.msrb.mxu1 %v2936_v48  ;;  %3731 = vst [vmem:[#allocation50_spill] sm:$0xff] %v2972_v38  ;;  %v2977_v25 = vpop.eup %2284  ;;  %v2993_v34 = vmul.f32 %v2972_v38, %v2455_v28  ;;  %v1285_v18 = vmul.f32 1.442695, %v1276_v32  ;;  %v1794_v28 = vmul.f32 -0.25, %v2494_v6  ;;  %v1621_v61 = vmul.f32 -1.0, %v2627_v37 }
 0x26f   : > { %2290 = vpow2.f32 %v1811_v29  ;;  %v2287_v4 = vpop.eup %2286  ;;  %3732 = vst [vmem:[#allocation51_spill] sm:$0xff] %v2989_v23  ;;  %v1459_v29 = vmul.f32 1.442695, %v1449_v12 }
 0x270   : > { %2292 = vpow2.f32 %v1813_v9  ;;  %3733 = vst [vmem:[#allocation52_spill] sm:$0xff] %v2993_v34  ;;  %v2997_v58 = vpack.c.bf16 %v2287_v4, %v2977_v25  ;;  %v1622_v9 = vmul.f32 -1.0, %v2494_v6  ;;  %v3000_v39 = vpop.eup %2288  ;;  %v3016_v6 = vmul.f32 %v2279_v62, %v2583_v15 }
 0x271   : > { %2294 = vpow2.f32 %v1287_v17  ;;  %v1275_v17 = vmul.f32 -16.0, %v2667_v42 }
 0x272   : > { %3734 = vst [vmem:[#allocation53_spill] sm:$0xff] %v2997_v58  ;;  %2296 = vpow2.f32 %v1461_v8  ;;  %v1633_v26 = vmul.f32 1.442695, %v1622_v9  ;;  %v1805_v8 = vmul.f32 1.442695, %v1794_v28  ;;  %v3031_v9 = vmul.f32 %v3000_v39, %v2480_v59 }
 0x273   : > { %v1283_v12 = vmul.f32 1.442695, %v1275_v17  ;;  %2298 = vpow2.f32 %v1459_v29  ;;  %v1631_v29 = vmul.f32 1.442695, %v1621_v61  ;;  %v624_v28 = vpack.c.bf16 %v618_v41, %v617_v3 }
 0x274   : > { %2300 = vpow2.f32 %v1285_v18  ;;  %v1620_v17 = vmul.f32 -1.0, %v2531_v44 }
 0x275   : > { %572 = vmatpush.bf16.xpose.msrb.mxu2 %v554_v2  ;;  %v1448_v2 = vmul.f32 -4.0, %v2531_v44  ;;  %v2291_v38 = vpop.eup %2290  ;;  %2302 = vpow2.f32 %v1283_v12 }
 0x276   : > { %892 = vmatpush.bf16.xpose.msrb.mxu1 %v2981_v35  ;;  %v2293_v47 = vpop.eup %2292  ;;  %v3073_v61 = vmul.f32 %v2291_v38, %v2553_v63 }
 0x277   : > { %v1457_v54 = vmul.f32 1.442695, %v1448_v2  ;;  %v3009_v58 = vpop.eup %2294  ;;  %v1629_v2 = vmul.f32 1.442695, %v1620_v17 }
 0x278   : > { %v3027_v62 = vmul.f32 %v3009_v58, %v2611_v24  ;;  %v3033_v18 = vpop.eup %2296  ;;  %3738 = vst [vmem:[#allocation57_spill] sm:$0xff] %v3073_v61 }
 0x279   : > { %2304 = vpow2.f32 %v1457_v54  ;;  %v3035_v36 = vpop.eup %2298  ;;  %v1793_v54 = vmul.f32 -0.25, %v2627_v37  ;;  %v3049_v3 = vmul.f32 %v3033_v18, %v2480_v59 }
 0x27a   : > { %2306 = vpow2.f32 %v1633_v26  ;;  %v3044_v12 = vpop.eup %2300  ;;  %v1619_v26 = vmul.f32 -1.0, %v2667_v42  ;;  %v3055_v37 = vmul.f32 %v3035_v36, %v2611_v24 }
 0x27b   : > { %2308 = vpow2.f32 %v1805_v8  ;;  %v3051_v41 = vpop.eup %2302  ;;  %v3065_v8 = vmul.f32 %v2293_v47, %v2583_v15 }
 0x27c   : > { %2310 = vpow2.f32 %v1631_v29 }
 0x27d   : > { %742 = vmatpush.bf16.xpose.msra.mxu2 %v736_v27  ;;  %v625_v27 = vpack.c.bf16 %v620_v60, %v619_v10  ;;  %v3013_v10 = vmul.f32 %v2277_v5, %v2553_v63  ;;  %v3018_v60 = vpack.c.bf16 %v2293_v47, %v2291_v38  ;;  %v1455_v5 = vmul.f32 1.442695, %v1447_v49  ;;  %3737 = vst [vmem:[#allocation56_spill] sm:$0xff] %v3065_v8 }
 0x27e   : > { %v616_v49 = vmul.f32 %v2797_v7, %v2517_v33  ;;  %v3059_v7 = vmul.f32 %v2977_v25, %v2553_v63  ;;  %v3089_v38 = vmul.f32 %v3044_v12, %v2517_v33 }
 0x27f   : > { %v733_v32 = vsel %vm453_vm1, %v625_v27, 0  ;;  %v1792_v27 = vmul.f32 -0.25, %v2531_v44  ;;  %2312 = vpow2.f32 %v1455_v5  ;;  %v3062_v44 = vmul.f32 %v2287_v4, %v2583_v15  ;;  %v3067_v29 = vpop.eup %2304 }
 0x280   : > { %3735 = vst [vmem:[#allocation54_spill] sm:$0xff] %v3059_v7  ;;  %v730_v5 = vsel %vm453_vm1, %v624_v28, 0  ;;  %v3075_v23 = vpop.eup %2306  ;;  %v1627_v28 = vmul.f32 1.442695, %v1619_v26  ;;  %v1791_v4 = vmul.f32 -0.25, %v2667_v42  ;;  %v3108_v17 = vmul.f32 %v3067_v29, %v2517_v33 }
 0x281   : > { %3736 = vst [vmem:[#allocation55_spill] sm:$0xff] %v3062_v44  ;;  %v1801_v47 = vmul.f32 1.442695, %v1792_v27  ;;  %v3081_v15 = vpop.eup %2308  ;;  %v3116_v42 = vmul.f32 %v3075_v23, %v2480_v59 }
 0x282   : > { %3739 = vst [vmem:[#allocation58_spill] sm:$0xff] %v3081_v15  ;;  %v1799_v63 = vmul.f32 1.442695, %v1791_v4  ;;  %v3125_v4 = vmul.f32 %v3081_v15, %v2480_v59 }
 0x283   : > { %3742 = vst [vmem:[#allocation61_spill] sm:$0xff] %v3116_v42 }
 0x284   : > { %3744 = vst [vmem:[#allocation63_spill] sm:$0xff] %v3125_v4 }
 0x285   : > { %743 = vmatpush.bf16.xpose.msra.mxu2 %v733_v32  ;;  %v1803_v32 = vmul.f32 1.442695, %v1793_v54  ;;  %v615_v54 = vmul.f32 %v2769_v40, %v2657_v22  ;;  %v3085_v40 = vmul.f32 %v3051_v41, %v2657_v22 }
 0x287   : > { %2314 = vpow2.f32 %v1803_v32  ;;  %v623_v32 = vpack.c.bf16 %v616_v49, %v615_v54 }
 0x288   : > { %2316 = vpow2.f32 %v1629_v2 }
 0x289   : > { %2318 = vpow2.f32 %v1801_v47  ;;  %v727_v2 = vsel %vm453_vm1, %v623_v32, 0 }
 0x28a   : > { %2320 = vpow2.f32 %v1627_v28 }
 0x28b   : > { %2322 = vpow2.f32 %v1799_v63 }
 0x28d   : > { %744 = vmatpush.bf16.xpose.msra.mxu2 %v730_v5  ;;  %v3093_v5 = vpop.eup %2310 }
 0x28e   : > { %v3095_v27 = vpop.eup %2312  ;;  %v3112_v49 = vmul.f32 %v3093_v5, %v2611_v24 }
 0x28f   : > { %v3100_v34 = vpop.eup %2314  ;;  %v3104_v26 = vmul.f32 %v3095_v27, %v2657_v22 }
 0x290   : > { %3740 = vst [vmem:[#allocation59_spill] sm:$0xff] %v3100_v34  ;;  %v3121_v54 = vmul.f32 %v3100_v34, %v2611_v24  ;;  %v3131_v25 = vpop.eup %2316 }
 0x291   : > { %3741 = vst [vmem:[#allocation60_spill] sm:$0xff] %v3112_v49  ;;  %v3135_v32 = vpop.eup %2318  ;;  %v3147_v47 = vmul.f32 %v3131_v25, %v2517_v33 }
 0x292   : > { %3743 = vst [vmem:[#allocation62_spill] sm:$0xff] %v3121_v54  ;;  %v3137_v24 = vpop.eup %2320  ;;  %v3155_v63 = vmul.f32 %v3135_v32, %v2517_v33 }
 0x293   : > { %3745 = vst [vmem:[#allocation64_spill] sm:$0xff] %v3135_v32  ;;  %v3139_v61 = vpop.eup %2322 }
 0x294   : > { %3746 = vst [vmem:[#allocation65_spill] sm:$0xff] %v3139_v61  ;;  %v3151_v28 = vmul.f32 %v3139_v61, %v2657_v22 }
 0x295   : > { %745 = vmatpush.bf16.xpose.msra.mxu2 %v727_v2  ;;  %v3143_v2 = vmul.f32 %v3137_v24, %v2657_v22  ;;  %3748 = vst [vmem:[#allocation67_spill] sm:$0xff] %v3147_v47 }
 0x296   : > { %3749 = vst [vmem:[#allocation68_spill] sm:$0xff] %v3151_v28  ;;  %v3757_v28 = vld [vmem:[#allocation25_spill] sm:$0xff] }
 0x297   : > { %3747 = vst [vmem:[#allocation66_spill] sm:$0xff] %v3143_v2 }
 0x298   : > { %3750 = vst [vmem:[#allocation69_spill] sm:$0xff] %v3155_v63 }
 0x2df   : > { %v478_v4 = vpop.f32.mrf.mxu2 }
 0x2e0   : > { %v479_v8 = vadd.f32 1e-09, %v478_v4 }
 0x2e2   : > { %2324 = vrcp.f32 %v479_v8  ;;  %v493_v15 = vand.u32 2147483648, %v479_v8  ;;  %v491_v61 = vand.u32 2147483647, %v479_v8  ;;  %vm487_vm5 = vweird.f32 %v479_v8 }
 0x2e4   : > { %v494_v33 = vor.u32 1.1754944e-38, %v493_v15  ;;  %vm492_vm7 = vcmp.eq.f32.partialorder %v491_v61, 8.507059e+37 }
 0x2e7   : > { %v480_v49 = vpop.f32.mrf.mxu2 }
 0x2e8   : > { %v2325_v42 = vpop.eup %2324 }
 0x2e9   : > { %v483_v7 = vmul.f32 %v2325_v42, %v479_v8  ;;  %vm488_vm4 = vweird.f32 %v2325_v42 }
 0x2ea   : > { %vm489_vm6 = vmor %vm487_vm5, %vm488_vm4 }
 0x2eb   : > { %v484_v44 = vsub.f32 1.0, %v483_v7 }
 0x2ed   : > { %v485_v22 = vmul.f32 %v2325_v42, %v484_v44 }
 0x2ef   : > { %v486_v34 = vadd.f32 %v2325_v42, %v485_v22 }
 0x2f1   : > { %v490_v32 = vsel %vm489_vm6, %v2325_v42, %v486_v34 }
 0x2f2   : > { %v3161_v59 = vsel %vm492_vm7, %v494_v33, %v490_v32 }
 0x2f3   : > { %v497_v4 = vpack.c.bf16 %v3161_v59, %v3161_v59 }
 0x2f5   : > { %2109 = vmatmul.msk.bf16.vlgmr.msra.gmra.mxu3 %vm498_vm8, %v497_v4 }
 0x2f6   : > { %679 = vmatpush.bf16.msra.mxu3 %v2655_v50  ;;  %v3751_v50 = vld [vmem:[#allocation20_spill] sm:$0xff] }
 0x2fa   : > { %680 = vmatpush.bf16.msra.mxu3 %v2685_v11  ;;  %v3752_v11 = vpack.c.bf16 %v2675_v21, %v3751_v50 }
 0x2fe   : > { %681 = vmatpush.bf16.msra.mxu3 %v2745_v0  ;;  %v908_v0 = vsel %vm453_vm1, %v3752_v11, 0 }
 0x302   : > { %682 = vmatpush.bf16.msra.mxu3 %v2804_v46 }
 0x378   : > { %v511_v22 = vpop.f32.mrf.mxu3 }
 0x379   : > { %v515_v15 = vmul.f32 2.0, %v511_v22  ;;  %v3753_v22 = vld [vmem:[#allocation5_spill] sm:$0xff] }
 0x37b   : > { %v516_v34 = vadd.f32 1e-09, %v515_v15  ;;  %v534_v61 = vsub.f32 2.0, %v515_v15  ;;  %v3754_v15 = vld [vmem:[#allocation6_spill] sm:$0xff] }
 0x37d   : > { %2326 = vrcp.f32 %v516_v34  ;;  %v3170_v33 = vmax.f32 %v534_v61, 0.0  ;;  %v528_v42 = vand.u32 2147483648, %v516_v34  ;;  %v526_v4 = vand.u32 2147483647, %v516_v34 }
 0x37e   : > { %v3755_v61 = vpack.c.bf16 %v3753_v22, %v3754_v15  ;;  %vm522_vm10 = vweird.f32 %v516_v34 }
 0x37f   : > { %v627_v7 = vpack.c.bf16 %v3170_v33, %v3170_v33  ;;  %v529_v21 = vor.u32 1.1754944e-38, %v528_v42  ;;  %vm527_vm12 = vcmp.eq.f32.partialorder %v526_v4, 8.507059e+37 }
 0x380   : > { %v513_v44 = vpop.f32.mrf.mxu3 }
 0x381   : > { %2112 = vmatmul.msk.bf16.vlgmr.msrb.gmra.mxu0 %vm453_vm1, %v627_v7  ;;  %v905_v44 = vsel %vm453_vm1, %v3755_v61, 0  ;;  %v3765_v61 = vld [vmem:[#allocation27_spill] sm:$0xff] }
 0x382   : > { %914 = vmatpush.bf16.xpose.msrb.mxu0 %v908_v0 }
 0x383   : > { %v2327_v46 = vpop.eup %2326 }
 0x384   : > { %v518_v8 = vmul.f32 %v2327_v46, %v516_v34  ;;  %vm523_vm9 = vweird.f32 %v2327_v46  ;;  %v3759_v34 = vld [vmem:[#allocation21_spill] sm:$0xff] }
 0x385   : > { %vm524_vm11 = vmor %vm522_vm10, %vm523_vm9  ;;  %v3191_v42 = vsel %vm453_vm1, %v3759_v34, 0 }
 0x386   : > { %v519_v49 = vsub.f32 1.0, %v518_v8  ;;  %v3756_v8 = vld [vmem:[#allocation26_spill] sm:$0xff] }
 0x388   : > { %v520_v32 = vmul.f32 %v2327_v46, %v519_v49  ;;  %v3758_v49 = vpack.c.bf16 %v3756_v8, %v3757_v28 }
 0x38a   : > { %915 = vmatpush.bf16.xpose.msrb.mxu0 %v905_v44  ;;  %v521_v7 = vadd.f32 %v2327_v46, %v520_v32  ;;  %v902_v63 = vsel %vm453_vm1, %v3758_v49, 0  ;;  %v3761_v32 = vld [vmem:[#allocation33_spill] sm:$0xff] }
 0x38c   : > { %v525_v50 = vsel %vm524_vm11, %v2327_v46, %v521_v7  ;;  %v3760_v46 = vld [vmem:[#allocation31_spill] sm:$0xff] }
 0x38d   : > { %v530_v11 = vsel %vm527_vm12, %v529_v21, %v525_v50  ;;  %v3762_v28 = vpack.c.bf16 %v3760_v46, %v3761_v32  ;;  %v3767_v21 = vld [vmem:[#allocation34_spill] sm:$0xff]  ;;  %v3768_v50 = vld [vmem:[#allocation32_spill] sm:$0xff] }
 0x38e   : > { %v531_v0 = vmul.f32 2.0, %v530_v11  ;;  %v955_v11 = vpack.c.bf16 %v3768_v50, %v3767_v21 }
 0x38f   : > { %v899_v4 = vsel %vm453_vm1, %v3762_v28, 0 }
 0x390   : > { %v532_v54 = vmin.f32 %v531_v0, 1.0  ;;  %v3216_v0 = vsel %vm453_vm1, %v955_v11, 0 }
 0x392   : > { %916 = vmatpush.bf16.xpose.msrb.mxu0 %v902_v63  ;;  %v533_v2 = vmul.f32 2.0, %v532_v54  ;;  %v3763_v54 = vld [vmem:[#allocation9_spill] sm:$0xff]  ;;  %v3764_v63 = vld [vmem:[#allocation7_spill] sm:$0xff] }
 0x394   : > { %v536_v22 = vpack.c.bf16 %v533_v2, %v533_v2  ;;  %v957_v2 = vpack.c.bf16 %v3764_v63, %v3763_v54 }
 0x396   : > { %2110 = vmatmul.msk.bf16.vlgmr.msrb.gmra.mxu3 %vm453_vm1, %v536_v22  ;;  %2111 = vmatmul.msk.bf16.vlgmr.msrb.gmra.mxu2 %vm453_vm1, %v536_v22  ;;  %v3202_v15 = vsel %vm453_vm1, %v957_v2, 0 }
 0x397   : > { %819 = vmatpush.bf16.xpose.msrb.mxu3 %v2828_v53  ;;  %991 = vmatpush.bf16.xpose.msrb.mxu2 %v3191_v42  ;;  %v3766_v53 = vld [vmem:[#allocation22_spill] sm:$0xff] }
 0x398   : > { %v956_v44 = vpack.c.bf16 %v3766_v53, %v3765_v61 }
 0x39a   : > { %917 = vmatpush.bf16.xpose.msrb.mxu0 %v899_v4  ;;  %v3209_v7 = vsel %vm453_vm1, %v956_v44, 0 }
 0x39f   : > { %820 = vmatpush.bf16.xpose.msrb.mxu3 %v2884_v57  ;;  %992 = vmatpush.bf16.xpose.msrb.mxu2 %v3202_v15 }
 0x3a7   : > { %821 = vmatpush.bf16.xpose.msrb.mxu3 %v2936_v48  ;;  %993 = vmatpush.bf16.xpose.msrb.mxu2 %v3209_v7 }
 0x3af   : > { %822 = vmatpush.bf16.xpose.msrb.mxu3 %v2981_v35  ;;  %994 = vmatpush.bf16.xpose.msrb.mxu2 %v3216_v0 }
 0x3fe   : > { %v652_v57 = vpop.f32.mrf.mxu0 }
 0x3ff   : > { %v653_v8 = vadd.f32 1e-09, %v652_v57 }
 0x401   : > { %2328 = vrcp.f32 %v653_v8  ;;  %v667_v54 = vand.u32 2147483648, %v653_v8  ;;  %vm661_vm15 = vweird.f32 %v653_v8  ;;  %v665_v35 = vand.u32 2147483647, %v653_v8 }
 0x403   : > { %vm666_vm2 = vcmp.eq.f32.partialorder %v665_v35, 8.507059e+37  ;;  %v3769_v35 = vld [vmem:[#allocation23_spill] sm:$0xff] }
 0x406   : > { %v654_v49 = vpop.f32.mrf.mxu0 }
 0x407   : > { %v2329_v22 = vpop.eup %2328  ;;  %v668_v49 = vor.u32 1.1754944e-38, %v667_v54 }
 0x408   : > { %v657_v46 = vmul.f32 %v2329_v22, %v653_v8  ;;  %vm662_vm13 = vweird.f32 %v2329_v22 }
 0x409   : > { %vm663_vm0 = vmor %vm661_vm15, %vm662_vm13 }
 0x40a   : > { %v658_v32 = vsub.f32 1.0, %v657_v46 }
 0x40c   : > { %v659_v48 = vmul.f32 %v2329_v22, %v658_v32 }
 0x40e   : > { %v660_v28 = vadd.f32 %v2329_v22, %v659_v48 }
 0x410   : > { %v664_v50 = vsel %vm663_vm0, %v2329_v22, %v660_v28 }
 0x411   : > { %v669_v32 = vsel %vm666_vm2, %v668_v49, %v664_v50 }
 0x419   : > { %v549_v4 = vpop.f32.mrf.mxu3  ;;  %v574_v63 = vpop.f32.mrf.mxu2 }
 0x41a   : > { %v578_v61 = vmul.f32 %v549_v4, %v3161_v59  ;;  %v581_v53 = vmul.f32 %v574_v63, %v3161_v59 }
 0x41c   : > { %v579_v21 = vsub.f32 1.0, %v578_v61  ;;  %v583_v57 = vsel %vm582_vm14, %v581_v53, 0.0 }
 0x41d   : > { %584 = vadd.xlane.f32.xlu1 %v583_v57 }
 0x41e   : > { %v3223_v46 = vmax.f32 %v579_v21, 0.0 }
 0x420   : > { %v3226_v48 = vmul.f32 %v669_v32, %v3223_v46 }
 0x421   : > { %v551_v47 = vpop.f32.mrf.mxu3  ;;  %v576_v4 = vpop.f32.mrf.mxu2 }
 0x422   : > { %v671_v8 = vpack.c.bf16 %v3226_v48, %v3226_v48  ;;  %v3772_v4 = vld [vmem:[#allocation10_spill] sm:$0xff] }
 0x424   : > { %2113 = vmatmul.msk.bf16.vlgmr.msra.gmra.mxu3 %vm498_vm8, %v671_v8  ;;  %v3773_v8 = vld [vmem:[#allocation11_spill] sm:$0xff] }
 0x425   : > { %1023 = vmatpush.bf16.msra.mxu3 %v3759_v34  ;;  %v3770_v34 = vld [vmem:[#allocation24_spill] sm:$0xff] }
 0x429   : > { %1024 = vmatpush.bf16.msra.mxu3 %v957_v2  ;;  %v3771_v2 = vpack.c.bf16 %v3769_v35, %v3770_v34 }
 0x42d   : > { %1025 = vmatpush.bf16.msra.mxu3 %v956_v44  ;;  %v1080_v44 = vsel %vm453_vm1, %v3771_v2, 0  ;;  %v3775_v2 = vld [vmem:[#allocation29_spill] sm:$0xff] }
 0x431   : > { %1026 = vmatpush.bf16.msra.mxu3 %v955_v11 }
 0x4a7   : > { %v684_v59 = vpop.f32.mrf.mxu3 }
 0x4a8   : > { %v688_v22 = vmul.f32 %v684_v59, %v3170_v33  ;;  %v3774_v59 = vpack.c.bf16 %v3772_v4, %v3773_v8  ;;  %v3781_v4 = vpack.c.bf16 %v2794_v16, %v2790_v13 }
 0x4aa   : > { %v689_v28 = vadd.f32 1e-09, %v688_v22  ;;  %v707_v54 = vsub.f32 %v3170_v33, %v688_v22  ;;  %v1077_v22 = vsel %vm453_vm1, %v3774_v59, 0  ;;  %v1071_v8 = vsel %vm453_vm1, %v3781_v4, 0 }
 0x4ac   : > { %2330 = vrcp.f32 %v689_v28  ;;  %v3234_v63 = vmax.f32 %v707_v54, 0.0  ;;  %v701_v50 = vand.u32 2147483648, %v689_v28  ;;  %v699_v49 = vand.u32 2147483647, %v689_v28 }
 0x4ad   : > { %vm695_vm4 = vweird.f32 %v689_v28 }
 0x4ae   : > { %v799_v61 = vpack.c.bf16 %v3234_v63, %v3234_v63  ;;  %v702_v54 = vor.u32 1.1754944e-38, %v701_v50  ;;  %vm700_vm6 = vcmp.eq.f32.partialorder %v699_v49, 8.507059e+37  ;;  %v3779_v50 = vld [vmem:[#allocation14_spill] sm:$0xff]  ;;  %v3780_v49 = vld [vmem:[#allocation15_spill] sm:$0xff] }
 0x4af   : > { %v686_v47 = vpop.f32.mrf.mxu3 }
 0x4b0   : > { %2116 = vmatmul.msk.bf16.vlgmr.msrb.gmra.mxu3 %vm453_vm1, %v799_v61 }
 0x4b1   : > { %1086 = vmatpush.bf16.xpose.msrb.mxu3 %v1080_v44  ;;  %v3776_v44 = vld [vmem:[#allocation28_spill] sm:$0xff] }
 0x4b2   : > { %v2331_v11 = vpop.eup %2330 }
 0x4b3   : > { %v691_v53 = vmul.f32 %v2331_v11, %v689_v28  ;;  %vm696_vm3 = vweird.f32 %v2331_v11 }
 0x4b4   : > { %vm697_vm5 = vmor %vm695_vm4, %vm696_vm3 }
 0x4b5   : > { %v692_v21 = vsub.f32 1.0, %v691_v53  ;;  %v3777_v53 = vpack.c.bf16 %v3775_v2, %v3776_v44 }
 0x4b7   : > { %v693_v57 = vmul.f32 %v2331_v11, %v692_v21  ;;  %v1074_v21 = vsel %vm453_vm1, %v3777_v53, 0 }
 0x4b9   : > { %v694_v32 = vadd.f32 %v2331_v11, %v693_v57  ;;  %1087 = vmatpush.bf16.xpose.msrb.mxu3 %v1077_v22 }
 0x4bb   : > { %v698_v47 = vsel %vm697_vm5, %v2331_v11, %v694_v32  ;;  %v3778_v11 = vld [vmem:[#allocation30_spill] sm:$0xff]  ;;  %v1129_v32 = vpack.c.bf16 %v3780_v49, %v3779_v50 }
 0x4bc   : > { %v703_v61 = vsel %vm700_vm6, %v702_v54, %v698_v47 }
 0x4bd   : > { %v704_v35 = vmul.f32 %v703_v61, %v3170_v33  ;;  %v1154_v4 = vsel %vm453_vm1, %v1129_v32, 0 }
 0x4bf   : > { %v705_v34 = vmin.f32 %v704_v35, 1.0 }
 0x4c1   : > { %v706_v28 = vmul.f32 %v705_v34, %v3170_v33  ;;  %1088 = vmatpush.bf16.xpose.msrb.mxu3 %v1074_v21  ;;  %v1128_v33 = vpack.c.bf16 %v2822_v19, %v2830_v14 }
 0x4c3   : > { %v709_v57 = vpack.c.bf16 %v706_v28, %v706_v28 }
 0x4c5   : > { %2114 = vmatmul.msk.bf16.vlgmr.msra.gmra.mxu1 %vm453_vm1, %v709_v57  ;;  %2115 = vmatmul.msk.bf16.vlgmr.msra.gmra.mxu2 %vm453_vm1, %v709_v57 }
 0x4c6   : > { %1061 = vmatpush.bf16.xpose.msra.mxu1 %v3191_v42  ;;  %1195 = vmatpush.bf16.msra.mxu2 %v3778_v11  ;;  %v1127_v42 = vpack.c.bf16 %v2868_v43, %v2881_v31 }
 0x4c9   : > { %1089 = vmatpush.bf16.xpose.msrb.mxu3 %v1071_v8  ;;  %v1151_v8 = vsel %vm453_vm1, %v1128_v33, 0 }
 0x4ca   : > { %1196 = vmatpush.bf16.msra.mxu2 %v1129_v32 }
 0x4ce   : > { %1062 = vmatpush.bf16.xpose.msra.mxu1 %v3202_v15  ;;  %1197 = vmatpush.bf16.msra.mxu2 %v1128_v33  ;;  %v3782_v33 = vld [vmem:[#allocation36_spill] sm:$0xff] }
 0x4d2   : > { %1198 = vmatpush.bf16.msra.mxu2 %v1127_v42 }
 0x4d6   : > { %1063 = vmatpush.bf16.xpose.msra.mxu1 %v3209_v7 }
 0x4de   : > { %1064 = vmatpush.bf16.xpose.msra.mxu1 %v3216_v0 }
 0x533   : > { %v824_v59 = vpop.f32.mrf.mxu3 }
 0x534   : > { %v825_v13 = vadd.f32 1e-09, %v824_v59 }
 0x536   : > { %2332 = vrcp.f32 %v825_v13  ;;  %v839_v14 = vand.u32 2147483648, %v825_v13  ;;  %v837_v35 = vand.u32 2147483647, %v825_v13  ;;  %vm833_vm9 = vweird.f32 %v825_v13 }
 0x538   : > { %v840_v0 = vor.u32 1.1754944e-38, %v839_v14  ;;  %vm838_vm11 = vcmp.eq.f32.partialorder %v837_v35, 8.507059e+37 }
 0x53b   : > { %v826_v16 = vpop.f32.mrf.mxu3 }
 0x53c   : > { %v2333_v22 = vpop.eup %2332 }
 0x53d   : > { %v829_v54 = vmul.f32 %v2333_v22, %v825_v13  ;;  %vm834_vm7 = vweird.f32 %v2333_v22 }
 0x53e   : > { %vm835_vm10 = vmor %vm833_vm9, %vm834_vm7 }
 0x53f   : > { %v830_v47 = vsub.f32 1.0, %v829_v54 }
 0x541   : > { %v831_v19 = vmul.f32 %v2333_v22, %v830_v47  ;;  %v3783_v47 = vld [vmem:[#allocation35_spill] sm:$0xff] }
 0x542   : > { %v722_v61 = vpop.f32.mrf.mxu1 }
 0x543   : > { %v751_v15 = vmul.f32 %v722_v61, %v3226_v48  ;;  %v832_v43 = vadd.f32 %v2333_v22, %v831_v19  ;;  %v3784_v61 = vpack.c.bf16 %v3782_v33, %v3783_v47  ;;  %v3790_v33 = vld [vmem:[#allocation37_spill] sm:$0xff]  ;;  %v3791_v47 = vld [vmem:[#allocation39_spill] sm:$0xff] }
 0x545   : > { %v752_v31 = vsub.f32 %v3223_v46, %v751_v15  ;;  %v836_v7 = vsel %vm835_vm10, %v2333_v22, %v832_v43  ;;  %v1157_v46 = vsel %vm453_vm1, %v3778_v11, 0 }
 0x546   : > { %v841_v2 = vsel %vm838_vm11, %v840_v0, %v836_v7  ;;  %v3785_v0 = vld [vmem:[#allocation18_spill] sm:$0xff] }
 0x547   : > { %v3272_v34 = vmax.f32 %v752_v31, 0.0 }
 0x548   : > { %v747_v44 = vpop.f32.mrf.mxu2 }
 0x549   : > { %v3275_v53 = vmul.f32 %v841_v2, %v3272_v34  ;;  %v754_v21 = vmul.f32 %v747_v44, %v3226_v48  ;;  %v1148_v48 = vsel %vm453_vm1, %v1127_v42, 0  ;;  %v1252_v42 = vsel %vm453_vm1, %v3784_v61, 0  ;;  %v3786_v2 = vld [vmem:[#allocation17_spill] sm:$0xff] }
 0x54a   : > { %v724_v28 = vpop.f32.mrf.mxu1  ;;  %v3787_v44 = vpack.c.bf16 %v3785_v0, %v3786_v2  ;;  %v1301_v61 = vpack.c.bf16 %v3791_v47, %v3790_v33 }
 0x54b   : > { %v843_v57 = vpack.c.bf16 %v3275_v53, %v3275_v53  ;;  %v755_v50 = vsel %vm582_vm14, %v754_v21, 0.0 }
 0x54c   : > { %756 = vadd.xlane.f32.xlu2 %v755_v50  ;;  %v1249_v21 = vsel %vm453_vm1, %v3787_v44, 0 }
 0x54d   : > { %2117 = vmatmul.msk.bf16.vlgmr.msra.gmra.mxu0 %vm498_vm8, %v843_v57 }
 0x54e   : > { %1163 = vmatpush.bf16.xpose.msra.mxu0 %v1157_v46 }
 0x550   : > { %v749_v49 = vpop.f32.mrf.mxu2 }
 0x556   : > { %1164 = vmatpush.bf16.xpose.msra.mxu0 %v1154_v4 }
 0x55e   : > { %1165 = vmatpush.bf16.xpose.msra.mxu0 %v1151_v8 }
 0x566   : > { %1166 = vmatpush.bf16.xpose.msra.mxu0 %v1148_v48 }
 0x5ca   : > { %v856_v59 = vpop.f32.mrf.mxu0 }
 0x5cb   : > { %v860_v13 = vmul.f32 %v856_v59, %v3234_v63 }
 0x5cd   : > { %v861_v16 = vadd.f32 1e-09, %v860_v13  ;;  %v879_v22 = vsub.f32 %v3234_v63, %v860_v13  ;;  %v3788_v13 = vpack.c.bf16 %v2849_v51, %v2845_v55  ;;  %v1300_v51 = vpack.c.bf16 %v3000_v39, %v3009_v58 }
 0x5cf   : > { %2334 = vrcp.f32 %v861_v16  ;;  %v3289_v54 = vmax.f32 %v879_v22, 0.0  ;;  %v873_v35 = vand.u32 2147483648, %v861_v16  ;;  %v871_v31 = vand.u32 2147483647, %v861_v16 }
 0x5d0   : > { %vm867_vm13 = vweird.f32 %v861_v16  ;;  %v1246_v22 = vsel %vm453_vm1, %v3788_v13, 0 }
 0x5d1   : > { %v971_v32 = vpack.c.bf16 %v3289_v54, %v3289_v54  ;;  %v874_v28 = vor.u32 1.1754944e-38, %v873_v35  ;;  %vm872_vm0 = vcmp.eq.f32.partialorder %v871_v31, 8.507059e+37 }
 0x5d2   : > { %v858_v11 = vpop.f32.mrf.mxu0 }
 0x5d3   : > { %2120 = vmatmul.msk.bf16.vlgmr.msrb.gmra.mxu2 %vm453_vm1, %v971_v32  ;;  %v3789_v32 = vld [vmem:[#allocation38_spill] sm:$0xff] }
 0x5d4   : > { %1258 = vmatpush.bf16.xpose.msrb.mxu2 %v1252_v42  ;;  %v3792_v42 = vpack.c.bf16 %v2904_v20, %v2910_v30 }
 0x5d5   : > { %v2335_v19 = vpop.eup %2334 }
 0x5d6   : > { %v863_v14 = vmul.f32 %v2335_v19, %v861_v16  ;;  %vm868_vm12 = vweird.f32 %v2335_v19  ;;  %v1243_v55 = vsel %vm453_vm1, %v3792_v42, 0 }
 0x5d7   : > { %vm869_vm15 = vmor %vm867_vm13, %vm868_vm12 }
 0x5d8   : > { %v864_v15 = vsub.f32 1.0, %v863_v14 }
 0x5da   : > { %v865_v43 = vmul.f32 %v2335_v19, %v864_v15 }
 0x5dc   : > { %v866_v7 = vadd.f32 %v2335_v19, %v865_v43  ;;  %1259 = vmatpush.bf16.xpose.msrb.mxu2 %v1249_v21 }
 0x5de   : > { %v870_v57 = vsel %vm869_vm15, %v2335_v19, %v866_v7 }
 0x5df   : > { %v875_v50 = vsel %vm872_vm0, %v874_v28, %v870_v57 }
 0x5e0   : > { %v876_v49 = vmul.f32 %v875_v50, %v3234_v63  ;;  %v1326_v50 = vsel %vm453_vm1, %v1301_v61, 0 }
 0x5e2   : > { %v877_v59 = vmin.f32 %v876_v49, 1.0  ;;  %v1323_v49 = vsel %vm453_vm1, %v1300_v51, 0 }
 0x5e4   : > { %v878_v16 = vmul.f32 %v877_v59, %v3234_v63  ;;  %1260 = vmatpush.bf16.xpose.msrb.mxu2 %v1246_v22  ;;  %v1299_v63 = vpack.c.bf16 %v3044_v12, %v3051_v41 }
 0x5e6   : > { %v881_v11 = vpack.c.bf16 %v878_v16, %v878_v16  ;;  %v1320_v59 = vsel %vm453_vm1, %v1299_v63, 0 }
 0x5e8   : > { %2118 = vmatmul.msk.bf16.vlgmr.msrb.gmra.mxu1 %vm453_vm1, %v881_v11  ;;  %2119 = vmatmul.msk.bf16.vlgmr.msrb.gmra.mxu0 %vm453_vm1, %v881_v11 }
 0x5e9   : > { %1233 = vmatpush.bf16.xpose.msrb.mxu1 %v1157_v46  ;;  %1367 = vmatpush.bf16.msrb.mxu0 %v3789_v32 }
 0x5ec   : > { %1261 = vmatpush.bf16.xpose.msrb.mxu2 %v1243_v55 }
 0x5ed   : > { %1368 = vmatpush.bf16.msrb.mxu0 %v1301_v61 }
 0x5f1   : > { %1234 = vmatpush.bf16.xpose.msrb.mxu1 %v1154_v4  ;;  %1369 = vmatpush.bf16.msrb.mxu0 %v1300_v51 }
 0x5f5   : > { %1370 = vmatpush.bf16.msrb.mxu0 %v1299_v63 }
 0x5f9   : > { %1235 = vmatpush.bf16.xpose.msrb.mxu1 %v1151_v8 }
 0x601   : > { %1236 = vmatpush.bf16.xpose.msrb.mxu1 %v1148_v48 }
 0x656   : > { %v996_v46 = vpop.f32.mrf.mxu2 }
 0x657   : > { %v997_v19 = vadd.f32 1e-09, %v996_v46 }
 0x659   : > { %2336 = vrcp.f32 %v997_v19  ;;  %v1011_v31 = vand.u32 2147483648, %v997_v19  ;;  %v1009_v4 = vand.u32 2147483647, %v997_v19  ;;  %vm1005_vm3 = vweird.f32 %v997_v19 }
 0x65b   : > { %v1012_v0 = vor.u32 1.1754944e-38, %v1011_v31  ;;  %vm1010_vm5 = vcmp.eq.f32.partialorder %v1009_v4, 8.507059e+37  ;;  %v3794_v4 = vld [vmem:[#allocation42_spill] sm:$0xff] }
 0x65e   : > { %v998_v14 = vpop.f32.mrf.mxu2 }
 0x65f   : > { %v2337_v20 = vpop.eup %2336 }
 0x660   : > { %v1001_v30 = vmul.f32 %v2337_v20, %v997_v19  ;;  %vm1006_vm2 = vweird.f32 %v2337_v20 }
 0x661   : > { %vm1007_vm4 = vmor %vm1005_vm3, %vm1006_vm2 }
 0x662   : > { %v1002_v15 = vsub.f32 1.0, %v1001_v30 }
 0x664   : > { %v1003_v43 = vmul.f32 %v2337_v20, %v1002_v15 }
 0x665   : > { %v894_v35 = vpop.f32.mrf.mxu1  ;;  %v919_v39 = vpop.f32.mrf.mxu0 }
 0x666   : > { %v923_v58 = vmul.f32 %v894_v35, %v3275_v53  ;;  %v926_v12 = vmul.f32 %v919_v39, %v3275_v53  ;;  %v1004_v41 = vadd.f32 %v2337_v20, %v1003_v43  ;;  %v3793_v39 = vpack.c.bf16 %v2968_v56, %v2964_v52 }
 0x667   : > { %v1471_v52 = vpack.c.bf16 %v3067_v29, %v3095_v27  ;;  %v3798_v56 = vpack.c.bf16 %v3031_v9, %v3027_v62 }
 0x668   : > { %v924_v8 = vsub.f32 %v3272_v34, %v923_v58  ;;  %v927_v48 = vsel %vm582_vm14, %v926_v12, 0.0  ;;  %v1008_v7 = vsel %vm1007_vm4, %v2337_v20, %v1004_v41  ;;  %v1329_v34 = vsel %vm453_vm1, %v3789_v32, 0  ;;  %v3795_v41 = vld [vmem:[#allocation41_spill] sm:$0xff] }
 0x669   : > { %928 = vadd.xlane.f32.xlu0 %v927_v48  ;;  %v1013_v44 = vsel %vm1010_vm5, %v1012_v0, %v1008_v7  ;;  %v1424_v58 = vsel %vm453_vm1, %v3793_v39, 0  ;;  %v1473_v12 = vpack.c.bf16 %v2893_v1, %v3794_v4  ;;  %v1418_v1 = vsel %vm453_vm1, %v3798_v56, 0 }
 0x66a   : > { %v3325_v2 = vmax.f32 %v924_v8, 0.0  ;;  %v3796_v8 = vld [vmem:[#allocation40_spill] sm:$0xff] }
 0x66b   : > { %v3797_v48 = vpack.c.bf16 %v3795_v41, %v3796_v8 }
 0x66c   : > { %v3328_v21 = vmul.f32 %v1013_v44, %v3325_v2 }
 0x66d   : > { %v896_v28 = vpop.f32.mrf.mxu1  ;;  %v921_v57 = vpop.f32.mrf.mxu0  ;;  %v1421_v7 = vsel %vm453_vm1, %v3797_v48, 0 }
 0x66e   : > { %v1015_v53 = vpack.c.bf16 %v3328_v21, %v3328_v21 }
 0x670   : > { %2121 = vmatmul.msk.bf16.vlgmr.msra.gmra.mxu3 %vm498_vm8, %v1015_v53 }
 0x671   : > { %1335 = vmatpush.bf16.xpose.msra.mxu3 %v1329_v34 }
 0x679   : > { %1336 = vmatpush.bf16.xpose.msra.mxu3 %v1326_v50 }
 0x681   : > { %1337 = vmatpush.bf16.xpose.msra.mxu3 %v1323_v49 }
 0x689   : > { %1338 = vmatpush.bf16.xpose.msra.mxu3 %v1320_v59 }
 0x6f3   : > { %v1028_v13 = vpop.f32.mrf.mxu3 }
 0x6f4   : > { %v1032_v22 = vmul.f32 %v1028_v13, %v3289_v54 }
 0x6f6   : > { %v1033_v16 = vadd.f32 1e-09, %v1032_v22  ;;  %v1051_v11 = vsub.f32 %v3289_v54, %v1032_v22 }
 0x6f8   : > { %2338 = vrcp.f32 %v1033_v16  ;;  %v3340_v33 = vmax.f32 %v1051_v11, 0.0  ;;  %v1045_v51 = vand.u32 2147483648, %v1033_v16  ;;  %v1043_v46 = vand.u32 2147483647, %v1033_v16 }
 0x6f9   : > { %vm1039_vm7 = vweird.f32 %v1033_v16 }
 0x6fa   : > { %v1143_v47 = vpack.c.bf16 %v3340_v33, %v3340_v33  ;;  %v1046_v14 = vor.u32 1.1754944e-38, %v1045_v51  ;;  %vm1044_vm10 = vcmp.eq.f32.partialorder %v1043_v46, 8.507059e+37  ;;  %v1498_v51 = vsel %vm453_vm1, %v1473_v12, 0 }
 0x6fb   : > { %v1030_v32 = vpop.f32.mrf.mxu3 }
 0x6fc   : > { %2124 = vmatmul.msk.bf16.vlgmr.msra.gmra.mxu0 %vm453_vm1, %v1143_v47 }
 0x6fd   : > { %1405 = vmatpush.bf16.xpose.msra.mxu0 %v1329_v34 }
 0x6fe   : > { %v2339_v61 = vpop.eup %2338 }
 0x6ff   : > { %v1035_v42 = vmul.f32 %v2339_v61, %v1033_v16  ;;  %vm1040_vm6 = vweird.f32 %v2339_v61 }
 0x700   : > { %vm1041_vm9 = vmor %vm1039_vm7, %vm1040_vm6 }
 0x701   : > { %v1036_v55 = vsub.f32 1.0, %v1035_v42 }
 0x703   : > { %v1037_v63 = vmul.f32 %v2339_v61, %v1036_v55 }
 0x705   : > { %v1038_v19 = vadd.f32 %v2339_v61, %v1037_v63  ;;  %1406 = vmatpush.bf16.xpose.msra.mxu0 %v1326_v50 }
 0x707   : > { %v1042_v20 = vsel %vm1041_vm9, %v2339_v61, %v1038_v19 }
 0x708   : > { %v1047_v30 = vsel %vm1044_vm10, %v1046_v14, %v1042_v20 }
 0x709   : > { %v1048_v15 = vmul.f32 %v1047_v30, %v3289_v54 }
 0x70b   : > { %v1049_v35 = vmin.f32 %v1048_v15, 1.0 }
 0x70d   : > { %v1050_v43 = vmul.f32 %v1049_v35, %v3289_v54  ;;  %1407 = vmatpush.bf16.xpose.msra.mxu0 %v1323_v49  ;;  %v1472_v54 = vpack.c.bf16 %v3033_v18, %v3035_v36  ;;  %v3799_v18 = vpack.c.bf16 %v3089_v38, %v3085_v40 }
 0x70f   : > { %v1053_v31 = vpack.c.bf16 %v1050_v43, %v1050_v43  ;;  %v1415_v36 = vsel %vm453_vm1, %v3799_v18, 0  ;;  %v1495_v63 = vsel %vm453_vm1, %v1472_v54, 0 }
 0x711   : > { %2122 = vmatmul.msk.bf16.vlgmr.msra.gmra.mxu1 %vm453_vm1, %v1053_v31  ;;  %2123 = vmatmul.msk.bf16.vlgmr.msrb.gmra.mxu3 %vm453_vm1, %v1053_v31 }
 0x712   : > { %1430 = vmatpush.bf16.xpose.msra.mxu1 %v1424_v58  ;;  %1539 = vmatpush.bf16.msrb.mxu3 %v2970_v45 }
 0x715   : > { %1408 = vmatpush.bf16.xpose.msra.mxu0 %v1320_v59 }
 0x716   : > { %1540 = vmatpush.bf16.msrb.mxu3 %v1473_v12 }
 0x71a   : > { %1431 = vmatpush.bf16.xpose.msra.mxu1 %v1421_v7  ;;  %1541 = vmatpush.bf16.msrb.mxu3 %v1472_v54 }
 0x71e   : > { %1542 = vmatpush.bf16.msrb.mxu3 %v1471_v52 }
 0x722   : > { %1432 = vmatpush.bf16.xpose.msra.mxu1 %v1418_v1  ;;  %v3800_v1 = vld [vmem:[#allocation53_spill] sm:$0xff] }
 0x723   : > { %v3402_v18 = vsel %vm453_vm1, %v3800_v1, 0 }
 0x72a   : > { %1433 = vmatpush.bf16.xpose.msra.mxu1 %v1415_v36  ;;  %v3801_v36 = vld [vmem:[#allocation45_spill] sm:$0xff] }
 0x779   : > { %v1168_v0 = vpop.f32.mrf.mxu0 }
 0x77a   : > { %v1169_v44 = vadd.f32 1e-09, %v1168_v0  ;;  %v3802_v0 = vld [vmem:[#allocation46_spill] sm:$0xff] }
 0x77c   : > { %2340 = vrcp.f32 %v1169_v44  ;;  %v1183_v9 = vand.u32 2147483648, %v1169_v44  ;;  %vm1177_vm12 = vweird.f32 %v1169_v44  ;;  %v1181_v49 = vand.u32 2147483647, %v1169_v44 }
 0x77e   : > { %v1184_v59 = vor.u32 1.1754944e-38, %v1183_v9  ;;  %vm1182_vm15 = vcmp.eq.f32.partialorder %v1181_v49, 8.507059e+37 }
 0x781   : > { %v1170_v28 = vpop.f32.mrf.mxu0 }
 0x782   : > { %v2341_v57 = vpop.eup %2340 }
 0x783   : > { %v1173_v53 = vmul.f32 %v2341_v57, %v1169_v44  ;;  %vm1178_vm11 = vweird.f32 %v2341_v57  ;;  %v1645_v44 = vpack.c.bf16 %v3802_v0, %v3801_v36  ;;  %v3468_v0 = vsel %vm453_vm1, %v3018_v60, 0 }
 0x784   : > { %vm1179_vm13 = vmor %vm1177_vm12, %vm1178_vm11 }
 0x785   : > { %v1174_v29 = vsub.f32 1.0, %v1173_v53  ;;  %v3411_v28 = vsel %vm453_vm1, %v1645_v44, 0 }
 0x787   : > { %v1175_v27 = vmul.f32 %v2341_v57, %v1174_v29 }
 0x789   : > { %v1176_v34 = vadd.f32 %v2341_v57, %v1175_v27 }
 0x78b   : > { %v1180_v38 = vsel %vm1179_vm13, %v2341_v57, %v1176_v34  ;;  %v1643_v57 = vpack.c.bf16 %v3131_v25, %v3137_v24 }
 0x78c   : > { %v1185_v22 = vsel %vm1182_vm15, %v1184_v59, %v1180_v38 }
 0x78d   : > { %v3421_v29 = vsel %vm453_vm1, %v1643_v57, 0 }
 0x78e   : > { %v1066_v62 = vpop.f32.mrf.mxu1 }
 0x78f   : > { %v1095_v50 = vmul.f32 %v1066_v62, %v3328_v21 }
 0x791   : > { %v1096_v40 = vsub.f32 %v3325_v2, %v1095_v50  ;;  %v1501_v2 = vsel %vm453_vm1, %v2970_v45, 0 }
 0x793   : > { %v3374_v13 = vmax.f32 %v1096_v40, 0.0 }
 0x794   : > { %v1091_v16 = vpop.f32.mrf.mxu3 }
 0x795   : > { %v3377_v11 = vmul.f32 %v1185_v22, %v3374_v13  ;;  %v1098_v32 = vmul.f32 %v1091_v16, %v3328_v21  ;;  %v1492_v21 = vsel %vm453_vm1, %v1471_v52, 0 }
 0x796   : > { %v1068_v47 = vpop.f32.mrf.mxu1 }
 0x797   : > { %v1187_v61 = vpack.c.bf16 %v3377_v11, %v3377_v11  ;;  %v1099_v42 = vsel %vm582_vm14, %v1098_v32, 0.0 }
 0x798   : > { %1100 = vadd.xlane.f32.xlu2 %v1099_v42 }
 0x799   : > { %2125 = vmatmul.msk.bf16.vlgmr.msra.gmra.mxu2 %vm498_vm8, %v1187_v61 }
 0x79a   : > { %1507 = vmatpush.bf16.xpose.msra.mxu2 %v1501_v2 }
 0x79c   : > { %v1093_v55 = vpop.f32.mrf.mxu3 }
 0x7a2   : > { %1508 = vmatpush.bf16.xpose.msra.mxu2 %v1498_v51 }
 0x7aa   : > { %1509 = vmatpush.bf16.xpose.msra.mxu2 %v1495_v63 }
 0x7b2   : > { %1510 = vmatpush.bf16.xpose.msra.mxu2 %v1492_v21 }
 0x81c   : > { %v1200_v46 = vpop.f32.mrf.mxu2 }
 0x81d   : > { %v1204_v19 = vmul.f32 %v1200_v46, %v3340_v33 }
 0x81f   : > { %v1205_v14 = vadd.f32 1e-09, %v1204_v19  ;;  %v1223_v20 = vsub.f32 %v3340_v33, %v1204_v19  ;;  %v3804_v19 = vld [vmem:[#allocation44_spill] sm:$0xff] }
 0x821   : > { %2342 = vrcp.f32 %v1205_v14  ;;  %v3391_v30 = vmax.f32 %v1223_v20, 0.0  ;;  %v1217_v39 = vand.u32 2147483648, %v1205_v14  ;;  %v1215_v4 = vand.u32 2147483647, %v1205_v14 }
 0x822   : > { %vm1211_vm2 = vweird.f32 %v1205_v14 }
 0x823   : > { %v1315_v15 = vpack.c.bf16 %v3391_v30, %v3391_v30  ;;  %v1218_v54 = vor.u32 1.1754944e-38, %v1217_v39  ;;  %vm1216_vm4 = vcmp.eq.f32.partialorder %v1215_v4, 8.507059e+37 }
 0x824   : > { %v1202_v45 = vpop.f32.mrf.mxu2 }
 0x825   : > { %2128 = vmatmul.msk.bf16.vlgmr.msra.gmra.mxu3 %vm453_vm1, %v1315_v15  ;;  %v3807_v45 = vpack.c.bf16 %v3049_v3, %v3055_v37 }
 0x826   : > { %1577 = vmatpush.bf16.xpose.msra.mxu3 %v1501_v2 }
 0x827   : > { %v2343_v35 = vpop.eup %2342  ;;  %v1590_v15 = vsel %vm453_vm1, %v3807_v45, 0  ;;  %v3816_v45 = vld [vmem:[#allocation54_spill] sm:$0xff] }
 0x828   : > { %v1207_v43 = vmul.f32 %v2343_v35, %v1205_v14  ;;  %vm1212_vm0 = vweird.f32 %v2343_v35  ;;  %v3805_v14 = vld [vmem:[#allocation43_spill] sm:$0xff] }
 0x829   : > { %vm1213_vm3 = vmor %vm1211_vm2, %vm1212_vm0  ;;  %v3806_v20 = vpack.c.bf16 %v3804_v19, %v3805_v14 }
 0x82a   : > { %v1208_v31 = vsub.f32 1.0, %v1207_v43 }
 0x82c   : > { %v1209_v58 = vmul.f32 %v2343_v35, %v1208_v31 }
 0x82e   : > { %v1210_v12 = vadd.f32 %v2343_v35, %v1209_v58  ;;  %1578 = vmatpush.bf16.xpose.msra.mxu3 %v1498_v51 }
 0x830   : > { %v1214_v41 = vsel %vm1213_vm3, %v2343_v35, %v1210_v12  ;;  %v3808_v35 = vpack.c.bf16 %v3108_v17, %v3104_v26 }
 0x831   : > { %v1219_v8 = vsel %vm1216_vm4, %v1218_v54, %v1214_v41 }
 0x832   : > { %v1220_v48 = vmul.f32 %v1219_v8, %v3340_v33 }
 0x834   : > { %v1221_v7 = vmin.f32 %v1220_v48, 1.0 }
 0x836   : > { %v1222_v52 = vmul.f32 %v1221_v7, %v3340_v33  ;;  %1579 = vmatpush.bf16.xpose.msra.mxu3 %v1495_v63  ;;  %v1644_v33 = vpack.c.bf16 %v3075_v23, %v3093_v5 }
 0x838   : > { %v1225_v56 = vpack.c.bf16 %v1222_v52, %v1222_v52  ;;  %v3417_v53 = vsel %vm453_vm1, %v1644_v33, 0 }
 0x83a   : > { %2126 = vmatmul.msk.bf16.vlgmr.msrb.gmra.mxu1 %vm453_vm1, %v1225_v56  ;;  %2127 = vmatmul.msk.bf16.vlgmr.msrb.gmra.mxu2 %vm453_vm1, %v1225_v56 }
 0x83b   : > { %1679 = vmatpush.bf16.xpose.msrb.mxu1 %v3402_v18  ;;  %1711 = vmatpush.bf16.msrb.mxu2 %v3800_v1 }
 0x83e   : > { %1580 = vmatpush.bf16.xpose.msra.mxu3 %v1492_v21 }
 0x83f   : > { %1712 = vmatpush.bf16.msrb.mxu2 %v1645_v44  ;;  %v3809_v44 = vld [vmem:[#allocation49_spill] sm:$0xff] }
 0x843   : > { %1680 = vmatpush.bf16.xpose.msrb.mxu1 %v3411_v28  ;;  %1713 = vmatpush.bf16.msrb.mxu2 %v1644_v33  ;;  %v3810_v33 = vld [vmem:[#allocation50_spill] sm:$0xff] }
 0x847   : > { %1714 = vmatpush.bf16.msrb.mxu2 %v1643_v57  ;;  %v3812_v57 = vld [vmem:[#allocation58_spill] sm:$0xff] }
 0x84b   : > { %1681 = vmatpush.bf16.xpose.msrb.mxu1 %v3417_v53 }
 0x853   : > { %1682 = vmatpush.bf16.xpose.msrb.mxu1 %v3421_v29 }
 0x8a8   : > { %v1340_v23 = vpop.f32.mrf.mxu3 }
 0x8a9   : > { %v1341_v5 = vadd.f32 1e-09, %v1340_v23 }
 0x8ab   : > { %2344 = vrcp.f32 %v1341_v5  ;;  %v1355_v25 = vand.u32 2147483648, %v1341_v5  ;;  %v1353_v40 = vand.u32 2147483647, %v1341_v5  ;;  %vm1349_vm6 = vweird.f32 %v1341_v5 }
 0x8ad   : > { %v1356_v16 = vor.u32 1.1754944e-38, %v1355_v25  ;;  %vm1354_vm9 = vcmp.eq.f32.partialorder %v1353_v40, 8.507059e+37 }
 0x8b0   : > { %v1342_v27 = vpop.f32.mrf.mxu3 }
 0x8b1   : > { %v2345_v34 = vpop.eup %2344  ;;  %v3814_v27 = vld [vmem:[#allocation64_spill] sm:$0xff] }
 0x8b2   : > { %v1345_v62 = vmul.f32 %v2345_v34, %v1341_v5  ;;  %vm1350_vm5 = vweird.f32 %v2345_v34  ;;  %v3813_v5 = vld [vmem:[#allocation65_spill] sm:$0xff] }
 0x8b3   : > { %vm1351_vm7 = vmor %vm1349_vm6, %vm1350_vm5 }
 0x8b4   : > { %v1346_v9 = vsub.f32 1.0, %v1345_v62 }
 0x8b6   : > { %v1347_v24 = vmul.f32 %v2345_v34, %v1346_v9 }
 0x8b7   : > { %v1238_v50 = vpop.f32.mrf.mxu1 }
 0x8b8   : > { %v1267_v49 = vmul.f32 %v1238_v50, %v3377_v11  ;;  %v1348_v38 = vadd.f32 %v2345_v34, %v1347_v24 }
 0x8ba   : > { %v1268_v59 = vsub.f32 %v3374_v13, %v1267_v49  ;;  %v1352_v22 = vsel %vm1351_vm7, %v2345_v34, %v1348_v38  ;;  %v3803_v13 = vpack.c.bf16 %v3016_v6, %v3013_v10  ;;  %v1587_v10 = vsel %vm453_vm1, %v3808_v35, 0  ;;  %v3818_v35 = vld [vmem:[#allocation48_spill] sm:$0xff] }
 0x8bb   : > { %v1357_v47 = vsel %vm1354_vm9, %v1356_v16, %v1352_v22  ;;  %v1815_v34 = vpack.c.bf16 %v3814_v27, %v3813_v5 }
 0x8bc   : > { %v3426_v32 = vmax.f32 %v1268_v59, 0.0  ;;  %v1596_v21 = vsel %vm453_vm1, %v3803_v13, 0 }
 0x8bd   : > { %v1263_v61 = vpop.f32.mrf.mxu2 }
 0x8be   : > { %v3429_v42 = vmul.f32 %v1357_v47, %v3426_v32  ;;  %v1270_v2 = vmul.f32 %v1263_v61, %v3377_v11  ;;  %v1593_v11 = vsel %vm453_vm1, %v3806_v20, 0 }
 0x8bf   : > { %v1240_v55 = vpop.f32.mrf.mxu1 }
 0x8c0   : > { %v1359_v51 = vpack.c.bf16 %v3429_v42, %v3429_v42  ;;  %v1271_v63 = vsel %vm582_vm14, %v1270_v2, 0.0 }
 0x8c1   : > { %1272 = vadd.xlane.f32.xlu1 %v1271_v63 }
 0x8c2   : > { %2129 = vmatmul.msk.bf16.vlgmr.msrb.gmra.mxu0 %vm498_vm8, %v1359_v51 }
 0x8c3   : > { %1602 = vmatpush.bf16.xpose.msrb.mxu0 %v1596_v21 }
 0x8c5   : > { %v1265_v46 = vpop.f32.mrf.mxu2 }
 0x8cb   : > { %1603 = vmatpush.bf16.xpose.msrb.mxu0 %v1593_v11 }
 0x8d3   : > { %1604 = vmatpush.bf16.xpose.msrb.mxu0 %v1590_v15 }
 0x8db   : > { %1605 = vmatpush.bf16.xpose.msrb.mxu0 %v1587_v10  ;;  %v3819_v10 = vld [vmem:[#allocation47_spill] sm:$0xff] }
 0x93f   : > { %v1372_v6 = vpop.f32.mrf.mxu0 }
 0x940   : > { %v1376_v43 = vmul.f32 %v1372_v6, %v3391_v30  ;;  %v3820_v6 = vpack.c.bf16 %v3818_v35, %v3819_v10  ;;  %v3833_v10 = vld [vmem:[#allocation63_spill] sm:$0xff] }
 0x942   : > { %v1377_v31 = vadd.f32 1e-09, %v1376_v43  ;;  %v1395_v39 = vsub.f32 %v3391_v30, %v1376_v43  ;;  %v1765_v43 = vsel %vm453_vm1, %v3820_v6, 0  ;;  %v3834_v6 = vld [vmem:[#allocation62_spill] sm:$0xff] }
 0x944   : > { %2346 = vrcp.f32 %v1377_v31  ;;  %v3454_v58 = vmax.f32 %v1395_v39, 0.0  ;;  %v1389_v12 = vand.u32 2147483648, %v1377_v31  ;;  %v1387_v41 = vand.u32 2147483647, %v1377_v31  ;;  %v3822_v39 = vld [vmem:[#allocation60_spill] sm:$0xff] }
 0x945   : > { %vm1383_vm11 = vweird.f32 %v1377_v31 }
 0x946   : > { %v1487_v3 = vpack.c.bf16 %v3454_v58, %v3454_v58  ;;  %v1390_v48 = vor.u32 1.1754944e-38, %v1389_v12  ;;  %vm1388_vm13 = vcmp.eq.f32.partialorder %v1387_v41, 8.507059e+37 }
 0x947   : > { %v1374_v4 = vpop.f32.mrf.mxu0 }
 0x948   : > { %2132 = vmatmul.msk.bf16.vlgmr.msra.gmra.mxu2 %vm453_vm1, %v1487_v3 }
 0x949   : > { %1749 = vmatpush.bf16.xpose.msra.mxu2 %v3402_v18 }
 0x94a   : > { %v2347_v37 = vpop.eup %2346 }
 0x94b   : > { %v1379_v17 = vmul.f32 %v2347_v37, %v1377_v31  ;;  %vm1384_vm10 = vweird.f32 %v2347_v37  ;;  %v3821_v31 = vld [vmem:[#allocation61_spill] sm:$0xff] }
 0x94c   : > { %vm1385_vm12 = vmor %vm1383_vm11, %vm1384_vm10  ;;  %v3823_v4 = vpack.c.bf16 %v3821_v31, %v3822_v39  ;;  %v3836_v39 = vld [vmem:[#allocation69_spill] sm:$0xff] }
 0x94d   : > { %v1380_v26 = vsub.f32 1.0, %v1379_v17  ;;  %v3825_v17 = vld [vmem:[#allocation66_spill] sm:$0xff] }
 0x94e   : > { %v1762_v3 = vsel %vm453_vm1, %v3823_v4, 0  ;;  %v3837_v4 = vld [vmem:[#allocation68_spill] sm:$0xff] }
 0x94f   : > { %v1381_v54 = vmul.f32 %v2347_v37, %v1380_v26 }
 0x951   : > { %v1382_v8 = vadd.f32 %v2347_v37, %v1381_v54  ;;  %1750 = vmatpush.bf16.xpose.msra.mxu2 %v3411_v28  ;;  %v1817_v28 = vpack.c.bf16 %v3810_v33, %v3809_v44 }
 0x953   : > { %v1386_v7 = vsel %vm1385_vm12, %v2347_v37, %v1382_v8  ;;  %v3478_v23 = vsel %vm453_vm1, %v1817_v28, 0  ;;  %v3824_v37 = vld [vmem:[#allocation67_spill] sm:$0xff] }
 0x954   : > { %v1391_v52 = vsel %vm1388_vm13, %v1390_v48, %v1386_v7  ;;  %v3826_v26 = vpack.c.bf16 %v3824_v37, %v3825_v17  ;;  %v2375_v17 = vmov 1065369472  }
 0x955   : > { %v1392_v56 = vmul.f32 %v1391_v52, %v3391_v30 }
 0x956   : > { %v1759_v12 = vsel %vm453_vm1, %v3826_v26, 0 }
 0x957   : > { %v1393_v1 = vmin.f32 %v1392_v56, 1.0 }
 0x959   : > { %v1394_v18 = vmul.f32 %v1393_v1, %v3391_v30  ;;  %1751 = vmatpush.bf16.xpose.msra.mxu2 %v3417_v53  ;;  %v3811_v30 = vld [vmem:[#allocation59_spill] sm:$0xff] }
 0x95a   : > { %v1816_v53 = vpack.c.bf16 %v3812_v57, %v3811_v30 }
 0x95b   : > { %v1397_v36 = vpack.c.bf16 %v1394_v18, %v1394_v18 }
 0x95d   : > { %2130 = vmatmul.msk.bf16.vlgmr.msra.gmra.mxu0 %vm453_vm1, %v1397_v36  ;;  %2131 = vmatmul.msk.bf16.vlgmr.msra.gmra.mxu1 %vm453_vm1, %v1397_v36 }
 0x95e   : > { %1851 = vmatpush.bf16.xpose.msra.mxu0 %v3468_v0  ;;  %1883 = vmatpush.bf16.msra.mxu1 %v3018_v60  ;;  %v3484_v60 = vsel %vm453_vm1, %v1816_v53, 0 }
 0x961   : > { %1752 = vmatpush.bf16.xpose.msra.mxu2 %v3421_v29  ;;  %v3488_v29 = vsel %vm453_vm1, %v1815_v34, 0 }
 0x962   : > { %1884 = vmatpush.bf16.msra.mxu1 %v1817_v28 }
 0x966   : > { %1852 = vmatpush.bf16.xpose.msra.mxu0 %v3478_v23  ;;  %1885 = vmatpush.bf16.msra.mxu1 %v1816_v53 }
 0x96a   : > { %1886 = vmatpush.bf16.msra.mxu1 %v1815_v34 }
 0x96e   : > { %1853 = vmatpush.bf16.xpose.msra.mxu0 %v3484_v60 }
 0x976   : > { %1854 = vmatpush.bf16.xpose.msra.mxu0 %v3488_v29 }
 0x9cb   : > { %v1512_v62 = vpop.f32.mrf.mxu2 }
 0x9cc   : > { %v1513_v9 = vadd.f32 1e-09, %v1512_v62 }
 0x9ce   : > { %2348 = vrcp.f32 %v1513_v9  ;;  %v1527_v59 = vand.u32 2147483648, %v1513_v9  ;;  %v1525_v47 = vand.u32 2147483647, %v1513_v9  ;;  %vm1521_vm0 = vweird.f32 %v1513_v9 }
 0x9d0   : > { %v1528_v13 = vor.u32 1.1754944e-38, %v1527_v59  ;;  %vm1526_vm3 = vcmp.eq.f32.partialorder %v1525_v47, 8.507059e+37 }
 0x9d3   : > { %v1514_v50 = vpop.f32.mrf.mxu2 }
 0x9d4   : > { %v2349_v24 = vpop.eup %2348 }
 0x9d5   : > { %v1517_v25 = vmul.f32 %v2349_v24, %v1513_v9  ;;  %vm1522_vm15 = vweird.f32 %v2349_v24 }
 0x9d6   : > { %vm1523_vm2 = vmor %vm1521_vm0, %vm1522_vm15 }
 0x9d7   : > { %v1518_v49 = vsub.f32 1.0, %v1517_v25 }
 0x9d9   : > { %v1519_v38 = vmul.f32 %v2349_v24, %v1518_v49 }
 0x9da   : > { %v1410_v40 = vpop.f32.mrf.mxu0  ;;  %v1435_v22 = vpop.f32.mrf.mxu1 }
 0x9db   : > { %v1439_v16 = vmul.f32 %v1410_v40, %v3429_v42  ;;  %v1442_v61 = vmul.f32 %v1435_v22, %v3429_v42  ;;  %v1520_v2 = vadd.f32 %v2349_v24, %v1519_v38  ;;  %v3815_v42 = vld [vmem:[#allocation55_spill] sm:$0xff] }
 0x9dd   : > { %v1440_v55 = vsub.f32 %v3426_v32, %v1439_v16  ;;  %v1443_v51 = vsel %vm582_vm14, %v1442_v61, 0.0  ;;  %v1524_v63 = vsel %vm1523_vm2, %v2349_v24, %v1520_v2  ;;  %v3817_v32 = vpack.c.bf16 %v3815_v42, %v3816_v45  ;;  %v3830_v45 = vld [vmem:[#allocation52_spill] sm:$0xff] }
 0x9de   : > { %1444 = vadd.xlane.f32.xlu2 %v1443_v51  ;;  %v1529_v46 = vsel %vm1526_vm3, %v1528_v13, %v1524_v63 }
 0x9df   : > { %v3495_v21 = vmax.f32 %v1440_v55, 0.0  ;;  %v1768_v15 = vsel %vm453_vm1, %v3817_v32, 0  ;;  %v3831_v32 = vld [vmem:[#allocation51_spill] sm:$0xff] }
 0x9e1   : > { %v1530_v19 = vmul.f32 %v1529_v46, %v3495_v21 }
 0x9e2   : > { %v1412_v14 = vpop.f32.mrf.mxu0  ;;  %v1437_v20 = vpop.f32.mrf.mxu1 }
 0x9e3   : > { %v1531_v11 = vpack.c.bf16 %v1530_v19, %v1530_v19 }
 0x9e5   : > { %2133 = vmatmul.msk.bf16.vlgmr.msrb.gmra.mxu3 %vm498_vm8, %v1531_v11  ;;  %v3828_v11 = vld [vmem:[#allocation57_spill] sm:$0xff] }
 0x9e6   : > { %1774 = vmatpush.bf16.xpose.msrb.mxu3 %v1768_v15  ;;  %v3832_v15 = vpack.c.bf16 %v3830_v45, %v3831_v32 }
 0x9e8   : > { %v1937_v35 = vsel %vm453_vm1, %v3832_v15, 0 }
 0x9ee   : > { %1775 = vmatpush.bf16.xpose.msrb.mxu3 %v1765_v43  ;;  %v3835_v43 = vpack.c.bf16 %v3833_v10, %v3834_v6 }
 0x9f0   : > { %v1934_v31 = vsel %vm453_vm1, %v3835_v43, 0 }
 0x9f6   : > { %1776 = vmatpush.bf16.xpose.msrb.mxu3 %v1762_v3  ;;  %v3838_v3 = vpack.c.bf16 %v3836_v39, %v3837_v4 }
 0x9f8   : > { %v1931_v37 = vsel %vm453_vm1, %v3838_v3, 0 }
 0x9fe   : > { %1777 = vmatpush.bf16.xpose.msrb.mxu3 %v1759_v12 }
 0xa68   : > { %v1544_v54 = vpop.f32.mrf.mxu3 }
 0xa69   : > { %v1548_v41 = vmul.f32 %v1544_v54, %v3454_v58 }
 0xa6b   : > { %v1549_v8 = vadd.f32 1e-09, %v1548_v41  ;;  %v1567_v48 = vsub.f32 %v3454_v58, %v1548_v41 }
 0xa6d   : > { %2350 = vrcp.f32 %v1549_v8  ;;  %v3517_v7 = vmax.f32 %v1567_v48, 0.0  ;;  %v1561_v44 = vand.u32 2147483648, %v1549_v8  ;;  %v1559_v28 = vand.u32 2147483647, %v1549_v8  ;;  %v3839_v48 = vld [vmem:[#allocation12_spill] sm:$0xff] }
 0xa6e   : > { %vm1555_vm5 = vweird.f32 %v1549_v8 }
 0xa6f   : > { %v1659_v56 = vpack.c.bf16 %v3517_v7, %v3517_v7  ;;  %v1562_v57 = vor.u32 1.1754944e-38, %v1561_v44  ;;  %vm1560_vm7 = vcmp.eq.f32.partialorder %v1559_v28, 8.507059e+37 }
 0xa70   : > { %v1546_v52 = vpop.f32.mrf.mxu3 }
 0xa71   : > { %2136 = vmatmul.msk.bf16.vlgmr.msrb.gmra.mxu1 %vm453_vm1, %v1659_v56  ;;  %v3840_v52 = vld [vmem:[#allocation13_spill] sm:$0xff] }
 0xa72   : > { %1921 = vmatpush.bf16.xpose.msrb.mxu1 %v3468_v0  ;;  %v1966_v56 = vpack.c.bf16 %v3840_v52, %v3839_v48 }
 0xa73   : > { %v2351_v1 = vpop.eup %2350 }
 0xa74   : > { %v1551_v18 = vmul.f32 %v2351_v1, %v1549_v8  ;;  %vm1556_vm4 = vweird.f32 %v2351_v1 }
 0xa75   : > { %vm1557_vm6 = vmor %vm1555_vm5, %vm1556_vm4 }
 0xa76   : > { %v1552_v36 = vsub.f32 1.0, %v1551_v18 }
 0xa78   : > { %v1553_v33 = vmul.f32 %v2351_v1, %v1552_v36  ;;  %v2052_v36 = vsel %vm453_vm1, %v1966_v56, 0 }
 0xa7a   : > { %v1554_v30 = vadd.f32 %v2351_v1, %v1553_v33  ;;  %1922 = vmatpush.bf16.xpose.msrb.mxu1 %v3478_v23 }
 0xa7c   : > { %v1558_v53 = vsel %vm1557_vm6, %v2351_v1, %v1554_v30  ;;  %v3841_v30 = vld [vmem:[#allocation2_spill] sm:$0xff] }
 0xa7d   : > { %v1563_v5 = vsel %vm1560_vm7, %v1562_v57, %v1558_v53  ;;  %v3842_v57 = vld [vmem:[#allocation3_spill] sm:$0xff] }
 0xa7e   : > { %v1564_v27 = vmul.f32 %v1563_v5, %v3454_v58  ;;  %v1965_v53 = vpack.c.bf16 %v3842_v57, %v3841_v30 }
 0xa80   : > { %v1565_v34 = vmin.f32 %v1564_v27, 1.0 }
 0xa82   : > { %v1566_v0 = vmul.f32 %v1565_v34, %v3454_v58  ;;  %1923 = vmatpush.bf16.xpose.msrb.mxu1 %v3484_v60 }
 0xa84   : > { %v1569_v62 = vpack.c.bf16 %v1566_v0, %v1566_v0 }
 0xa86   : > { %2134 = vmatmul.msk.bf16.vlgmr.msra.gmra.mxu3 %vm453_vm1, %v1569_v62  ;;  %2135 = vmatmul.msk.bf16.vlgmr.msrb.gmra.mxu0 %vm453_vm1, %v1569_v62  ;;  %v2049_v62 = vsel %vm453_vm1, %v1965_v53, 0 }
 0xa87   : > { %2010 = vmatpush.bf16.msrb.mxu0 %v2375_v17 }
 0xa8a   : > { %1924 = vmatpush.bf16.xpose.msrb.mxu1 %v3488_v29 }
 0xa8b   : > { %2011 = vmatpush.bf16.msrb.mxu0 %v2375_v17 }
 0xa8f   : > { %2012 = vmatpush.bf16.msrb.mxu0 %v2375_v17 }
 0xa93   : > { %2013 = vmatpush.bf16.msrb.mxu0 %v2375_v17 }
 0xaee   : > { %v1684_v9 = vpop.f32.mrf.mxu1 }
 0xaef   : > { %v1685_v50 = vadd.f32 1e-09, %v1684_v9 }
 0xaf1   : > { %2352 = vrcp.f32 %v1685_v50  ;;  %v1699_v16 = vand.u32 2147483648, %v1685_v50  ;;  %vm1693_vm10 = vweird.f32 %v1685_v50  ;;  %v1697_v29 = vand.u32 2147483647, %v1685_v50 }
 0xaf3   : > { %v1700_v51 = vor.u32 1.1754944e-38, %v1699_v16  ;;  %vm1698_vm12 = vcmp.eq.f32.partialorder %v1697_v29, 8.507059e+37  ;;  %v3846_v16 = vld [vmem:[#allocation8_spill] sm:$0xff] }
 0xaf6   : > { %v1686_v23 = vpop.f32.mrf.mxu1 }
 0xaf7   : > { %v2353_v24 = vpop.eup %2352 }
 0xaf8   : > { %v1689_v25 = vmul.f32 %v2353_v24, %v1685_v50  ;;  %vm1694_vm9 = vweird.f32 %v2353_v24 }
 0xaf9   : > { %vm1695_vm11 = vmor %vm1693_vm10, %vm1694_vm9 }
 0xafa   : > { %v1690_v49 = vsub.f32 1.0, %v1689_v25  ;;  %v3844_v25 = vld [vmem:[#allocation4_spill] sm:$0xff] }
 0xafc   : > { %v1691_v59 = vmul.f32 %v2353_v24, %v1690_v49 }
 0xafe   : > { %v1692_v60 = vadd.f32 %v2353_v24, %v1691_v59 }
 0xb00   : > { %v1696_v55 = vsel %vm1695_vm11, %v2353_v24, %v1692_v60  ;;  %v3843_v24 = vld [vmem:[#allocation16_spill] sm:$0xff] }
 0xb01   : > { %v1701_v13 = vsel %vm1698_vm12, %v1700_v51, %v1696_v55  ;;  %v1964_v49 = vpack.c.bf16 %v3844_v25, %v3843_v24  ;;  %v3847_v55 = vmov 0  }
 0xb02   : > { %v1972_v51 = vsel %vm453_vm1, 1065369472, %v3847_v55 }
 0xb03   : > { %v1607_v40 = vpop.f32.mrf.mxu0  ;;  %v2046_v59 = vsel %vm453_vm1, %v1964_v49, 0  ;;  %1978 = vmatpush.bf16.xpose.msra.mxu3 %v1972_v51 }
 0xb04   : > { %v1614_v38 = vmul.f32 %v1607_v40, %v1530_v19 }
 0xb06   : > { %v1615_v58 = vsel %vm582_vm14, %v1614_v38, 0.0 }
 0xb07   : > { %1616 = vadd.xlane.f32.xlu1 %v1615_v58 }
 0xb09   : > { %v1582_v22 = vpop.f32.mrf.mxu3 }
 0xb0a   : > { %v1611_v47 = vmul.f32 %v1582_v22, %v1530_v19  ;;  %v3827_v19 = vld [vmem:[#allocation56_spill] sm:$0xff]  ;;  %v3845_v22 = vld [vmem:[#allocation19_spill] sm:$0xff] }
 0xb0b   : > { %v1609_v61 = vpop.f32.mrf.mxu0  ;;  %v3829_v42 = vpack.c.bf16 %v3827_v19, %v3828_v11  ;;  %1979 = vmatpush.bf16.xpose.msra.mxu3 %v1972_v51 }
 0xb0c   : > { %v1612_v2 = vsub.f32 %v3495_v21, %v1611_v47  ;;  %v1963_v47 = vpack.c.bf16 %v3846_v16, %v3845_v22 }
 0xb0d   : > { %v1940_v21 = vsel %vm453_vm1, %v3829_v42, 0 }
 0xb0e   : > { %v3532_v63 = vmax.f32 %v1612_v2, 0.0  ;;  %v2043_v29 = vsel %vm453_vm1, %v1963_v47, 0 }
 0xb10   : > { %v3535_v46 = vmul.f32 %v1701_v13, %v3532_v63 }
 0xb11   : > { %v1584_v14 = vpop.f32.mrf.mxu3 }
 0xb12   : > { %v1703_v20 = vpack.c.bf16 %v3535_v46, %v3535_v46 }
 0xb13   : > { %1980 = vmatpush.bf16.xpose.msra.mxu3 %v1972_v51 }
 0xb14   : > { %2137 = vmatmul.msk.bf16.vlgmr.msrb.gmra.mxu2 %vm498_vm8, %v1703_v20 }
 0xb15   : > { %1946 = vmatpush.bf16.xpose.msrb.mxu2 %v1940_v21 }
 0xb1b   : > { %1981 = vmatpush.bf16.xpose.msra.mxu3 %v1972_v51 }
 0xb1d   : > { %1947 = vmatpush.bf16.xpose.msrb.mxu2 %v1937_v35 }
 0xb25   : > { %1948 = vmatpush.bf16.xpose.msrb.mxu2 %v1934_v31 }
 0xb2d   : > { %1949 = vmatpush.bf16.xpose.msrb.mxu2 %v1931_v37 }
 0xb97   : > { %v1716_v26 = vpop.f32.mrf.mxu2 }
 0xb98   : > { %v1720_v12 = vmul.f32 %v1716_v26, %v3517_v7 }
 0xb9a   : > { %v1721_v54 = vadd.f32 1e-09, %v1720_v12  ;;  %v1739_v41 = vsub.f32 %v3517_v7, %v1720_v12 }
 0xb9c   : > { %2354 = vrcp.f32 %v1721_v54  ;;  %v3558_v8 = vmax.f32 %v1739_v41, 0.0  ;;  %v1733_v5 = vand.u32 2147483648, %v1721_v54  ;;  %v1731_v34 = vand.u32 2147483647, %v1721_v54 }
 0xb9d   : > { %vm1727_vm15 = vweird.f32 %v1721_v54 }
 0xb9e   : > { %v1831_v18 = vpack.c.bf16 %v3558_v8, %v3558_v8  ;;  %v1734_v9 = vor.u32 1.1754944e-38, %v1733_v5  ;;  %vm1732_vm2 = vcmp.eq.f32.partialorder %v1731_v34, 8.507059e+37 }
 0xb9f   : > { %v1718_v1 = vpop.f32.mrf.mxu2 }
 0xba0   : > { %2140 = vmatmul.msk.bf16.vlgmr.msra.gmra.mxu0 %vm453_vm1, %v1831_v18 }
 0xba1   : > { %2058 = vmatpush.bf16.xpose.msra.mxu0 %v2052_v36 }
 0xba2   : > { %v2355_v44 = vpop.eup %2354 }
 0xba3   : > { %v1723_v33 = vmul.f32 %v2355_v44, %v1721_v54  ;;  %vm1728_vm13 = vweird.f32 %v2355_v44 }
 0xba4   : > { %vm1729_vm0 = vmor %vm1727_vm15, %vm1728_vm13 }
 0xba5   : > { %v1724_v28 = vsub.f32 1.0, %v1723_v33 }
 0xba7   : > { %v1725_v27 = vmul.f32 %v2355_v44, %v1724_v28 }
 0xba9   : > { %v1726_v0 = vadd.f32 %v2355_v44, %v1725_v27  ;;  %2059 = vmatpush.bf16.xpose.msra.mxu0 %v2049_v62 }
 0xbab   : > { %v1730_v50 = vsel %vm1729_vm0, %v2355_v44, %v1726_v0 }
 0xbac   : > { %v1735_v23 = vsel %vm1732_vm2, %v1734_v9, %v1730_v50 }
 0xbad   : > { %v1736_v40 = vmul.f32 %v1735_v23, %v3517_v7 }
 0xbaf   : > { %v1737_v38 = vmin.f32 %v1736_v40, 1.0 }
 0xbb1   : > { %v1738_v58 = vmul.f32 %v1737_v38, %v3517_v7  ;;  %2060 = vmatpush.bf16.xpose.msra.mxu0 %v2046_v59 }
 0xbb3   : > { %v1741_v60 = vpack.c.bf16 %v1738_v58, %v1738_v58 }
 0xbb5   : > { %2138 = vmatmul.msk.bf16.vlgmr.msra.gmra.mxu2 %vm453_vm1, %v1741_v60  ;;  %2139 = vmatmul.msk.bf16.vlgmr.msrb.gmra.mxu3 %vm453_vm1, %v1741_v60 }
 0xbb9   : > { %2061 = vmatpush.bf16.xpose.msra.mxu0 %v2043_v29 }
 0xc1d   : > { %v1856_v61 = vpop.f32.mrf.mxu0 }
 0xc1e   : > { %v1857_v2 = vadd.f32 1e-09, %v1856_v61 }
 0xc20   : > { %2356 = vrcp.f32 %v1857_v2  ;;  %v1871_v21 = vand.u32 2147483648, %v1857_v2  ;;  %vm1865_vm4 = vweird.f32 %v1857_v2  ;;  %v1869_v15 = vand.u32 2147483647, %v1857_v2 }
 0xc22   : > { %v1872_v31 = vor.u32 1.1754944e-38, %v1871_v21  ;;  %vm1870_vm6 = vcmp.eq.f32.partialorder %v1869_v15, 8.507059e+37 }
 0xc25   : > { %v1858_v7 = vpop.f32.mrf.mxu0 }
 0xc26   : > { %v2357_v13 = vpop.eup %2356 }
 0xc27   : > { %v1861_v14 = vmul.f32 %v2357_v13, %v1857_v2  ;;  %vm1866_vm3 = vweird.f32 %v2357_v13 }
 0xc28   : > { %vm1867_vm5 = vmor %vm1865_vm4, %vm1866_vm3 }
 0xc29   : > { %v1862_v20 = vsub.f32 1.0, %v1861_v14 }
 0xc2b   : > { %v1863_v19 = vmul.f32 %v2357_v13, %v1862_v20 }
 0xc2d   : > { %v1864_v11 = vadd.f32 %v2357_v13, %v1863_v19 }
 0xc2f   : > { %v1868_v6 = vsel %vm1867_vm5, %v2357_v13, %v1864_v11 }
 0xc30   : > { %v1873_v4 = vsel %vm1870_vm6, %v1872_v31, %v1868_v6 }
 0xc38   : > { %v1754_v42 = vpop.f32.mrf.mxu2  ;;  %v1779_v45 = vpop.f32.mrf.mxu3 }
 0xc39   : > { %v1783_v32 = vmul.f32 %v1754_v42, %v3535_v46  ;;  %v1786_v35 = vmul.f32 %v1779_v45, %v3535_v46 }
 0xc3b   : > { %v1784_v10 = vsub.f32 %v3532_v63, %v1783_v32  ;;  %v1787_v43 = vsel %vm582_vm14, %v1786_v35, 0.0 }
 0xc3c   : > { %1788 = vadd.xlane.f32.xlu2 %v1787_v43 }
 0xc3d   : > { %v1785_v39 = vmax.f32 %v1784_v10, 0.0 }
 0xc3f   : > { %v1874_v3 = vmul.f32 %v1873_v4, %v1785_v39 }
 0xc40   : > { %v1756_v37 = vpop.f32.mrf.mxu2  ;;  %v1781_v17 = vpop.f32.mrf.mxu3 }
 0xc41   : > { %v1875_v26 = vpack.c.bf16 %v1874_v3, %v1874_v3 }
 0xc43   : > { %2141 = vmatmul.msk.bf16.vlgmr.msra.gmra.mxu1 %vm498_vm8, %v1875_v26 }
 0xcc0   : > { %v1888_v12 = vpop.f32.mrf.mxu1 }
 0xcc1   : > { %v1892_v46 = vmul.f32 %v1888_v12, %v3558_v8 }
 0xcc3   : > { %v1893_v54 = vadd.f32 1e-09, %v1892_v46  ;;  %v1911_v63 = vsub.f32 %v3558_v8, %v1892_v46 }
 0xcc5   : > { %2358 = vrcp.f32 %v1893_v54  ;;  %v3588_v41 = vmax.f32 %v1911_v63, 0.0  ;;  %v1905_v36 = vand.u32 2147483648, %v1893_v54  ;;  %v1903_v33 = vand.u32 2147483647, %v1893_v54  ;;  %v757_v63 = vpop.xlane.xlu2 %756 }
 0xcc6   : > { %vm1899_vm9 = vweird.f32 %v1893_v54 }
 0xcc7   : > { %v1967_v48 = vpack.c.bf16 %v3588_v41, %v3588_v41  ;;  %v1906_v30 = vor.u32 1.1754944e-38, %v1905_v36  ;;  %vm1904_vm11 = vcmp.eq.f32.partialorder %v1903_v33, 8.507059e+37 }
 0xcc8   : > { %v1890_v52 = vpop.f32.mrf.mxu1 }
 0xcc9   : > { %2144 = vmatmul.msk.bf16.vlgmr.msra.gmra.mxu3 %vm453_vm1, %v1967_v48  ;;  %v585_v48 = vpop.xlane.xlu1 %584 }
 0xcca   : > { %v758_v36 = vadd.f32 %v757_v63, %v585_v48 }
 0xccb   : > { %v2359_v56 = vpop.eup %2358 }
 0xccc   : > { %v1895_v1 = vmul.f32 %v2359_v56, %v1893_v54  ;;  %vm1900_vm7 = vweird.f32 %v2359_v56 }
 0xccd   : > { %vm1901_vm10 = vmor %vm1899_vm9, %vm1900_vm7  ;;  %v1101_v52 = vpop.xlane.xlu2 %1100 }
 0xcce   : > { %v1896_v18 = vsub.f32 1.0, %v1895_v1  ;;  %v929_v1 = vpop.xlane.xlu0 %928 }
 0xcd0   : > { %v1897_v44 = vmul.f32 %v2359_v56, %v1896_v18 }
 0xcd2   : > { %v1898_v28 = vadd.f32 %v2359_v56, %v1897_v44  ;;  %v930_v44 = vadd.f32 %v929_v1, %v758_v36 }
 0xcd4   : > { %v1902_v57 = vsel %vm1901_vm10, %v2359_v56, %v1898_v28  ;;  %v1273_v56 = vpop.xlane.xlu1 %1272 }
 0xcd5   : > { %v1907_v53 = vsel %vm1904_vm11, %v1906_v30, %v1902_v57  ;;  %v1445_v18 = vpop.xlane.xlu2 %1444 }
 0xcd6   : > { %v1908_v5 = vmul.f32 %v1907_v53, %v3558_v8 }
 0xcd8   : > { %v1909_v27 = vmin.f32 %v1908_v5, 1.0 }
 0xcda   : > { %v1910_v34 = vmul.f32 %v1909_v27, %v3558_v8 }
 0xcdc   : > { %v1913_v0 = vpack.c.bf16 %v1910_v34, %v1910_v34  ;;  %v1617_v33 = vpop.xlane.xlu1 %1616 }
 0xcdd   : > { %v1789_v30 = vpop.xlane.xlu2 %1788 }
 0xcde   : > { %2142 = vmatmul.msk.bf16.vlgmr.msrb.gmra.mxu1 %vm453_vm1, %v1913_v0  ;;  %2143 = vmatmul.msk.bf16.vlgmr.msrb.gmra.mxu2 %vm453_vm1, %v1913_v0 }
 0xd4c   : > { %v1983_v62 = vpop.f32.mrf.mxu3 }
 0xd4d   : > { %v1984_v9 = vadd.f32 1e-09, %v1983_v62 }
 0xd4f   : > { %2360 = vrcp.f32 %v1984_v9  ;;  %v1998_v38 = vand.u32 2147483648, %v1984_v9  ;;  %v1996_v58 = vand.u32 2147483647, %v1984_v9  ;;  %vm1992_vm13 = vweird.f32 %v1984_v9 }
 0xd51   : > { %v1999_v16 = vor.u32 1.1754944e-38, %v1998_v38  ;;  %vm1997_vm0 = vcmp.eq.f32.partialorder %v1996_v58, 8.507059e+37 }
 0xd54   : > { %v1985_v50 = vpop.f32.mrf.mxu3 }
 0xd55   : > { %v2361_v23 = vpop.eup %2360 }
 0xd56   : > { %v1988_v24 = vmul.f32 %v2361_v23, %v1984_v9  ;;  %vm1993_vm12 = vweird.f32 %v2361_v23 }
 0xd57   : > { %vm1994_vm15 = vmor %vm1992_vm13, %vm1993_vm12 }
 0xd58   : > { %v1989_v25 = vsub.f32 1.0, %v1988_v24 }
 0xd5a   : > { %v1990_v40 = vmul.f32 %v2361_v23, %v1989_v25 }
 0xd5b   : > { %v1926_v49 = vpop.f32.mrf.mxu1 }
 0xd5c   : > { %v1955_v59 = vmul.f32 %v1926_v49, %v1874_v3  ;;  %v1991_v60 = vadd.f32 %v2361_v23, %v1990_v40 }
 0xd5e   : > { %v1956_v8 = vsub.f32 %v1785_v39, %v1955_v59  ;;  %v1995_v22 = vsel %vm1994_vm15, %v2361_v23, %v1991_v60 }
 0xd5f   : > { %v2000_v29 = vsel %vm1997_vm0, %v1999_v16, %v1995_v22 }
 0xd60   : > { %v1957_v47 = vmax.f32 %v1956_v8, 0.0 }
 0xd61   : > { %v1951_v61 = vpop.f32.mrf.mxu2 }
 0xd62   : > { %v2001_v2 = vmul.f32 %v2000_v29, %v1957_v47  ;;  %v1958_v55 = vmul.f32 %v1951_v61, %v1874_v3 }
 0xd63   : > { %v1928_v51 = vpop.f32.mrf.mxu1 }
 0xd64   : > { %v2002_v7 = vpack.c.bf16 %v2001_v2, %v2001_v2  ;;  %v1959_v13 = vsel %vm582_vm14, %v1958_v55, 0.0 }
 0xd65   : > { %1960 = vadd.xlane.f32.xlu1 %v1959_v13 }
 0xd66   : > { %2145 = vmatmul.msk.bf16.vlgmr.msrb.gmra.mxu0 %vm498_vm8, %v2002_v7 }
 0xd69   : > { %v1953_v14 = vpop.f32.mrf.mxu2 }
 0xdd8   : > { %v1961_v5 = vpop.xlane.xlu1 %1960 }
 0xde3   : > { %v2015_v20 = vpop.f32.mrf.mxu0 }
 0xde4   : > { %v2019_v19 = vmul.f32 %v2015_v20, %v3588_v41 }
 0xde6   : > { %v2020_v11 = vadd.f32 1e-09, %v2019_v19 }
 0xde8   : > { %2362 = vrcp.f32 %v2020_v11  ;;  %v2032_v15 = vand.u32 2147483648, %v2020_v11  ;;  %v2030_v10 = vand.u32 2147483647, %v2020_v11  ;;  %vm2026_vm3 = vweird.f32 %v2020_v11 }
 0xdea   : > { %v2033_v43 = vor.u32 1.1754944e-38, %v2032_v15  ;;  %vm2031_vm8 = vcmp.eq.f32.partialorder %v2030_v10, 8.507059e+37 }
 0xdeb   : > { %v2017_v42 = vpop.f32.mrf.mxu0 }
 0xdee   : > { %v2363_v21 = vpop.eup %2362 }
 0xdef   : > { %v2022_v45 = vmul.f32 %v2363_v21, %v2020_v11  ;;  %vm2027_vm2 = vweird.f32 %v2363_v21 }
 0xdf0   : > { %vm2028_vm4 = vmor %vm2026_vm3, %vm2027_vm2 }
 0xdf1   : > { %v2023_v32 = vsub.f32 1.0, %v2022_v45 }
 0xdf3   : > { %v2024_v35 = vmul.f32 %v2363_v21, %v2023_v32 }
 0xdf5   : > { %v2025_v6 = vadd.f32 %v2363_v21, %v2024_v35 }
 0xdf7   : > { %v2029_v31 = vsel %vm2028_vm4, %v2363_v21, %v2025_v6 }
 0xdf8   : > { %v2034_v39 = vsel %vm2031_vm8, %v2033_v43, %v2029_v31 }
 0xdf9   : > { %v2035_v4 = vmul.f32 %v2034_v39, %v3588_v41 }
 0xdfb   : > { %v2036_v3 = vmin.f32 %v2035_v4, 1.0 }
 0xdfd   : > { %v2037_v37 = vmul.f32 %v2036_v3, %v3588_v41  ;;  %v1102_v41 = vadd.f32 %v1101_v52, %v930_v44 }
 0xdff   : > { %v2038_v17 = vpack.c.bf16 %v2037_v37, %v2037_v37  ;;  %v1274_v28 = vadd.f32 %v1273_v56, %v1102_v41 }
 0xe01   : > { %2146 = vmatmul.msk.bf16.vlgmr.msra.gmra.mxu0 %vm453_vm1, %v2038_v17  ;;  %v1446_v57 = vadd.f32 %v1445_v18, %v1274_v28  ;;  %vm2073_vm1 = vcmask 0  }
 0xe03   : > { %v1618_v53 = vadd.f32 %v1617_v33, %v1446_v57 }
 0xe05   : > { %v1790_v27 = vadd.f32 %v1789_v30, %v1618_v53 }
 0xe07   : > { %v1962_v34 = vadd.f32 %v1961_v5, %v1790_v27 }
 0xe7e   : > { %v2063_v26 = vpop.f32.mrf.mxu0 }
 0xe7f   : > { %v2067_v12 = vmul.f32 %v2063_v26, %v2001_v2 }
 0xe81   : > { %v2068_v46 = vsel %vm582_vm14, %v2067_v12, 0.0 }
 0xe82   : > { %2069 = vadd.xlane.f32.xlu2 %v2068_v46 }
 0xe86   : > { %v2065_v54 = vpop.f32.mrf.mxu0 }
 0xef4   :  { %18 = sbr.rel (!%p16_p0) target bundleno = 1 (0x1), region = 38 }
 0xef5   : > { %v2070_v0 = vpop.xlane.xlu2 %2069 }
 0xef6   : > { %v2071_v62 = vadd.f32 %v2070_v0, %v1962_v34 }
 0xef8   : > { %2074 = vst.msk [vmem:[%s2072_s19] sm:$0x1] %vm2073_vm1, %v2071_v62 }

</bundles_post_ra>
